<compile_context>
chip_gen: v6e
topology: v6e:2x2x1
jax: 0.10.0
libtpu: 0.0.40
codegen_flags: <defaults>
</compile_context>

<pallas_src>
import jax
import jax.numpy as jnp
from jax.experimental import pallas as pl
from jax.experimental.pallas import tpu as pltpu


def mlp_kernel(x_ref, w1_ref, b1_ref, w2_ref, b2_ref, w3_ref, b3_ref, o_ref):
    # fc1 + ReLU: bf16 MXU matmul, f32 accumulate, f32 elementwise.
    h1 = jnp.dot(x_ref[...], w1_ref[...], preferred_element_type=jnp.float32)
    h1 = jnp.maximum(h1 + b1_ref[...], 0.0)

    # fc2 + ReLU.
    h2 = jnp.dot(h1.astype(jnp.bfloat16), w2_ref[...],
                 preferred_element_type=jnp.float32)
    h2 = jnp.maximum(h2 + b2_ref[...], 0.0)

    # fc3 (output width 1): VPU multiply + XLU lane-reduce instead of pushing
    # a 1024-deep, 1-wide weight through the MXU.
    w3_row = w3_ref[...].astype(jnp.float32)                 # (1, 1024)
    logits = jnp.sum(h2 * w3_row, axis=-1, keepdims=True) + b3_ref[...]
    o_ref[...] = jax.nn.sigmoid(logits)


def _round_up(x, m):
    return ((x + m - 1) // m) * m


def model_downstream(x, w1, b1, w2, b2, w3, b3, *, block_b=None):
    """x: [B, F_in] f32; w_k: [F_in_k, F_out_k] f32; b_k: [1, F_out_k] f32."""
    B, f_in = x.shape
    h1_dim = w1.shape[1]          # 512
    h2_dim = w2.shape[1]          # 1024
    out_dim = w3.shape[1]         # 1

    # Batch tile: biggest that comfortably fits VMEM, amortizing the ~0.35us
    # per-grid-step overhead, while keeping >=2 grid steps once B >= 1024 so
    # v7x's two TensorCores can both be engaged.
    if block_b is None:
        if B >= 4096:
            block_b = 1024
        elif B >= 512:
            block_b = 512
        elif B >= 128:
            block_b = 128
        else:
            block_b = max(8, _round_up(B, 8))

    b_pad = _round_up(B, block_b)
    if b_pad != B:
        x = jnp.pad(x, ((0, b_pad - B), (0, 0)))
    n_tiles = b_pad // block_b

    # Halve HBM traffic: x and weights in bf16 (matmul accumulates f32),
    # biases stay f32.
    x_bf = x.astype(jnp.bfloat16)
    w1_bf = w1.astype(jnp.bfloat16)
    w2_bf = w2.astype(jnp.bfloat16)
    w3_bf = w3.reshape(1, h2_dim).astype(jnp.bfloat16)   # row layout for VPU reduce

    # With block_b >= 512 the f32 intermediates reach ~7-13 MiB; raise the
    # scoped VMEM limit explicitly (v5e defaults to 16 MiB) but keep headroom.
    vmem_limit = 32 * 1024 * 1024 if block_b >= 512 else None

    def _call(single_buffer_weights):
        if single_buffer_weights:
            # Constant index_map -> fetched once; single buffer frees ~1.1 MiB VMEM.
            const = lambda shape: pl.BlockSpec(shape, lambda i: (0, 0),
                                               pipeline_mode=pl.Buffered(1))
        else:
            const = lambda shape: pl.BlockSpec(shape, lambda i: (0, 0))

        return pl.pallas_call(
            mlp_kernel,
            out_shape=jax.ShapeDtypeStruct((b_pad, out_dim), jnp.float32),
            grid=(n_tiles,),
            in_specs=[
                pl.BlockSpec((block_b, f_in), lambda i: (i, 0)),   # x: streamed
                const((f_in, h1_dim)),                             # w1: VMEM-resident
                const((1, h1_dim)),                                # b1
                const((h1_dim, h2_dim)),                           # w2: VMEM-resident
                const((1, h2_dim)),                                # b2
                const((1, h2_dim)),                                # w3 (as a row)
                const((1, out_dim)),                               # b3
            ],
            out_specs=pl.BlockSpec((block_b, out_dim), lambda i: (i, 0)),
            compiler_params=pltpu.CompilerParams(
                dimension_semantics=("parallel",),
                vmem_limit_bytes=vmem_limit),
        )(x_bf, w1_bf, b1, w2_bf, b2, w3_bf, b3)

    try:
        out = _call(True)
    except Exception:  # fallback: default double-buffered constants
        out = _call(False)

    return out[:B]


def init_linear(key, fan_in, fan_out):
    # Mimic PyTorch nn.Linear default init: U(-1/sqrt(fan_in), 1/sqrt(fan_in))
    kw, kb = jax.random.split(key)
    bound = 1.0 / jnp.sqrt(jnp.float32(fan_in))
    w = jax.random.uniform(kw, (fan_in, fan_out), jnp.float32, -bound, bound)
    b = jax.random.uniform(kb, (1, fan_out), jnp.float32, -bound, bound)
    return w, b


if __name__ == "__main__":
    key = jax.random.PRNGKey(0)
    k_x, k1, k2, k3 = jax.random.split(key, 4)

    num_feat_in = 32   # input feature size
    w1, b1 = init_linear(k1, num_feat_in, 512)
    w2, b2 = init_linear(k2, 512, 1024)
    w3, b3 = init_linear(k3, 1024, 1)

    f32 = jnp.float32

    def mixed_precision_ref(x):
        # Same mixed precision as the kernel: bf16 matmul operands, f32
        # accumulate / elementwise.
        w1b = w1.astype(jnp.bfloat16).astype(f32)
        w2b = w2.astype(jnp.bfloat16).astype(f32)
        w3b = w3.astype(jnp.bfloat16).astype(f32).reshape(1, -1)
        xb = x.astype(jnp.bfloat16).astype(f32)
        h1 = jnp.maximum(xb @ w1b + b1, 0.0)
        h2 = jnp.maximum(h1.astype(jnp.bfloat16).astype(f32) @ w2b + b2, 0.0)
        return jax.nn.sigmoid(jnp.sum(h2 * w3b, axis=-1, keepdims=True) + b3)

    def f32_ref(x):
        return jax.nn.sigmoid(
            jnp.maximum(jnp.maximum(x @ w1 + b1, 0.0) @ w2 + b2, 0.0) @ w3 + b3)

    # Small-batch path (single grid step).
    x_small = jax.random.normal(k_x, (8, num_feat_in), jnp.float32)
    out_small = jax.block_until_ready(
        model_downstream(x_small, w1, b1, w2, b2, w3, b3))
    assert out_small.shape == (8, 1)
    assert jnp.allclose(out_small, mixed_precision_ref(x_small),
                        atol=1e-3, rtol=1e-3), float(
        jnp.max(jnp.abs(out_small - mixed_precision_ref(x_small))))
    assert jnp.max(jnp.abs(out_small - f32_ref(x_small))) < 5e-2

    # Larger-batch path: exercises padding, multi-tile grid (block_b=512,
    # n_tiles=2), single-buffered constant weights and the raised VMEM limit.
    x_big = jax.random.normal(jax.random.fold_in(k_x, 1),
                              (600, num_feat_in), jnp.float32)
    out_big = jax.block_until_ready(
        model_downstream(x_big, w1, b1, w2, b2, w3, b3))
    assert out_big.shape == (600, 1)
    assert jnp.allclose(out_big, mixed_precision_ref(x_big),
                        atol=1e-3, rtol=1e-3), float(
        jnp.max(jnp.abs(out_big - mixed_precision_ref(x_big))))
    assert jnp.max(jnp.abs(out_big - f32_ref(x_big))) < 5e-2

    print("KERNEL_OK")
</pallas_src>

<mosaic_0001>
module attributes {stable_mosaic.version = 11 : i64} {
  func.func @mlp_kernel(%arg0: i32, %arg1: memref<8x32xbf16, #tpu.memory_space<vmem>>, %arg2: memref<32x512xbf16, #tpu.memory_space<vmem>>, %arg3: memref<1x512xf32, #tpu.memory_space<vmem>>, %arg4: memref<512x1024xbf16, #tpu.memory_space<vmem>>, %arg5: memref<1x1024xf32, #tpu.memory_space<vmem>>, %arg6: memref<1x1024xbf16, #tpu.memory_space<vmem>>, %arg7: memref<1x1xf32, #tpu.memory_space<vmem>>, %arg8: memref<8x1xf32, #tpu.memory_space<vmem>>) attributes {dimension_semantics = [#tpu.dimension_semantics<parallel>], iteration_bounds = array<i64: 1>, scalar_prefetch = 0 : i64, scratch_operands = 0 : i64, tpu.core_type = #tpu.core_type<tc>, window_params = [{transform_indices = @transform_0, window_bounds = array<i64: 8, 32>}, {pipeline_mode = #tpu.pipeline_mode<synchronous>, transform_indices = @transform_1, window_bounds = array<i64: 32, 512>}, {pipeline_mode = #tpu.pipeline_mode<synchronous>, transform_indices = @transform_2, window_bounds = array<i64: 1, 512>}, {pipeline_mode = #tpu.pipeline_mode<synchronous>, transform_indices = @transform_3, window_bounds = array<i64: 512, 1024>}, {pipeline_mode = #tpu.pipeline_mode<synchronous>, transform_indices = @transform_4, window_bounds = array<i64: 1, 1024>}, {pipeline_mode = #tpu.pipeline_mode<synchronous>, transform_indices = @transform_5, window_bounds = array<i64: 1, 1024>}, {pipeline_mode = #tpu.pipeline_mode<synchronous>, transform_indices = @transform_6, window_bounds = array<i64: 1, 1>}, {transform_indices = @transform_7, window_bounds = array<i64: 8, 1>}]} {
    %c0 = arith.constant 0 : index
    %c0_0 = arith.constant 0 : index
    %0 = vector.load %arg1[%c0, %c0_0] : memref<8x32xbf16, #tpu.memory_space<vmem>>, vector<8x32xbf16>
    %c0_1 = arith.constant 0 : index
    %c0_2 = arith.constant 0 : index
    %1 = vector.load %arg2[%c0_1, %c0_2] : memref<32x512xbf16, #tpu.memory_space<vmem>>, vector<32x512xbf16>
    %cst = arith.constant dense<0.000000e+00> : vector<8x512xf32>
    %2 = tpu.matmul %0, %1, %cst {dimension_numbers = #tpu.dot_dimension_numbers<[1], [0], [0], [1], [0, 0, 1, 1], [], []>} : vector<8x32xbf16>, vector<32x512xbf16>, vector<8x512xf32> -> vector<8x512xf32>
    %c0_3 = arith.constant 0 : index
    %c0_4 = arith.constant 0 : index
    %3 = vector.load %arg3[%c0_3, %c0_4] : memref<1x512xf32, #tpu.memory_space<vmem>>, vector<1x512xf32>
    %4 = vector.broadcast %3 : vector<1x512xf32> to vector<8x512xf32>
    %5 = arith.addf %2, %4 : vector<8x512xf32>
    %cst_5 = arith.constant 0.000000e+00 : f32
    %6 = vector.broadcast %cst_5 : f32 to vector<8x512xf32>
    %7 = arith.maximumf %5, %6 : vector<8x512xf32>
    %8 = arith.truncf %7 : vector<8x512xf32> to vector<8x512xbf16>
    %c0_6 = arith.constant 0 : index
    %c0_7 = arith.constant 0 : index
    %9 = vector.load %arg4[%c0_6, %c0_7] : memref<512x1024xbf16, #tpu.memory_space<vmem>>, vector<512x1024xbf16>
    %cst_8 = arith.constant dense<0.000000e+00> : vector<8x1024xf32>
    %10 = tpu.matmul %8, %9, %cst_8 {dimension_numbers = #tpu.dot_dimension_numbers<[1], [0], [0], [1], [0, 0, 1, 1], [], []>} : vector<8x512xbf16>, vector<512x1024xbf16>, vector<8x1024xf32> -> vector<8x1024xf32>
    %c0_9 = arith.constant 0 : index
    %c0_10 = arith.constant 0 : index
    %11 = vector.load %arg5[%c0_9, %c0_10] : memref<1x1024xf32, #tpu.memory_space<vmem>>, vector<1x1024xf32>
    %12 = vector.broadcast %11 : vector<1x1024xf32> to vector<8x1024xf32>
    %13 = arith.addf %10, %12 : vector<8x1024xf32>
    %cst_11 = arith.constant 0.000000e+00 : f32
    %14 = vector.broadcast %cst_11 : f32 to vector<8x1024xf32>
    %15 = arith.maximumf %13, %14 : vector<8x1024xf32>
    %c0_12 = arith.constant 0 : index
    %c0_13 = arith.constant 0 : index
    %16 = vector.load %arg6[%c0_12, %c0_13] : memref<1x1024xbf16, #tpu.memory_space<vmem>>, vector<1x1024xbf16>
    %17 = arith.extf %16 : vector<1x1024xbf16> to vector<1x1024xf32>
    %18 = vector.broadcast %17 : vector<1x1024xf32> to vector<8x1024xf32>
    %19 = arith.mulf %15, %18 : vector<8x1024xf32>
    %cst_14 = arith.constant dense<0.000000e+00> : vector<8xf32>
    %20 = vector.multi_reduction <add>, %19, %cst_14 [1] : vector<8x1024xf32> to vector<8xf32>
    %21 = vector.shape_cast %20 : vector<8xf32> to vector<8x1xf32>
    %c0_15 = arith.constant 0 : index
    %c0_16 = arith.constant 0 : index
    %22 = vector.load %arg7[%c0_15, %c0_16] : memref<1x1xf32, #tpu.memory_space<vmem>>, vector<1x1xf32>
    %23 = vector.broadcast %22 : vector<1x1xf32> to vector<8x1xf32>
    %24 = arith.addf %21, %23 : vector<8x1xf32>
    %25 = arith.negf %24 : vector<8x1xf32>
    %26 = math.exp %25 : vector<8x1xf32>
    %cst_17 = arith.constant 1.000000e+00 : f32
    %27 = vector.broadcast %cst_17 : f32 to vector<8x1xf32>
    %28 = arith.addf %27, %26 : vector<8x1xf32>
    %29 = arith.divf %27, %28 : vector<8x1xf32>
    %c0_18 = arith.constant 0 : index
    %c0_19 = arith.constant 0 : index
    %30 = vector.load %arg8[%c0_18, %c0_19] : memref<8x1xf32, #tpu.memory_space<vmem>>, vector<8x1xf32>
    tpu.vector_store %arg8[%c0_18, %c0_19], %29 {strides = array<i32>} : memref<8x1xf32, #tpu.memory_space<vmem>>, vector<8x1xf32>,
    return
  }
  func.func @transform_0(%arg0: i32) -> (i32, i32) {
    %c0_i32 = arith.constant 0 : i32
    %c0_i32_0 = arith.constant 0 : i32
    return %arg0, %c0_i32 : i32, i32
  }
  func.func @transform_1(%arg0: i32) -> (i32, i32) {
    %c0_i32 = arith.constant 0 : i32
    %c0_i32_0 = arith.constant 0 : i32
    %c0_i32_1 = arith.constant 0 : i32
    return %c0_i32, %c0_i32_0 : i32, i32
  }
  func.func @transform_2(%arg0: i32) -> (i32, i32) {
    %c0_i32 = arith.constant 0 : i32
    %c0_i32_0 = arith.constant 0 : i32
    %c0_i32_1 = arith.constant 0 : i32
    return %c0_i32, %c0_i32_0 : i32, i32
  }
  func.func @transform_3(%arg0: i32) -> (i32, i32) {
    %c0_i32 = arith.constant 0 : i32
    %c0_i32_0 = arith.constant 0 : i32
    %c0_i32_1 = arith.constant 0 : i32
    return %c0_i32, %c0_i32_0 : i32, i32
  }
  func.func @transform_4(%arg0: i32) -> (i32, i32) {
    %c0_i32 = arith.constant 0 : i32
    %c0_i32_0 = arith.constant 0 : i32
    %c0_i32_1 = arith.constant 0 : i32
    return %c0_i32, %c0_i32_0 : i32, i32
  }
  func.func @transform_5(%arg0: i32) -> (i32, i32) {
    %c0_i32 = arith.constant 0 : i32
    %c0_i32_0 = arith.constant 0 : i32
    %c0_i32_1 = arith.constant 0 : i32
    return %c0_i32, %c0_i32_0 : i32, i32
  }
  func.func @transform_6(%arg0: i32) -> (i32, i32) {
    %c0_i32 = arith.constant 0 : i32
    %c0_i32_0 = arith.constant 0 : i32
    %c0_i32_1 = arith.constant 0 : i32
    return %c0_i32, %c0_i32_0 : i32, i32
  }
  func.func @transform_7(%arg0: i32) -> (i32, i32) {
    %c0_i32 = arith.constant 0 : i32
    %c0_i32_0 = arith.constant 0 : i32
    return %arg0, %c0_i32 : i32, i32
  }
}

module attributes {stable_mosaic.version = 11 : i64} {
  func.func @mlp_kernel(%arg0: i32, %arg1: memref<8x32xbf16, #tpu.memory_space<vmem>>, %arg2: memref<32x512xbf16, #tpu.memory_space<vmem>>, %arg3: memref<1x512xf32, #tpu.memory_space<vmem>>, %arg4: memref<512x1024xbf16, #tpu.memory_space<vmem>>, %arg5: memref<1x1024xf32, #tpu.memory_space<vmem>>, %arg6: memref<1x1024xbf16, #tpu.memory_space<vmem>>, %arg7: memref<1x1xf32, #tpu.memory_space<vmem>>, %arg8: memref<8x1xf32, #tpu.memory_space<vmem>>) attributes {dimension_semantics = [#tpu.dimension_semantics<parallel>], iteration_bounds = array<i64: 1>, scalar_prefetch = 0 : i64, scratch_operands = 0 : i64, tpu.core_type = #tpu.core_type<tc>, window_params = [{transform_indices = @transform_0, window_bounds = array<i64: 8, 32>}, {pipeline_mode = #tpu.pipeline_mode<synchronous>, transform_indices = @transform_1, window_bounds = array<i64: 32, 512>}, {pipeline_mode = #tpu.pipeline_mode<synchronous>, transform_indices = @transform_2, window_bounds = array<i64: 1, 512>}, {pipeline_mode = #tpu.pipeline_mode<synchronous>, transform_indices = @transform_3, window_bounds = array<i64: 512, 1024>}, {pipeline_mode = #tpu.pipeline_mode<synchronous>, transform_indices = @transform_4, window_bounds = array<i64: 1, 1024>}, {pipeline_mode = #tpu.pipeline_mode<synchronous>, transform_indices = @transform_5, window_bounds = array<i64: 1, 1024>}, {pipeline_mode = #tpu.pipeline_mode<synchronous>, transform_indices = @transform_6, window_bounds = array<i64: 1, 1>}, {transform_indices = @transform_7, window_bounds = array<i64: 8, 1>}]} {
    %c0 = arith.constant 0 : index
    %c0_0 = arith.constant 0 : index
    %0 = vector.load %arg1[%c0, %c0_0] : memref<8x32xbf16, #tpu.memory_space<vmem>>, vector<8x32xbf16>
    %c0_1 = arith.constant 0 : index
    %c0_2 = arith.constant 0 : index
    %1 = vector.load %arg2[%c0_1, %c0_2] : memref<32x512xbf16, #tpu.memory_space<vmem>>, vector<32x512xbf16>
    %cst = arith.constant dense<0.000000e+00> : vector<8x512xf32>
    %2 = tpu.matmul %0, %1, %cst {dimension_numbers = #tpu.dot_dimension_numbers<[1], [0], [0], [1], [0, 0, 1, 1], [], []>} : vector<8x32xbf16>, vector<32x512xbf16>, vector<8x512xf32> -> vector<8x512xf32>
    %c0_3 = arith.constant 0 : index
    %c0_4 = arith.constant 0 : index
    %3 = vector.load %arg3[%c0_3, %c0_4] : memref<1x512xf32, #tpu.memory_space<vmem>>, vector<1x512xf32>
    %4 = vector.broadcast %3 : vector<1x512xf32> to vector<8x512xf32>
    %5 = arith.addf %2, %4 : vector<8x512xf32>
    %cst_5 = arith.constant 0.000000e+00 : f32
    %6 = vector.broadcast %cst_5 : f32 to vector<8x512xf32>
    %7 = arith.maximumf %5, %6 : vector<8x512xf32>
    %8 = arith.truncf %7 : vector<8x512xf32> to vector<8x512xbf16>
    %c0_6 = arith.constant 0 : index
    %c0_7 = arith.constant 0 : index
    %9 = vector.load %arg4[%c0_6, %c0_7] : memref<512x1024xbf16, #tpu.memory_space<vmem>>, vector<512x1024xbf16>
    %cst_8 = arith.constant dense<0.000000e+00> : vector<8x1024xf32>
    %10 = tpu.matmul %8, %9, %cst_8 {dimension_numbers = #tpu.dot_dimension_numbers<[1], [0], [0], [1], [0, 0, 1, 1], [], []>} : vector<8x512xbf16>, vector<512x1024xbf16>, vector<8x1024xf32> -> vector<8x1024xf32>
    %c0_9 = arith.constant 0 : index
    %c0_10 = arith.constant 0 : index
    %11 = vector.load %arg5[%c0_9, %c0_10] : memref<1x1024xf32, #tpu.memory_space<vmem>>, vector<1x1024xf32>
    %12 = vector.broadcast %11 : vector<1x1024xf32> to vector<8x1024xf32>
    %13 = arith.addf %10, %12 : vector<8x1024xf32>
    %cst_11 = arith.constant 0.000000e+00 : f32
    %14 = vector.broadcast %cst_11 : f32 to vector<8x1024xf32>
    %15 = arith.maximumf %13, %14 : vector<8x1024xf32>
    %c0_12 = arith.constant 0 : index
    %c0_13 = arith.constant 0 : index
    %16 = vector.load %arg6[%c0_12, %c0_13] : memref<1x1024xbf16, #tpu.memory_space<vmem>>, vector<1x1024xbf16>
    %17 = arith.extf %16 : vector<1x1024xbf16> to vector<1x1024xf32>
    %18 = vector.broadcast %17 : vector<1x1024xf32> to vector<8x1024xf32>
    %19 = arith.mulf %15, %18 : vector<8x1024xf32>
    %cst_14 = arith.constant dense<0.000000e+00> : vector<8xf32>
    %20 = vector.multi_reduction <add>, %19, %cst_14 [1] : vector<8x1024xf32> to vector<8xf32>
    %21 = vector.shape_cast %20 : vector<8xf32> to vector<8x1xf32>
    %c0_15 = arith.constant 0 : index
    %c0_16 = arith.constant 0 : index
    %22 = vector.load %arg7[%c0_15, %c0_16] : memref<1x1xf32, #tpu.memory_space<vmem>>, vector<1x1xf32>
    %23 = vector.broadcast %22 : vector<1x1xf32> to vector<8x1xf32>
    %24 = arith.addf %21, %23 : vector<8x1xf32>
    %25 = arith.negf %24 : vector<8x1xf32>
    %26 = math.exp %25 : vector<8x1xf32>
    %cst_17 = arith.constant 1.000000e+00 : f32
    %27 = vector.broadcast %cst_17 : f32 to vector<8x1xf32>
    %28 = arith.addf %27, %26 : vector<8x1xf32>
    %29 = arith.divf %27, %28 : vector<8x1xf32>
    %c0_18 = arith.constant 0 : index
    %c0_19 = arith.constant 0 : index
    %30 = vector.load %arg8[%c0_18, %c0_19] : memref<8x1xf32, #tpu.memory_space<vmem>>, vector<8x1xf32>
    tpu.vector_store %arg8[%c0_18, %c0_19], %29 {strides = array<i32>} : memref<8x1xf32, #tpu.memory_space<vmem>>, vector<8x1xf32>,
    return
  }
  func.func @transform_0(%arg0: i32) -> (i32, i32) {
    %c0_i32 = arith.constant 0 : i32
    %c0_i32_0 = arith.constant 0 : i32
    return %arg0, %c0_i32 : i32, i32
  }
  func.func @transform_1(%arg0: i32) -> (i32, i32) {
    %c0_i32 = arith.constant 0 : i32
    %c0_i32_0 = arith.constant 0 : i32
    %c0_i32_1 = arith.constant 0 : i32
    return %c0_i32, %c0_i32_0 : i32, i32
  }
  func.func @transform_2(%arg0: i32) -> (i32, i32) {
    %c0_i32 = arith.constant 0 : i32
    %c0_i32_0 = arith.constant 0 : i32
    %c0_i32_1 = arith.constant 0 : i32
    return %c0_i32, %c0_i32_0 : i32, i32
  }
  func.func @transform_3(%arg0: i32) -> (i32, i32) {
    %c0_i32 = arith.constant 0 : i32
    %c0_i32_0 = arith.constant 0 : i32
    %c0_i32_1 = arith.constant 0 : i32
    return %c0_i32, %c0_i32_0 : i32, i32
  }
  func.func @transform_4(%arg0: i32) -> (i32, i32) {
    %c0_i32 = arith.constant 0 : i32
    %c0_i32_0 = arith.constant 0 : i32
    %c0_i32_1 = arith.constant 0 : i32
    return %c0_i32, %c0_i32_0 : i32, i32
  }
  func.func @transform_5(%arg0: i32) -> (i32, i32) {
    %c0_i32 = arith.constant 0 : i32
    %c0_i32_0 = arith.constant 0 : i32
    %c0_i32_1 = arith.constant 0 : i32
    return %c0_i32, %c0_i32_0 : i32, i32
  }
  func.func @transform_6(%arg0: i32) -> (i32, i32) {
    %c0_i32 = arith.constant 0 : i32
    %c0_i32_0 = arith.constant 0 : i32
    %c0_i32_1 = arith.constant 0 : i32
    return %c0_i32, %c0_i32_0 : i32, i32
  }
  func.func @transform_7(%arg0: i32) -> (i32, i32) {
    %c0_i32 = arith.constant 0 : i32
    %c0_i32_0 = arith.constant 0 : i32
    return %arg0, %c0_i32 : i32, i32
  }
}

</mosaic_0001>

<bundles_post_ra>
// kernel: tpu_custom_call.1
= control target key start
LH: loop header
LB: loop body
LE: loop exit
PB: predicated region body
PF: predicated region fallthrough
CT: control target
= control target key end

     0   :  { %s2842_s0 = inlined_call_operand.hbm [shape: bf16[8,32], index: 0, kind: input, shape index: {}]   ;;  %s2843_s1 = inlined_call_operand.hbm [shape: bf16[32,512], index: 1, kind: input, shape index: {}]   ;;  %s2844_s2 = inlined_call_operand.hbm [shape: f32[1,512], index: 2, kind: input, shape index: {}]   ;;  %s2845_s3 = inlined_call_operand.hbm [shape: bf16[512,1024], index: 3, kind: input, shape index: {}]   ;;  %s2846_s4 = inlined_call_operand.vmem [shape: f32[1,1024], index: 4, kind: input, shape index: {}]   ;;  %s2847_s5 = inlined_call_operand.hbm [shape: bf16[1,1024], index: 5, kind: input, shape index: {}]   ;;  %s2848_s6 = inlined_call_operand.<no memory space> [shape: f32[1,1], index: 6, kind: input, shape index: {}]   ;;  %s2849_s7 = inlined_call_operand.vmem [shape: f32[8,1], index: 7, kind: output, shape index: {}]  }
   0x1   :  { %v12_v0 = vstv %s2848_s6 }
   0x2   :  { %13 = vst [vmem:[#allocation2] sm:$0x1] %v12_v0 }
   0x3   :  { %14 = vsyncpa [#allocation4], 0 }
   0x4   :  { %15 = vsyncpa [#allocation6], 0 }
   0x5   :  { %16 = vsyncpa [#allocation9], 0  ;;  %s2687_s26 = smov [#allocation5]  }
   0x6   :  { %s32_s27 = sshll.u32 %s2687_s26, 4  ;;  %s33_s27 = int_to_ptr.vmem [resolvable:$true] %s32_s27 }
   0x7   :  { %s2589_s28 = scalar_lea.vmem %s33_s27, 1024  ;;  %p2594_p1 = scmp.lt.s32.totalorder %s33_s27, %s33_s27 }
   0x8   :  { %p2590_p0 = scmp.ne.s32.totalorder %s33_s27, %s2589_s28  ;;  %p2595_p2 = scmp.lt.s32.totalorder %s2589_s28, %s2589_s28 }
   0xa   :  { %p2596_p3 = por %p2595_p2, %p2594_p1 }
   0xc   :  { %p2597_p4 = pnand %p2596_p3, %p2590_p0 }
   0xe   :  { %2600 = shalt.err (!%p2597_p4)
}
   0xf   :  { %s2688_s29 = smov 256   ;;  %s2689_s30 = smov 16  }
  0x10   :  { %38 = dma.hbm_to_vmem [thread:$0]  %s2843_s1, 1024, %s33_s27, [#allocation6], %s2688_s29, %s2688_s29, %s2689_s30  }
  0x11   :  { %s2690_s6 = smov [#allocation8]  }
  0x12   :  { %s54_s10 = sshll.u32 %s2690_s6, 4  ;;  %s55_s10 = int_to_ptr.vmem [resolvable:$true] %s54_s10 }
  0x13   :  { %s2609_s11 = scalar_lea.vmem %s55_s10, 32768  ;;  %p2614_p6 = scmp.lt.s32.totalorder %s55_s10, %s55_s10 }
  0x14   :  { %p2610_p5 = scmp.ne.s32.totalorder %s55_s10, %s2609_s11  ;;  %p2615_p7 = scmp.lt.s32.totalorder %s2609_s11, %s2609_s11 }
  0x16   :  { %p2616_p8 = por %p2615_p7, %p2614_p6 }
  0x18   :  { %p2617_p9 = pnand %p2616_p8, %p2610_p5 }
  0x1a   :  { %2620 = shalt.err (!%p2617_p9)
}
  0x1b   :  { %s2691_s12 = smov 512   ;;  %s2692_s13 = smov 32  }
  0x1c   :  { %60 = dma.hbm_to_vmem [thread:$0]  %s2845_s3, 32768, %s55_s10, [#allocation9], %s2691_s12, %s2691_s12, %s2692_s13  }
  0x1d   :  { %s2693_s16 = smov [#allocation3]   ;;  %s2694_s18 = smov [#allocation7]  }
  0x1e   :  { %s23_s17 = sshll.u32 %s2693_s16, 4  ;;  %s45_s1 = sshll.u32 %s2694_s18, 4  ;;  %s24_s17 = int_to_ptr.vmem [resolvable:$true] %s23_s17  ;;  %s46_s1 = int_to_ptr.vmem [resolvable:$true] %s45_s1 }
  0x1f   :  { %s2629_s19 = scalar_lea.vmem %s24_s17, 64  ;;  %p2634_p11 = scmp.lt.s32.totalorder %s24_s17, %s24_s17 }
  0x20   :  { %p2630_p10 = scmp.ne.s32.totalorder %s24_s17, %s2629_s19  ;;  %p2635_p12 = scmp.lt.s32.totalorder %s2629_s19, %s2629_s19 }
  0x22   :  { %p2636_p13 = por %p2635_p12, %p2634_p11 }
  0x24   :  { %p2637_p0 = pnand %p2636_p13, %p2630_p10 }
  0x26   :  { %2640 = shalt.err (!%p2637_p0)
}
  0x27   :  { %26 = dma.hbm_to_vmem [thread:$0]  %s2842_s0, 64, %s24_s17, [#allocation4]  }
  0x28   :  { %s2649_s22 = scalar_lea.vmem %s46_s1, 64  ;;  %p2654_p2 = scmp.lt.s32.totalorder %s46_s1, %s46_s1 }
  0x29   :  { %p2650_p1 = scmp.ne.s32.totalorder %s46_s1, %s2649_s22  ;;  %p2655_p3 = scmp.lt.s32.totalorder %s2649_s22, %s2649_s22 }
  0x2b   :  { %p2656_p4 = por %p2655_p3, %p2654_p2 }
  0x2d   :  { %p2657_p5 = pnand %p2656_p4, %p2650_p1 }
  0x2f   :  { %2660 = shalt.err (!%p2657_p5)
}
  0x30   :  { %48 = dma.hbm_to_vmem [thread:$0]  %s2844_s2, 64, %s46_s1, [#allocation6]  }
  0x31   :  { %s2695_s24 = smov [#allocation10]  }
  0x32   :  { %s69_s25 = sshll.u32 %s2695_s24, 4  ;;  %s70_s25 = int_to_ptr.vmem [resolvable:$true] %s69_s25 }
  0x33   :  { %s2669_s26 = scalar_lea.vmem %s70_s25, 128  ;;  %p2674_p7 = scmp.lt.s32.totalorder %s70_s25, %s70_s25 }
  0x34   :  { %p2670_p6 = scmp.ne.s32.totalorder %s70_s25, %s2669_s26  ;;  %p2675_p8 = scmp.lt.s32.totalorder %s2669_s26, %s2669_s26 }
  0x36   :  { %p2676_p9 = por %p2675_p8, %p2674_p7 }
  0x38   :  { %p2677_p10 = pnand %p2676_p9, %p2670_p6 }
  0x3a   :  { %2680 = shalt.err (!%p2677_p10)
}
  0x3b   :  { %72 = dma.hbm_to_vmem [thread:$0]  %s2847_s5, 128, %s70_s25, [#allocation9]  }
  0x3c   :  { %2681 = dma.done.wait [#allocation4], 64  }
  0x3d   :  { %2682 = vsyncadd [#allocation4], 4294967232 }
  0x3e   :  { %2683 = dma.done.wait [#allocation6], 1088  }
  0x3f   :  { %2684 = vsyncadd [#allocation6], 4294966208 }
  0x40   :  { %2685 = dma.done.wait [#allocation9], 32896  }
  0x41   :  { %2686 = vsyncadd [#allocation9], 4294934400  ;;  %v2696_v1 = vmov 0   ;;  %v2565_v2 = vld [vmem:[#allocation5 + $0x24] ss:$16 sps:$4 sm:$0xff]   ;;  %vm162_vm0 = vcmask 261120  }
  0x42   :  { %198 = vmatprep.mubr.bf16.mxu0 %v2696_v1  ;;  %239 = vmatprep.mubr.bf16.mxu1 %v2696_v1  ;;  %v2567_v3 = vld [vmem:[#allocation5 + $0x2c] ss:$16 sps:$4 sm:$0xff]   ;;  %v2569_v4 = vld [vmem:[#allocation5 + $0x20] ss:$16 sps:$4 sm:$0xff]   ;;  %v2570_v5 = vld [vmem:[#allocation5 + $0x28] ss:$16 sps:$4 sm:$0xff]  }
  0x43   :  { %178 = vmatprep.subr.bf16.mxu0 %v2565_v2  ;;  %219 = vmatprep.subr.bf16.mxu1 %v2567_v3  ;;  %v2571_v6 = vld [vmem:[#allocation5 + $0x4] ss:$16 sps:$4 sm:$0xff]   ;;  %v2573_v7 = vld [vmem:[#allocation5 + $0xc] ss:$16 sps:$4 sm:$0xff]   ;;  %v2575_v8 = vld [vmem:[#allocation5] ss:$16 sps:$4 sm:$0xff]  }
  0x44   :  { %179 = vmatpush1.bf16.msra.mxu0 %v2569_v4  ;;  %220 = vmatpush1.bf16.msra.mxu1 %v2570_v5  ;;  %v2576_v9 = vld [vmem:[#allocation5 + $0x8] ss:$16 sps:$4 sm:$0xff]   ;;  %v91_v19 = vld [vmem:[#allocation3] sm:$0xf]  ;;  %vm2278_vm1 = vcmask 7168  }
  0x45   :  { %180 = vmatprep.subr.bf16.mxu0 %v2571_v6  ;;  %v312_v10 = vld [vmem:[#allocation8 + $0x1c0] sm:$0xff]  ;;  %221 = vmatprep.subr.bf16.mxu1 %v2573_v7 }
  0x46   :  { %v316_v11 = vld [vmem:[#allocation8 + $0x1e0] sm:$0xff] }
  0x47   :  { %v440_v12 = vld [vmem:[#allocation8 + $0x5c0] sm:$0xff]  ;;  %v2354_v14 = vcombine.high %v312_v10, %v316_v11  ;;  %v2353_v20 = vcombine.low %v312_v10, %v316_v11 }
  0x48   :  { %v444_v13 = vld [vmem:[#allocation8 + $0x5e0] sm:$0xff]  ;;  %181 = vmatpush1.bf16.msra.mxu0 %v2575_v8  ;;  %222 = vmatpush1.bf16.msra.mxu1 %v2576_v9 }
  0x49   :  { %v2482_v15 = vcombine.high %v440_v12, %v444_v13  ;;  %v304_v16 = vld [vmem:[#allocation8 + $0x180] sm:$0xff]  ;;  %v2481_v21 = vcombine.low %v440_v12, %v444_v13  ;;  %1834 = vmatprep.subr.bf16.mxu0 %v2354_v14 }
  0x4a   :  { %v308_v17 = vld [vmem:[#allocation8 + $0x1a0] sm:$0xff] }
  0x4b   :  { %v432_v18 = vld [vmem:[#allocation8 + $0x580] sm:$0xff]  ;;  %1875 = vmatprep.subr.bf16.mxu1 %v2482_v15  ;;  %v2346_v23 = vcombine.high %v304_v16, %v308_v17  ;;  %2295 = vmatmul.mubr.msk.bf16.vlgmr.msra.gmra.mxu0 %vm162_vm0, %v91_v19  ;;  %v2345_v29 = vcombine.low %v304_v16, %v308_v17 }
  0x4c   :  { %v436_v22 = vld [vmem:[#allocation8 + $0x5a0] sm:$0xff]  ;;  %2296 = vmatmul.mubr.msk.bf16.vlgmr.msra.gmra.mxu1 %vm162_vm0, %v91_v19  ;;  %1835 = vmatpush1.bf16.msra.mxu0 %v2353_v20 }
  0x4d   :  { %v2474_v24 = vcombine.high %v432_v18, %v436_v22  ;;  %v296_v25 = vld [vmem:[#allocation8 + $0x140] sm:$0xff]  ;;  %1876 = vmatpush1.bf16.msra.mxu1 %v2481_v21  ;;  %v2473_v30 = vcombine.low %v432_v18, %v436_v22  ;;  %1836 = vmatprep.subr.bf16.mxu0 %v2346_v23 }
  0x4e   :  { %v300_v26 = vld [vmem:[#allocation8 + $0x160] sm:$0xff] }
  0x4f   :  { %v424_v27 = vld [vmem:[#allocation8 + $0x540] sm:$0xff]  ;;  %1877 = vmatprep.subr.bf16.mxu1 %v2474_v24  ;;  %v2338_v31 = vcombine.high %v296_v25, %v300_v26  ;;  %v2337_v37 = vcombine.low %v296_v25, %v300_v26 }
  0x50   :  { %v428_v28 = vld [vmem:[#allocation8 + $0x560] sm:$0xff]  ;;  %1837 = vmatpush1.bf16.msra.mxu0 %v2345_v29 }
  0x51   :  { %v2466_v32 = vcombine.high %v424_v27, %v428_v28  ;;  %v288_v33 = vld [vmem:[#allocation8 + $0x100] sm:$0xff]  ;;  %1878 = vmatpush1.bf16.msra.mxu1 %v2473_v30  ;;  %v2465_v38 = vcombine.low %v424_v27, %v428_v28  ;;  %1838 = vmatprep.subr.bf16.mxu0 %v2338_v31 }
  0x52   :  { %v292_v34 = vld [vmem:[#allocation8 + $0x120] sm:$0xff] }
  0x53   :  { %v416_v35 = vld [vmem:[#allocation8 + $0x500] sm:$0xff]  ;;  %1879 = vmatprep.subr.bf16.mxu1 %v2466_v32  ;;  %v2330_v39 = vcombine.high %v288_v33, %v292_v34  ;;  %v2329_v45 = vcombine.low %v288_v33, %v292_v34 }
  0x54   :  { %v420_v36 = vld [vmem:[#allocation8 + $0x520] sm:$0xff]  ;;  %1839 = vmatpush1.bf16.msra.mxu0 %v2337_v37 }
  0x55   :  { %v2458_v40 = vcombine.high %v416_v35, %v420_v36  ;;  %v280_v41 = vld [vmem:[#allocation8 + $0xc0] sm:$0xff]  ;;  %1880 = vmatpush1.bf16.msra.mxu1 %v2465_v38  ;;  %v2457_v46 = vcombine.low %v416_v35, %v420_v36  ;;  %1840 = vmatprep.subr.bf16.mxu0 %v2330_v39 }
  0x56   :  { %v284_v42 = vld [vmem:[#allocation8 + $0xe0] sm:$0xff] }
  0x57   :  { %v408_v43 = vld [vmem:[#allocation8 + $0x4c0] sm:$0xff]  ;;  %1881 = vmatprep.subr.bf16.mxu1 %v2458_v40  ;;  %v2322_v47 = vcombine.high %v280_v41, %v284_v42  ;;  %v2321_v53 = vcombine.low %v280_v41, %v284_v42 }
  0x58   :  { %v412_v44 = vld [vmem:[#allocation8 + $0x4e0] sm:$0xff]  ;;  %1841 = vmatpush1.bf16.msra.mxu0 %v2329_v45 }
  0x59   :  { %v2450_v48 = vcombine.high %v408_v43, %v412_v44  ;;  %v272_v49 = vld [vmem:[#allocation8 + $0x80] sm:$0xff]  ;;  %1882 = vmatpush1.bf16.msra.mxu1 %v2457_v46  ;;  %v2449_v54 = vcombine.low %v408_v43, %v412_v44  ;;  %1842 = vmatprep.subr.bf16.mxu0 %v2322_v47 }
  0x5a   :  { %v276_v50 = vld [vmem:[#allocation8 + $0xa0] sm:$0xff] }
  0x5b   :  { %v400_v51 = vld [vmem:[#allocation8 + $0x480] sm:$0xff]  ;;  %1883 = vmatprep.subr.bf16.mxu1 %v2450_v48  ;;  %v2314_v55 = vcombine.high %v272_v49, %v276_v50  ;;  %v2313_v61 = vcombine.low %v272_v49, %v276_v50 }
  0x5c   :  { %v404_v52 = vld [vmem:[#allocation8 + $0x4a0] sm:$0xff]  ;;  %1843 = vmatpush1.bf16.msra.mxu0 %v2321_v53 }
  0x5d   :  { %v2442_v56 = vcombine.high %v400_v51, %v404_v52  ;;  %v264_v57 = vld [vmem:[#allocation8 + $0x40] sm:$0xff]  ;;  %1884 = vmatpush1.bf16.msra.mxu1 %v2449_v54  ;;  %v2441_v62 = vcombine.low %v400_v51, %v404_v52  ;;  %1844 = vmatprep.subr.bf16.mxu0 %v2314_v55 }
  0x5e   :  { %v268_v58 = vld [vmem:[#allocation8 + $0x60] sm:$0xff] }
  0x5f   :  { %v392_v59 = vld [vmem:[#allocation8 + $0x440] sm:$0xff]  ;;  %1885 = vmatprep.subr.bf16.mxu1 %v2442_v56  ;;  %v2306_v63 = vcombine.high %v264_v57, %v268_v58  ;;  %v2305_v5 = vcombine.low %v264_v57, %v268_v58 }
  0x60   :  { %v396_v60 = vld [vmem:[#allocation8 + $0x460] sm:$0xff]  ;;  %1845 = vmatpush1.bf16.msra.mxu0 %v2313_v61 }
  0x61   :  { %v2434_v0 = vcombine.high %v392_v59, %v396_v60  ;;  %v256_v1 = vld [vmem:[#allocation8] sm:$0xff]  ;;  %1886 = vmatpush1.bf16.msra.mxu1 %v2441_v62  ;;  %v2433_v6 = vcombine.low %v392_v59, %v396_v60  ;;  %1846 = vmatprep.subr.bf16.mxu0 %v2306_v63 }
  0x62   :  { %v260_v2 = vld [vmem:[#allocation8 + $0x20] sm:$0xff] }
  0x63   :  { %v384_v3 = vld [vmem:[#allocation8 + $0x400] sm:$0xff]  ;;  %1887 = vmatprep.subr.bf16.mxu1 %v2434_v0  ;;  %v2298_v7 = vcombine.high %v256_v1, %v260_v2  ;;  %v2297_v13 = vcombine.low %v256_v1, %v260_v2 }
  0x64   :  { %v388_v4 = vld [vmem:[#allocation8 + $0x420] sm:$0xff]  ;;  %1847 = vmatpush1.bf16.msra.mxu0 %v2305_v5 }
  0x65   :  { %v2426_v8 = vcombine.high %v384_v3, %v388_v4  ;;  %v376_v9 = vld [vmem:[#allocation8 + $0x3c0] sm:$0xff]  ;;  %1888 = vmatpush1.bf16.msra.mxu1 %v2433_v6  ;;  %v2425_v14 = vcombine.low %v384_v3, %v388_v4  ;;  %1848 = vmatprep.subr.bf16.mxu0 %v2298_v7 }
  0x66   :  { %v380_v10 = vld [vmem:[#allocation8 + $0x3e0] sm:$0xff] }
  0x67   :  { %v504_v11 = vld [vmem:[#allocation8 + $0x7c0] sm:$0xff]  ;;  %1889 = vmatprep.subr.bf16.mxu1 %v2426_v8  ;;  %v2418_v15 = vcombine.high %v376_v9, %v380_v10  ;;  %v2417_v21 = vcombine.low %v376_v9, %v380_v10 }
  0x68   :  { %v508_v12 = vld [vmem:[#allocation8 + $0x7e0] sm:$0xff]  ;;  %1849 = vmatpush1.bf16.msra.mxu0 %v2297_v13  ;;  %v441_v13 = vld [vmem:[#allocation8 + $0x5c8] sm:$0xff] }
  0x69   :  { %v2546_v16 = vcombine.high %v504_v11, %v508_v12  ;;  %v368_v17 = vld [vmem:[#allocation8 + $0x380] sm:$0xff]  ;;  %1890 = vmatpush1.bf16.msra.mxu1 %v2425_v14  ;;  %v2545_v22 = vcombine.low %v504_v11, %v508_v12  ;;  %1850 = vmatprep.subr.bf16.mxu0 %v2418_v15  ;;  %v313_v11 = vld [vmem:[#allocation8 + $0x1c8] sm:$0xff] }
  0x6a   :  { %v372_v18 = vld [vmem:[#allocation8 + $0x3a0] sm:$0xff]  ;;  %v317_v12 = vld [vmem:[#allocation8 + $0x1e8] sm:$0xff] }
  0x6b   :  { %v496_v19 = vld [vmem:[#allocation8 + $0x780] sm:$0xff]  ;;  %1891 = vmatprep.subr.bf16.mxu1 %v2546_v16  ;;  %v2410_v23 = vcombine.high %v368_v17, %v372_v18  ;;  %v2409_v29 = vcombine.low %v368_v17, %v372_v18  ;;  %v2356_v14 = vcombine.high %v313_v11, %v317_v12  ;;  %v445_v15 = vld [vmem:[#allocation8 + $0x5e8] sm:$0xff]  ;;  %v2355_v16 = vcombine.low %v313_v11, %v317_v12 }
  0x6c   :  { %v500_v20 = vld [vmem:[#allocation8 + $0x7a0] sm:$0xff]  ;;  %1851 = vmatpush2.bf16.msra.mxu0 %v2417_v21  ;;  %v2483_v17 = vcombine.low %v441_v13, %v445_v15  ;;  %v2484_v18 = vcombine.high %v441_v13, %v445_v15  ;;  %v413_v11 = vld [vmem:[#allocation8 + $0x4e8] sm:$0xff] }
  0x6d   :  { %v2538_v24 = vcombine.high %v496_v19, %v500_v20  ;;  %v360_v25 = vld [vmem:[#allocation8 + $0x340] sm:$0xff]  ;;  %1892 = vmatpush2.bf16.msra.mxu1 %v2545_v22  ;;  %v2537_v30 = vcombine.low %v496_v19, %v500_v20  ;;  %1852 = vmatprep.subr.bf16.mxu0 %v2410_v23  ;;  %v102_v19 = vlaneseq  ;;  %v100_v23 = vld [vmem:[#allocation7] sm:$0xf] }
  0x6e   :  { %v364_v26 = vld [vmem:[#allocation8 + $0x360] sm:$0xff] }
  0x6f   :  { %v488_v27 = vld [vmem:[#allocation8 + $0x740] sm:$0xff]  ;;  %1893 = vmatprep.subr.bf16.mxu1 %v2538_v24  ;;  %v2402_v31 = vcombine.high %v360_v25, %v364_v26  ;;  %v2401_v37 = vcombine.low %v360_v25, %v364_v26  ;;  %v2755_v20 = vshrl.u32 %v102_v19, 7  ;;  %v405_v19 = vld [vmem:[#allocation8 + $0x4a8] sm:$0xff] }
  0x70   :  { %v492_v28 = vld [vmem:[#allocation8 + $0x760] sm:$0xff]  ;;  %1853 = vmatpush2.bf16.msra.mxu0 %v2409_v29 }
  0x71   :  { %v2530_v32 = vcombine.high %v488_v27, %v492_v28  ;;  %v352_v33 = vld [vmem:[#allocation8 + $0x300] sm:$0xff]  ;;  %1894 = vmatpush2.bf16.msra.mxu1 %v2537_v30  ;;  %v2529_v38 = vcombine.low %v488_v27, %v492_v28  ;;  %1854 = vmatprep.subr.bf16.mxu0 %v2402_v31  ;;  %v2758_v21 = vsub.s32 0, %v2755_v20  ;;  %v2761_v22 = vsub.s32 2, %v2755_v20 }
  0x72   :  { %v356_v34 = vld [vmem:[#allocation8 + $0x320] sm:$0xff]  ;;  %v108_v24 = vsub.s32 1, %v2755_v20  ;;  %v116_v25 = vsub.s32 3, %v2755_v20 }
  0x73   :  { %v480_v35 = vld [vmem:[#allocation8 + $0x700] sm:$0xff]  ;;  %1895 = vmatprep.subr.bf16.mxu1 %v2530_v32  ;;  %v2394_v39 = vcombine.high %v352_v33, %v356_v34  ;;  %v2393_v45 = vcombine.low %v352_v33, %v356_v34  ;;  %v105_v26 = vrot.slane %v100_v23, %v2758_v21  ;;  %v113_v27 = vrot.slane %v100_v23, %v2761_v22 }
  0x74   :  { %v484_v36 = vld [vmem:[#allocation8 + $0x720] sm:$0xff]  ;;  %1855 = vmatpush2.bf16.msra.mxu0 %v2401_v37  ;;  %v109_v28 = vrot.slane %v100_v23, %v108_v24  ;;  %v117_v29 = vrot.slane %v100_v23, %v116_v25 }
  0x75   :  { %v2522_v40 = vcombine.high %v480_v35, %v484_v36  ;;  %v344_v41 = vld [vmem:[#allocation8 + $0x2c0] sm:$0xff]  ;;  %1896 = vmatpush2.bf16.msra.mxu1 %v2529_v38  ;;  %v2521_v46 = vcombine.low %v480_v35, %v484_v36  ;;  %1856 = vmatprep.subr.bf16.mxu0 %v2394_v39 }
  0x76   :  { %v348_v42 = vld [vmem:[#allocation8 + $0x2e0] sm:$0xff] }
  0x77   :  { %v472_v43 = vld [vmem:[#allocation8 + $0x6c0] sm:$0xff]  ;;  %1897 = vmatprep.subr.bf16.mxu1 %v2522_v40  ;;  %v2386_v47 = vcombine.high %v344_v41, %v348_v42  ;;  %v2385_v53 = vcombine.low %v344_v41, %v348_v42 }
  0x78   :  { %v476_v44 = vld [vmem:[#allocation8 + $0x6e0] sm:$0xff]  ;;  %1857 = vmatpush2.bf16.msra.mxu0 %v2393_v45 }
  0x79   :  { %v2514_v48 = vcombine.high %v472_v43, %v476_v44  ;;  %v336_v49 = vld [vmem:[#allocation8 + $0x280] sm:$0xff]  ;;  %1898 = vmatpush2.bf16.msra.mxu1 %v2521_v46  ;;  %v2513_v54 = vcombine.low %v472_v43, %v476_v44  ;;  %1858 = vmatprep.subr.bf16.mxu0 %v2386_v47  ;;  %v305_v44 = vld [vmem:[#allocation8 + $0x188] sm:$0xff] }
  0x7a   :  { %v340_v50 = vld [vmem:[#allocation8 + $0x2a0] sm:$0xff] }
  0x7b   :  { %v464_v51 = vld [vmem:[#allocation8 + $0x680] sm:$0xff]  ;;  %1899 = vmatprep.subr.bf16.mxu1 %v2514_v48  ;;  %v2378_v55 = vcombine.high %v336_v49, %v340_v50  ;;  %v2377_v57 = vcombine.low %v336_v49, %v340_v50  ;;  %v309_v48 = vld [vmem:[#allocation8 + $0x1a8] sm:$0xff] }
  0x7c   :  { %v468_v52 = vld [vmem:[#allocation8 + $0x6a0] sm:$0xff]  ;;  %1859 = vmatpush2.bf16.msra.mxu0 %v2385_v53  ;;  %v433_v49 = vld [vmem:[#allocation8 + $0x588] sm:$0xff] }
  0x7d   :  { %v2506_v56 = vcombine.high %v464_v51, %v468_v52  ;;  %1900 = vmatpush2.bf16.msra.mxu1 %v2513_v54  ;;  %v2505_v58 = vcombine.low %v464_v51, %v468_v52  ;;  %1860 = vmatprep.subr.bf16.mxu0 %v2378_v55  ;;  %v328_v59 = vld [vmem:[#allocation8 + $0x240] sm:$0xff]  ;;  %v437_v50 = vld [vmem:[#allocation8 + $0x5a8] sm:$0xff]  ;;  %v2348_v55 = vcombine.high %v305_v44, %v309_v48 }
  0x7e   :  { %v332_v60 = vld [vmem:[#allocation8 + $0x260] sm:$0xff]  ;;  %v297_v54 = vld [vmem:[#allocation8 + $0x148] sm:$0xff] }
  0x7f   :  { %1901 = vmatprep.subr.bf16.mxu1 %v2506_v56  ;;  %v456_v61 = vld [vmem:[#allocation8 + $0x640] sm:$0xff]  ;;  %v2370_v62 = vcombine.high %v328_v59, %v332_v60  ;;  %v2369_v0 = vcombine.low %v328_v59, %v332_v60  ;;  %v2476_v56 = vcombine.high %v433_v49, %v437_v50  ;;  %v429_v59 = vld [vmem:[#allocation8 + $0x568] sm:$0xff]  ;;  %v2347_v60 = vcombine.low %v305_v44, %v309_v48 }
  0x80   :  { %1861 = vmatpush2.bf16.msra.mxu0 %v2377_v57  ;;  %v460_v63 = vld [vmem:[#allocation8 + $0x660] sm:$0xff]  ;;  %v301_v57 = vld [vmem:[#allocation8 + $0x168] sm:$0xff] }
  0x81   :  { %1902 = vmatpush2.bf16.msra.mxu1 %v2505_v58  ;;  %v2497_v1 = vcombine.low %v456_v61, %v460_v63  ;;  %v2498_v2 = vcombine.high %v456_v61, %v460_v63  ;;  %1862 = vmatprep.subr.bf16.mxu0 %v2370_v62  ;;  %v320_v3 = vld [vmem:[#allocation8 + $0x200] sm:$0xff]  ;;  %v425_v58 = vld [vmem:[#allocation8 + $0x548] sm:$0xff]  ;;  %v2475_v61 = vcombine.low %v433_v49, %v437_v50 }
  0x82   :  { %v324_v4 = vld [vmem:[#allocation8 + $0x220] sm:$0xff]  ;;  %v2340_v62 = vcombine.high %v297_v54, %v301_v57  ;;  %v2468_v63 = vcombine.high %v425_v58, %v429_v59  ;;  %v505_v48 = vld [vmem:[#allocation8 + $0x7c8] sm:$0xff] }
  0x83   :  { %1903 = vmatprep.subr.bf16.mxu1 %v2498_v2  ;;  %v448_v5 = vld [vmem:[#allocation8 + $0x600] sm:$0xff]  ;;  %v2362_v6 = vcombine.high %v320_v3, %v324_v4  ;;  %v2361_v8 = vcombine.low %v320_v3, %v324_v4  ;;  %v417_v2 = vld [vmem:[#allocation8 + $0x508] sm:$0xff]  ;;  %v2339_v4 = vcombine.low %v297_v54, %v301_v57 }
  0x84   :  { %1863 = vmatpush2.bf16.msra.mxu0 %v2369_v0  ;;  %v452_v7 = vld [vmem:[#allocation8 + $0x620] sm:$0xff]  ;;  %v289_v0 = vld [vmem:[#allocation8 + $0x108] sm:$0xff] }
  0x85   :  { %1904 = vmatpush2.bf16.msra.mxu1 %v2497_v1  ;;  %v2489_v9 = vcombine.low %v448_v5, %v452_v7  ;;  %v2490_v10 = vcombine.high %v448_v5, %v452_v7  ;;  %1864 = vmatprep.subr.bf16.mxu0 %v2362_v6  ;;  %v293_v1 = vld [vmem:[#allocation8 + $0x128] sm:$0xff]  ;;  %v2467_v5 = vcombine.low %v425_v58, %v429_v59 }
  0x86   :  { %v421_v3 = vld [vmem:[#allocation8 + $0x528] sm:$0xff]  ;;  %v2332_v6 = vcombine.high %v289_v0, %v293_v1  ;;  %v2331_v12 = vcombine.low %v289_v0, %v293_v1 }
  0x87   :  { %1905 = vmatprep.subr.bf16.mxu1 %v2490_v10  ;;  %v2460_v7 = vcombine.high %v417_v2, %v421_v3  ;;  %v409_v10 = vld [vmem:[#allocation8 + $0x4c8] sm:$0xff]  ;;  %v2459_v13 = vcombine.low %v417_v2, %v421_v3 }
  0x88   :  { %1865 = vmatpush2.bf16.msra.mxu0 %v2361_v8  ;;  %v281_v8 = vld [vmem:[#allocation8 + $0xc8] sm:$0xff]  ;;  %v2452_v15 = vcombine.high %v409_v10, %v413_v11 }
  0x89   :  { %1906 = vmatpush2.bf16.msra.mxu1 %v2489_v9  ;;  %1916 = vmatprep.subr.bf16.mxu0 %v2356_v14  ;;  %v285_v9 = vld [vmem:[#allocation8 + $0xe8] sm:$0xff] }
  0x8a   :  { %1957 = vmatprep.subr.bf16.mxu1 %v2484_v18  ;;  %v2324_v14 = vcombine.high %v281_v8, %v285_v9  ;;  %v401_v18 = vld [vmem:[#allocation8 + $0x488] sm:$0xff]  ;;  %v2323_v23 = vcombine.low %v281_v8, %v285_v9 }
  0x8b   :  { %v509_v49 = vld [vmem:[#allocation8 + $0x7e8] sm:$0xff] }
  0x8c   :  { %v369_v57 = vld [vmem:[#allocation8 + $0x388] sm:$0xff] }
  0x8d   :  { %v373_v58 = vld [vmem:[#allocation8 + $0x3a8] sm:$0xff] }
  0x8e   :  { %v497_v59 = vld [vmem:[#allocation8 + $0x788] sm:$0xff] }
  0x8f   :  { %v361_v1 = vld [vmem:[#allocation8 + $0x348] sm:$0xff] }
  0x90   :  { %v365_v2 = vld [vmem:[#allocation8 + $0x368] sm:$0xff] }
  0x91   :  { %v489_v3 = vld [vmem:[#allocation8 + $0x748] sm:$0xff] }
  0x92   :  { %v353_v9 = vld [vmem:[#allocation8 + $0x308] sm:$0xff] }
 0x10b   :  { %v200_v30 = vpop.f32.mrf.mxu0 }
 0x10c   :  { %v241_v31 = vpop.f32.mrf.mxu1  ;;  %v201_v32 = vadd.f32 %v200_v30, %v105_v26  ;;  %v2451_v26 = vcombine.low %v409_v10, %v413_v11  ;;  %v269_v30 = vld [vmem:[#allocation8 + $0x68] sm:$0xff] }
 0x10d   :  { %v242_v33 = vadd.f32 %v241_v31, %v113_v27  ;;  %v202_v34 = vpop.f32.mrf.mxu0  ;;  %v393_v31 = vld [vmem:[#allocation8 + $0x448] sm:$0xff] }
 0x10e   :  { %v243_v35 = vpop.f32.mrf.mxu1  ;;  %v203_v37 = vadd.f32 %v202_v34, %v109_v28  ;;  %v248_v39 = vmax.f32 %v201_v32, 0.0  ;;  %v2444_v28 = vcombine.high %v401_v18, %v405_v19  ;;  %v397_v32 = vld [vmem:[#allocation8 + $0x468] sm:$0xff]  ;;  %v2443_v34 = vcombine.low %v401_v18, %v405_v19 }
 0x10f   :  { %v250_v36 = vmax.f32 %v242_v33, 0.0  ;;  %v244_v38 = vadd.f32 %v243_v35, %v117_v29  ;;  %v204_v40 = vpop.f32.mrf.mxu0  ;;  %v265_v29 = vld [vmem:[#allocation8 + $0x48] sm:$0xff] }
 0x110   :  { %v245_v41 = vpop.f32.mrf.mxu1  ;;  %v249_v42 = vmax.f32 %v203_v37, 0.0  ;;  %v2777_v53 = vpack.c.bf16 %v248_v39, %v248_v39  ;;  %v2308_v35 = vcombine.high %v265_v29, %v269_v30  ;;  %v257_v37 = vld [vmem:[#allocation8 + $0x8] sm:$0xff] }
 0x111   :  { %v251_v43 = vmax.f32 %v244_v38, 0.0  ;;  %v2771_v45 = vpack.c.bf16 %v250_v36, %v250_v36  ;;  %v205_v46 = vpop.f32.mrf.mxu0  ;;  %v2436_v36 = vcombine.high %v393_v31, %v397_v32  ;;  %v261_v38 = vld [vmem:[#allocation8 + $0x28] sm:$0xff]  ;;  %v2307_v41 = vcombine.low %v265_v29, %v269_v30 }
 0x112   :  { %v246_v47 = vpop.f32.mrf.mxu1  ;;  %v2773_v51 = vpack.c.bf16 %v249_v42, %v249_v42  ;;  %v385_v39 = vld [vmem:[#allocation8 + $0x408] sm:$0xff]  ;;  %v2435_v42 = vcombine.low %v393_v31, %v397_v32  ;;  %v2299_v50 = vcombine.low %v257_v37, %v261_v38 }
 0x113   :  { %v2775_v52 = vpack.c.bf16 %v251_v43, %v251_v43  ;;  %v389_v40 = vld [vmem:[#allocation8 + $0x428] sm:$0xff]  ;;  %v2300_v43 = vcombine.high %v257_v37, %v261_v38 }
 0x114   :  { %1866 = vmatprep.mubr.bf16.mxu0 %v2773_v51  ;;  %v2428_v44 = vcombine.high %v385_v39, %v389_v40  ;;  %v377_v46 = vld [vmem:[#allocation8 + $0x3c8] sm:$0xff]  ;;  %v2427_v54 = vcombine.low %v385_v39, %v389_v40 }
 0x115   :  { %1907 = vmatprep.mubr.bf16.mxu1 %v2775_v52  ;;  %1867 = vmatmul.mubr.bf16.vlgmr.msra.gmra.mxu0 %v2777_v53  ;;  %v381_v47 = vld [vmem:[#allocation8 + $0x3e8] sm:$0xff] }
 0x116   :  { %1908 = vmatmul.mubr.bf16.vlgmr.msra.gmra.mxu1 %v2771_v45  ;;  %1917 = vmatpush1.bf16.msra.mxu0 %v2355_v16  ;;  %v273_v16 = vld [vmem:[#allocation8 + $0x88] sm:$0xff] }
 0x117   :  { %1958 = vmatpush1.bf16.msra.mxu1 %v2483_v17  ;;  %1948 = vmatprep.mubr.bf16.mxu0 %v2773_v51  ;;  %v277_v17 = vld [vmem:[#allocation8 + $0xa8] sm:$0xff] }
 0x118   :  { %1989 = vmatprep.mubr.bf16.mxu1 %v2775_v52  ;;  %1918 = vmatprep.subr.bf16.mxu0 %v2348_v55  ;;  %v2316_v27 = vcombine.high %v273_v16, %v277_v17  ;;  %v2315_v33 = vcombine.low %v273_v16, %v277_v17  ;;  %v2420_v55 = vcombine.high %v377_v46, %v381_v47  ;;  %v357_v10 = vld [vmem:[#allocation8 + $0x328] sm:$0xff] }
 0x119   :  { %1959 = vmatprep.subr.bf16.mxu1 %v2476_v56  ;;  %v2548_v56 = vcombine.high %v505_v48, %v509_v49  ;;  %v481_v11 = vld [vmem:[#allocation8 + $0x708] sm:$0xff] }
 0x11a   :  { %1919 = vmatpush1.bf16.msra.mxu0 %v2347_v60  ;;  %v501_v60 = vld [vmem:[#allocation8 + $0x7a8] sm:$0xff] }
 0x11b   :  { %1960 = vmatpush1.bf16.msra.mxu1 %v2475_v61  ;;  %1920 = vmatprep.subr.bf16.mxu0 %v2340_v62  ;;  %v2419_v61 = vcombine.low %v377_v46, %v381_v47  ;;  %v2547_v62 = vcombine.low %v505_v48, %v509_v49  ;;  %v2540_v0 = vcombine.high %v497_v59, %v501_v60  ;;  %v345_v17 = vld [vmem:[#allocation8 + $0x2c8] sm:$0xff] }
 0x11c   :  { %1961 = vmatprep.subr.bf16.mxu1 %v2468_v63  ;;  %v2412_v63 = vcombine.high %v369_v57, %v373_v58  ;;  %v349_v18 = vld [vmem:[#allocation8 + $0x2e8] sm:$0xff] }
 0x11d   :  { %v473_v19 = vld [vmem:[#allocation8 + $0x6c8] sm:$0xff] }
 0x11e   :  { %1921 = vmatpush1.bf16.msra.mxu0 %v2339_v4  ;;  %v493_v4 = vld [vmem:[#allocation8 + $0x768] sm:$0xff] }
 0x11f   :  { %1962 = vmatpush1.bf16.msra.mxu1 %v2467_v5  ;;  %1922 = vmatprep.subr.bf16.mxu0 %v2332_v6  ;;  %v2411_v5 = vcombine.low %v369_v57, %v373_v58  ;;  %v2539_v6 = vcombine.low %v497_v59, %v501_v60  ;;  %v2532_v8 = vcombine.high %v489_v3, %v493_v4  ;;  %v337_v30 = vld [vmem:[#allocation8 + $0x288] sm:$0xff]  ;;  %v314_v58 = vld [vmem:[#allocation8 + $0x1d0] sm:$0xff] }
 0x120   :  { %1963 = vmatprep.subr.bf16.mxu1 %v2460_v7  ;;  %v2404_v7 = vcombine.high %v361_v1, %v365_v2  ;;  %v341_v31 = vld [vmem:[#allocation8 + $0x2a8] sm:$0xff]  ;;  %v318_v59 = vld [vmem:[#allocation8 + $0x1f0] sm:$0xff] }
 0x121   :  { %v465_v32 = vld [vmem:[#allocation8 + $0x688] sm:$0xff]  ;;  %v442_v60 = vld [vmem:[#allocation8 + $0x5d0] sm:$0xff] }
 0x122   :  { %1923 = vmatpush1.bf16.msra.mxu0 %v2331_v12  ;;  %v485_v12 = vld [vmem:[#allocation8 + $0x728] sm:$0xff] }
 0x123   :  { %1964 = vmatpush1.bf16.msra.mxu1 %v2459_v13  ;;  %1924 = vmatprep.subr.bf16.mxu0 %v2324_v14  ;;  %v2403_v13 = vcombine.low %v361_v1, %v365_v2  ;;  %v2531_v14 = vcombine.low %v489_v3, %v493_v4  ;;  %v2524_v16 = vcombine.high %v481_v11, %v485_v12  ;;  %v329_v38 = vld [vmem:[#allocation8 + $0x248] sm:$0xff]  ;;  %v306_v2 = vld [vmem:[#allocation8 + $0x190] sm:$0xff] }
 0x124   :  { %1965 = vmatprep.subr.bf16.mxu1 %v2452_v15  ;;  %v2396_v15 = vcombine.high %v353_v9, %v357_v10  ;;  %v333_v39 = vld [vmem:[#allocation8 + $0x268] sm:$0xff]  ;;  %v310_v3 = vld [vmem:[#allocation8 + $0x1b0] sm:$0xff] }
 0x125   :  { %v457_v40 = vld [vmem:[#allocation8 + $0x648] sm:$0xff]  ;;  %v434_v4 = vld [vmem:[#allocation8 + $0x590] sm:$0xff] }
 0x126   :  { %1925 = vmatpush1.bf16.msra.mxu0 %v2323_v23  ;;  %v477_v23 = vld [vmem:[#allocation8 + $0x6e8] sm:$0xff] }
 0x127   :  { %1966 = vmatpush1.bf16.msra.mxu1 %v2451_v26  ;;  %1926 = vmatprep.subr.bf16.mxu0 %v2316_v27  ;;  %v2395_v26 = vcombine.low %v353_v9, %v357_v10  ;;  %v2523_v27 = vcombine.low %v481_v11, %v485_v12  ;;  %v2516_v29 = vcombine.high %v473_v19, %v477_v23  ;;  %v321_v47 = vld [vmem:[#allocation8 + $0x208] sm:$0xff]  ;;  %v298_v10 = vld [vmem:[#allocation8 + $0x150] sm:$0xff] }
 0x128   :  { %1967 = vmatprep.subr.bf16.mxu1 %v2444_v28  ;;  %v2388_v28 = vcombine.high %v345_v17, %v349_v18  ;;  %v325_v48 = vld [vmem:[#allocation8 + $0x228] sm:$0xff]  ;;  %v302_v11 = vld [vmem:[#allocation8 + $0x170] sm:$0xff] }
 0x129   :  { %v449_v49 = vld [vmem:[#allocation8 + $0x608] sm:$0xff]  ;;  %v426_v12 = vld [vmem:[#allocation8 + $0x550] sm:$0xff] }
 0x12a   :  { %1927 = vmatpush1.bf16.msra.mxu0 %v2315_v33  ;;  %v469_v33 = vld [vmem:[#allocation8 + $0x6a8] sm:$0xff] }
 0x12b   :  { %1968 = vmatpush1.bf16.msra.mxu1 %v2443_v34  ;;  %1928 = vmatprep.subr.bf16.mxu0 %v2308_v35  ;;  %v2387_v34 = vcombine.low %v345_v17, %v349_v18  ;;  %v2515_v35 = vcombine.low %v473_v19, %v477_v23  ;;  %v2508_v37 = vcombine.high %v465_v32, %v469_v33  ;;  %v290_v18 = vld [vmem:[#allocation8 + $0x110] sm:$0xff] }
 0x12c   :  { %1969 = vmatprep.subr.bf16.mxu1 %v2436_v36  ;;  %v2380_v36 = vcombine.high %v337_v30, %v341_v31  ;;  %v294_v19 = vld [vmem:[#allocation8 + $0x130] sm:$0xff] }
 0x12d   :  { %v418_v23 = vld [vmem:[#allocation8 + $0x510] sm:$0xff] }
 0x12e   :  { %1929 = vmatpush1.bf16.msra.mxu0 %v2307_v41  ;;  %v461_v41 = vld [vmem:[#allocation8 + $0x668] sm:$0xff] }
 0x12f   :  { %1970 = vmatpush1.bf16.msra.mxu1 %v2435_v42  ;;  %1930 = vmatprep.subr.bf16.mxu0 %v2300_v43  ;;  %v2379_v42 = vcombine.low %v337_v30, %v341_v31  ;;  %v2507_v43 = vcombine.low %v465_v32, %v469_v33  ;;  %v2500_v46 = vcombine.high %v457_v40, %v461_v41  ;;  %v282_v31 = vld [vmem:[#allocation8 + $0xd0] sm:$0xff] }
 0x130   :  { %1971 = vmatprep.subr.bf16.mxu1 %v2428_v44  ;;  %v2372_v44 = vcombine.high %v329_v38, %v333_v39  ;;  %v286_v32 = vld [vmem:[#allocation8 + $0xf0] sm:$0xff] }
 0x131   :  { %v410_v33 = vld [vmem:[#allocation8 + $0x4d0] sm:$0xff] }
 0x132   :  { %1931 = vmatpush1.bf16.msra.mxu0 %v2299_v50  ;;  %v453_v50 = vld [vmem:[#allocation8 + $0x628] sm:$0xff] }
 0x133   :  { %1972 = vmatpush1.bf16.msra.mxu1 %v2427_v54  ;;  %1932 = vmatprep.subr.bf16.mxu0 %v2420_v55  ;;  %v2371_v54 = vcombine.low %v329_v38, %v333_v39  ;;  %v2499_v55 = vcombine.low %v457_v40, %v461_v41  ;;  %v2492_v57 = vcombine.high %v449_v49, %v453_v50  ;;  %v274_v39 = vld [vmem:[#allocation8 + $0x90] sm:$0xff] }
 0x134   :  { %1973 = vmatprep.subr.bf16.mxu1 %v2548_v56  ;;  %v2364_v56 = vcombine.high %v321_v47, %v325_v48  ;;  %v278_v40 = vld [vmem:[#allocation8 + $0xb0] sm:$0xff] }
 0x135   :  { %v402_v41 = vld [vmem:[#allocation8 + $0x490] sm:$0xff] }
 0x136   :  { %1933 = vmatpush2.bf16.msra.mxu0 %v2419_v61  ;;  %v446_v61 = vld [vmem:[#allocation8 + $0x5f0] sm:$0xff] }
 0x137   :  { %1974 = vmatpush2.bf16.msra.mxu1 %v2547_v62  ;;  %1934 = vmatprep.subr.bf16.mxu0 %v2412_v63  ;;  %v2363_v62 = vcombine.low %v321_v47, %v325_v48  ;;  %v2491_v63 = vcombine.low %v449_v49, %v453_v50  ;;  %v2486_v1 = vcombine.high %v442_v60, %v446_v61  ;;  %v266_v48 = vld [vmem:[#allocation8 + $0x50] sm:$0xff] }
 0x138   :  { %1975 = vmatprep.subr.bf16.mxu1 %v2540_v0  ;;  %v2358_v0 = vcombine.high %v314_v58, %v318_v59  ;;  %v270_v49 = vld [vmem:[#allocation8 + $0x70] sm:$0xff] }
 0x139   :  { %v394_v50 = vld [vmem:[#allocation8 + $0x450] sm:$0xff] }
 0x13a   :  { %1935 = vmatpush2.bf16.msra.mxu0 %v2411_v5  ;;  %v438_v5 = vld [vmem:[#allocation8 + $0x5b0] sm:$0xff] }
 0x13b   :  { %1976 = vmatpush2.bf16.msra.mxu1 %v2539_v6  ;;  %1936 = vmatprep.subr.bf16.mxu0 %v2404_v7  ;;  %v2357_v6 = vcombine.low %v314_v58, %v318_v59  ;;  %v2485_v7 = vcombine.low %v442_v60, %v446_v61  ;;  %v2478_v9 = vcombine.high %v434_v4, %v438_v5  ;;  %v258_v59 = vld [vmem:[#allocation8 + $0x10] sm:$0xff] }
 0x13c   :  { %1977 = vmatprep.subr.bf16.mxu1 %v2532_v8  ;;  %v2350_v8 = vcombine.high %v306_v2, %v310_v3  ;;  %v262_v60 = vld [vmem:[#allocation8 + $0x30] sm:$0xff] }
 0x13d   :  { %v386_v61 = vld [vmem:[#allocation8 + $0x410] sm:$0xff] }
 0x13e   :  { %1937 = vmatpush2.bf16.msra.mxu0 %v2403_v13  ;;  %v430_v13 = vld [vmem:[#allocation8 + $0x570] sm:$0xff] }
 0x13f   :  { %1978 = vmatpush2.bf16.msra.mxu1 %v2531_v14  ;;  %1938 = vmatprep.subr.bf16.mxu0 %v2396_v15  ;;  %v2349_v14 = vcombine.low %v306_v2, %v310_v3  ;;  %v2477_v15 = vcombine.low %v434_v4, %v438_v5  ;;  %v2470_v17 = vcombine.high %v426_v12, %v430_v13  ;;  %v378_v3 = vld [vmem:[#allocation8 + $0x3d0] sm:$0xff] }
 0x140   :  { %1979 = vmatprep.subr.bf16.mxu1 %v2524_v16  ;;  %v2342_v16 = vcombine.high %v298_v10, %v302_v11  ;;  %v382_v4 = vld [vmem:[#allocation8 + $0x3f0] sm:$0xff] }
 0x141   :  { %v506_v5 = vld [vmem:[#allocation8 + $0x7d0] sm:$0xff] }
 0x142   :  { %1939 = vmatpush2.bf16.msra.mxu0 %v2395_v26  ;;  %v422_v26 = vld [vmem:[#allocation8 + $0x530] sm:$0xff] }
 0x143   :  { %1980 = vmatpush2.bf16.msra.mxu1 %v2523_v27  ;;  %1940 = vmatprep.subr.bf16.mxu0 %v2388_v28  ;;  %v2341_v27 = vcombine.low %v298_v10, %v302_v11  ;;  %v2469_v28 = vcombine.low %v426_v12, %v430_v13  ;;  %v2462_v30 = vcombine.high %v418_v23, %v422_v26  ;;  %v370_v11 = vld [vmem:[#allocation8 + $0x390] sm:$0xff] }
 0x144   :  { %1981 = vmatprep.subr.bf16.mxu1 %v2516_v29  ;;  %v2334_v29 = vcombine.high %v290_v18, %v294_v19  ;;  %v374_v12 = vld [vmem:[#allocation8 + $0x3b0] sm:$0xff] }
 0x145   :  { %v498_v13 = vld [vmem:[#allocation8 + $0x790] sm:$0xff] }
 0x146   :  { %1941 = vmatpush2.bf16.msra.mxu0 %v2387_v34  ;;  %v414_v34 = vld [vmem:[#allocation8 + $0x4f0] sm:$0xff] }
 0x147   :  { %1982 = vmatpush2.bf16.msra.mxu1 %v2515_v35  ;;  %1942 = vmatprep.subr.bf16.mxu0 %v2380_v36  ;;  %v2333_v35 = vcombine.low %v290_v18, %v294_v19  ;;  %v2461_v36 = vcombine.low %v418_v23, %v422_v26  ;;  %v2454_v38 = vcombine.high %v410_v33, %v414_v34  ;;  %v362_v19 = vld [vmem:[#allocation8 + $0x350] sm:$0xff] }
 0x148   :  { %1983 = vmatprep.subr.bf16.mxu1 %v2508_v37  ;;  %v2326_v37 = vcombine.high %v282_v31, %v286_v32  ;;  %v366_v23 = vld [vmem:[#allocation8 + $0x370] sm:$0xff] }
 0x149   :  { %v490_v26 = vld [vmem:[#allocation8 + $0x750] sm:$0xff] }
 0x14a   :  { %1943 = vmatpush2.bf16.msra.mxu0 %v2379_v42  ;;  %v406_v42 = vld [vmem:[#allocation8 + $0x4b0] sm:$0xff] }
 0x14b   :  { %1984 = vmatpush2.bf16.msra.mxu1 %v2507_v43  ;;  %1944 = vmatprep.subr.bf16.mxu0 %v2372_v44  ;;  %v2325_v43 = vcombine.low %v282_v31, %v286_v32  ;;  %v2453_v44 = vcombine.low %v410_v33, %v414_v34  ;;  %v2446_v47 = vcombine.high %v402_v41, %v406_v42  ;;  %v354_v32 = vld [vmem:[#allocation8 + $0x310] sm:$0xff] }
 0x14c   :  { %1985 = vmatprep.subr.bf16.mxu1 %v2500_v46  ;;  %v2318_v46 = vcombine.high %v274_v39, %v278_v40  ;;  %v358_v33 = vld [vmem:[#allocation8 + $0x330] sm:$0xff] }
 0x14d   :  { %v482_v34 = vld [vmem:[#allocation8 + $0x710] sm:$0xff] }
 0x14e   :  { %1945 = vmatpush2.bf16.msra.mxu0 %v2371_v54  ;;  %v398_v54 = vld [vmem:[#allocation8 + $0x470] sm:$0xff] }
 0x14f   :  { %1986 = vmatpush2.bf16.msra.mxu1 %v2499_v55  ;;  %1946 = vmatprep.subr.bf16.mxu0 %v2364_v56  ;;  %v2317_v55 = vcombine.low %v274_v39, %v278_v40  ;;  %v2445_v56 = vcombine.low %v402_v41, %v406_v42  ;;  %v2438_v58 = vcombine.high %v394_v50, %v398_v54  ;;  %v346_v40 = vld [vmem:[#allocation8 + $0x2d0] sm:$0xff] }
 0x150   :  { %1987 = vmatprep.subr.bf16.mxu1 %v2492_v57  ;;  %v2310_v57 = vcombine.high %v266_v48, %v270_v49  ;;  %v350_v41 = vld [vmem:[#allocation8 + $0x2f0] sm:$0xff] }
 0x151   :  { %v474_v42 = vld [vmem:[#allocation8 + $0x6d0] sm:$0xff] }
 0x152   :  { %1947 = vmatpush2.bf16.msra.mxu0 %v2363_v62  ;;  %v390_v62 = vld [vmem:[#allocation8 + $0x430] sm:$0xff] }
 0x153   :  { %1988 = vmatpush2.bf16.msra.mxu1 %v2491_v63  ;;  %1998 = vmatprep.subr.bf16.mxu0 %v2358_v0  ;;  %v2309_v63 = vcombine.low %v266_v48, %v270_v49  ;;  %v2437_v0 = vcombine.low %v394_v50, %v398_v54  ;;  %v2430_v2 = vcombine.high %v386_v61, %v390_v62  ;;  %v338_v49 = vld [vmem:[#allocation8 + $0x290] sm:$0xff] }
 0x154   :  { %2039 = vmatprep.subr.bf16.mxu1 %v2486_v1  ;;  %v2302_v1 = vcombine.high %v258_v59, %v262_v60  ;;  %v342_v50 = vld [vmem:[#allocation8 + $0x2b0] sm:$0xff] }
 0x155   :  { %1949 = vmatmul.mubr.bf16.vlgmr.msra.gmra.mxu0 %v2777_v53  ;;  %v466_v54 = vld [vmem:[#allocation8 + $0x690] sm:$0xff] }
 0x156   :  { %1990 = vmatmul.mubr.bf16.vlgmr.msra.gmra.mxu1 %v2771_v45  ;;  %1999 = vmatpush1.bf16.msra.mxu0 %v2357_v6  ;;  %v510_v6 = vld [vmem:[#allocation8 + $0x7f0] sm:$0xff] }
 0x157   :  { %2030 = vmatprep.mubr.bf16.mxu0 %v2773_v51  ;;  %2040 = vmatpush1.bf16.msra.mxu1 %v2485_v7  ;;  %v2301_v7 = vcombine.low %v258_v59, %v262_v60  ;;  %v2550_v10 = vcombine.high %v506_v5, %v510_v6  ;;  %v330_v60 = vld [vmem:[#allocation8 + $0x250] sm:$0xff] }
 0x158   :  { %2071 = vmatprep.mubr.bf16.mxu1 %v2775_v52  ;;  %2000 = vmatprep.subr.bf16.mxu0 %v2350_v8  ;;  %v2429_v8 = vcombine.low %v386_v61, %v390_v62  ;;  %v334_v61 = vld [vmem:[#allocation8 + $0x270] sm:$0xff] }
 0x159   :  { %2041 = vmatprep.subr.bf16.mxu1 %v2478_v9  ;;  %v2422_v9 = vcombine.high %v378_v3, %v382_v4  ;;  %v458_v62 = vld [vmem:[#allocation8 + $0x650] sm:$0xff] }
 0x15a   :  { %2001 = vmatpush1.bf16.msra.mxu0 %v2349_v14  ;;  %v502_v14 = vld [vmem:[#allocation8 + $0x7b0] sm:$0xff] }
 0x15b   :  { %2042 = vmatpush1.bf16.msra.mxu1 %v2477_v15  ;;  %2002 = vmatprep.subr.bf16.mxu0 %v2342_v16  ;;  %v2421_v15 = vcombine.low %v378_v3, %v382_v4  ;;  %v2549_v16 = vcombine.low %v506_v5, %v510_v6  ;;  %v2542_v18 = vcombine.high %v498_v13, %v502_v14  ;;  %v322_v4 = vld [vmem:[#allocation8 + $0x210] sm:$0xff] }
 0x15c   :  { %2043 = vmatprep.subr.bf16.mxu1 %v2470_v17  ;;  %v2414_v17 = vcombine.high %v370_v11, %v374_v12  ;;  %v326_v5 = vld [vmem:[#allocation8 + $0x230] sm:$0xff] }
 0x15d   :  { %v450_v6 = vld [vmem:[#allocation8 + $0x610] sm:$0xff] }
 0x15e   :  { %2003 = vmatpush1.bf16.msra.mxu0 %v2341_v27  ;;  %v494_v27 = vld [vmem:[#allocation8 + $0x770] sm:$0xff] }
 0x15f   :  { %2044 = vmatpush1.bf16.msra.mxu1 %v2469_v28  ;;  %2004 = vmatprep.subr.bf16.mxu0 %v2334_v29  ;;  %v2413_v28 = vcombine.low %v370_v11, %v374_v12  ;;  %v2541_v29 = vcombine.low %v498_v13, %v502_v14  ;;  %v2534_v31 = vcombine.high %v490_v26, %v494_v27  ;;  %v315_v12 = vld [vmem:[#allocation8 + $0x1d8] sm:$0xff] }
 0x160   :  { %2045 = vmatprep.subr.bf16.mxu1 %v2462_v30  ;;  %v2406_v30 = vcombine.high %v362_v19, %v366_v23  ;;  %v319_v13 = vld [vmem:[#allocation8 + $0x1f8] sm:$0xff] }
 0x161   :  { %v443_v14 = vld [vmem:[#allocation8 + $0x5d8] sm:$0xff] }
 0x162   :  { %2005 = vmatpush1.bf16.msra.mxu0 %v2333_v35  ;;  %v486_v35 = vld [vmem:[#allocation8 + $0x730] sm:$0xff] }
 0x163   :  { %2046 = vmatpush1.bf16.msra.mxu1 %v2461_v36  ;;  %2006 = vmatprep.subr.bf16.mxu0 %v2326_v37  ;;  %v2405_v36 = vcombine.low %v362_v19, %v366_v23  ;;  %v2533_v37 = vcombine.low %v490_v26, %v494_v27  ;;  %v2526_v39 = vcombine.high %v482_v34, %v486_v35  ;;  %v307_v23 = vld [vmem:[#allocation8 + $0x198] sm:$0xff] }
 0x164   :  { %2047 = vmatprep.subr.bf16.mxu1 %v2454_v38  ;;  %v2398_v38 = vcombine.high %v354_v32, %v358_v33  ;;  %v311_v26 = vld [vmem:[#allocation8 + $0x1b8] sm:$0xff]  ;;  %v2359_v27 = vcombine.low %v315_v12, %v319_v13 }
 0x166   :  { %2007 = vmatpush1.bf16.msra.mxu0 %v2325_v43  ;;  %v478_v43 = vld [vmem:[#allocation8 + $0x6f0] sm:$0xff] }
 0x167   :  { %2048 = vmatpush1.bf16.msra.mxu1 %v2453_v44  ;;  %2008 = vmatprep.subr.bf16.mxu0 %v2318_v46  ;;  %v2397_v44 = vcombine.low %v354_v32, %v358_v33  ;;  %v2525_v46 = vcombine.low %v482_v34, %v486_v35  ;;  %v2518_v48 = vcombine.high %v474_v42, %v478_v43  ;;  %v299_v32 = vld [vmem:[#allocation8 + $0x158] sm:$0xff] }
 0x168   :  { %2049 = vmatprep.subr.bf16.mxu1 %v2446_v47  ;;  %v2390_v47 = vcombine.high %v346_v40, %v350_v41  ;;  %v303_v33 = vld [vmem:[#allocation8 + $0x178] sm:$0xff] }
 0x169   :  { %v427_v35 = vld [vmem:[#allocation8 + $0x558] sm:$0xff] }
 0x16a   :  { %2009 = vmatpush1.bf16.msra.mxu0 %v2317_v55  ;;  %v470_v55 = vld [vmem:[#allocation8 + $0x6b0] sm:$0xff] }
 0x16b   :  { %2050 = vmatpush1.bf16.msra.mxu1 %v2445_v56  ;;  %2010 = vmatprep.subr.bf16.mxu0 %v2310_v57  ;;  %v2389_v56 = vcombine.low %v346_v40, %v350_v41  ;;  %v2517_v57 = vcombine.low %v474_v42, %v478_v43  ;;  %v2510_v59 = vcombine.high %v466_v54, %v470_v55  ;;  %v291_v41 = vld [vmem:[#allocation8 + $0x118] sm:$0xff] }
 0x16c   :  { %2051 = vmatprep.subr.bf16.mxu1 %v2438_v58  ;;  %v2382_v58 = vcombine.high %v338_v49, %v342_v50  ;;  %v295_v42 = vld [vmem:[#allocation8 + $0x138] sm:$0xff] }
 0x16d   :  { %v419_v43 = vld [vmem:[#allocation8 + $0x518] sm:$0xff] }
 0x16e   :  { %2011 = vmatpush1.bf16.msra.mxu0 %v2309_v63  ;;  %v462_v63 = vld [vmem:[#allocation8 + $0x670] sm:$0xff] }
 0x16f   :  { %2052 = vmatpush1.bf16.msra.mxu1 %v2437_v0  ;;  %2012 = vmatprep.subr.bf16.mxu0 %v2302_v1  ;;  %v2381_v0 = vcombine.low %v338_v49, %v342_v50  ;;  %v2509_v1 = vcombine.low %v466_v54, %v470_v55  ;;  %v2502_v3 = vcombine.high %v458_v62, %v462_v63  ;;  %v283_v49 = vld [vmem:[#allocation8 + $0xd8] sm:$0xff] }
 0x170   :  { %2053 = vmatprep.subr.bf16.mxu1 %v2430_v2  ;;  %v2374_v2 = vcombine.high %v330_v60, %v334_v61  ;;  %v287_v50 = vld [vmem:[#allocation8 + $0xf8] sm:$0xff] }
 0x171   :  { %v411_v54 = vld [vmem:[#allocation8 + $0x4d8] sm:$0xff] }
 0x172   :  { %2013 = vmatpush1.bf16.msra.mxu0 %v2301_v7  ;;  %v454_v7 = vld [vmem:[#allocation8 + $0x630] sm:$0xff]  ;;  %v415_v55 = vld [vmem:[#allocation8 + $0x4f8] sm:$0xff] }
 0x173   :  { %2054 = vmatpush1.bf16.msra.mxu1 %v2429_v8  ;;  %2014 = vmatprep.subr.bf16.mxu0 %v2422_v9  ;;  %v2373_v8 = vcombine.low %v330_v60, %v334_v61  ;;  %v2501_v9 = vcombine.low %v458_v62, %v462_v63  ;;  %v2494_v11 = vcombine.high %v450_v6, %v454_v7  ;;  %v279_v60 = vld [vmem:[#allocation8 + $0xb8] sm:$0xff] }
 0x174   :  { %2055 = vmatprep.subr.bf16.mxu1 %v2550_v10  ;;  %v2366_v10 = vcombine.high %v322_v4, %v326_v5  ;;  %v403_v61 = vld [vmem:[#allocation8 + $0x498] sm:$0xff]  ;;  %v2327_v63 = vcombine.low %v283_v49, %v287_v50 }
 0x175   :  { %v407_v62 = vld [vmem:[#allocation8 + $0x4b8] sm:$0xff] }
 0x176   :  { %2015 = vmatpush2.bf16.msra.mxu0 %v2421_v15  ;;  %v447_v15 = vld [vmem:[#allocation8 + $0x5f8] sm:$0xff] }
 0x177   :  { %2056 = vmatpush2.bf16.msra.mxu1 %v2549_v16  ;;  %2016 = vmatprep.subr.bf16.mxu0 %v2414_v17  ;;  %v2365_v16 = vcombine.low %v322_v4, %v326_v5  ;;  %v2493_v17 = vcombine.low %v450_v6, %v454_v7  ;;  %v2488_v19 = vcombine.high %v443_v14, %v447_v15  ;;  %v271_v4 = vld [vmem:[#allocation8 + $0x78] sm:$0xff] }
 0x178   :  { %2057 = vmatprep.subr.bf16.mxu1 %v2542_v18  ;;  %v2360_v18 = vcombine.high %v315_v12, %v319_v13  ;;  %v395_v5 = vld [vmem:[#allocation8 + $0x458] sm:$0xff] }
 0x179   :  { %v399_v6 = vld [vmem:[#allocation8 + $0x478] sm:$0xff] }
 0x17a   :  { %2017 = vmatpush2.bf16.msra.mxu0 %v2413_v28  ;;  %v435_v28 = vld [vmem:[#allocation8 + $0x598] sm:$0xff] }
 0x17b   :  { %2058 = vmatpush2.bf16.msra.mxu1 %v2541_v29  ;;  %2018 = vmatprep.subr.bf16.mxu0 %v2406_v30  ;;  %v439_v29 = vld [vmem:[#allocation8 + $0x5b8] sm:$0xff]  ;;  %v2487_v30 = vcombine.low %v443_v14, %v447_v15 }
 0x17c   :  { %2059 = vmatprep.subr.bf16.mxu1 %v2534_v31  ;;  %v2352_v31 = vcombine.high %v307_v23, %v311_v26  ;;  %v2480_v34 = vcombine.high %v435_v28, %v439_v29  ;;  %v263_v12 = vld [vmem:[#allocation8 + $0x38] sm:$0xff] }
 0x17d   :  { %v387_v13 = vld [vmem:[#allocation8 + $0x418] sm:$0xff] }
 0x17e   :  { %2019 = vmatpush2.bf16.msra.mxu0 %v2405_v36  ;;  %v431_v36 = vld [vmem:[#allocation8 + $0x578] sm:$0xff] }
 0x17f   :  { %2060 = vmatpush2.bf16.msra.mxu1 %v2533_v37  ;;  %2020 = vmatprep.subr.bf16.mxu0 %v2398_v38  ;;  %v2351_v37 = vcombine.low %v307_v23, %v311_v26  ;;  %v2479_v38 = vcombine.low %v435_v28, %v439_v29  ;;  %v2472_v40 = vcombine.high %v427_v35, %v431_v36  ;;  %v391_v14 = vld [vmem:[#allocation8 + $0x438] sm:$0xff] }
 0x180   :  { %2061 = vmatprep.subr.bf16.mxu1 %v2526_v39  ;;  %v2344_v39 = vcombine.high %v299_v32, %v303_v33  ;;  %v383_v23 = vld [vmem:[#allocation8 + $0x3f8] sm:$0xff]  ;;  %v2431_v29 = vcombine.low %v387_v13, %v391_v14 }
 0x181   :  { %v507_v26 = vld [vmem:[#allocation8 + $0x7d8] sm:$0xff] }
 0x182   :  { %2021 = vmatpush2.bf16.msra.mxu0 %v2397_v44  ;;  %v423_v44 = vld [vmem:[#allocation8 + $0x538] sm:$0xff] }
 0x183   :  { %2062 = vmatpush2.bf16.msra.mxu1 %v2525_v46  ;;  %2022 = vmatprep.subr.bf16.mxu0 %v2390_v47  ;;  %v2343_v46 = vcombine.low %v299_v32, %v303_v33  ;;  %v2471_v47 = vcombine.low %v427_v35, %v431_v36  ;;  %v371_v32 = vld [vmem:[#allocation8 + $0x398] sm:$0xff] }
 0x184   :  { %2063 = vmatprep.subr.bf16.mxu1 %v2518_v48  ;;  %v2336_v48 = vcombine.high %v291_v41, %v295_v42  ;;  %v375_v33 = vld [vmem:[#allocation8 + $0x3b8] sm:$0xff] }
 0x185   :  { %v503_v35 = vld [vmem:[#allocation8 + $0x7b8] sm:$0xff] }
 0x186   :  { %2023 = vmatpush2.bf16.msra.mxu0 %v2389_v56  ;;  %v2463_v56 = vcombine.low %v419_v43, %v423_v44 }
 0x187   :  { %2064 = vmatpush2.bf16.msra.mxu1 %v2517_v57  ;;  %2024 = vmatprep.subr.bf16.mxu0 %v2382_v58  ;;  %v2328_v57 = vcombine.high %v283_v49, %v287_v50  ;;  %v2456_v58 = vcombine.high %v411_v54, %v415_v55  ;;  %v359_v49 = vld [vmem:[#allocation8 + $0x338] sm:$0xff] }
 0x188   :  { %2065 = vmatprep.subr.bf16.mxu1 %v2510_v59  ;;  %v275_v59 = vld [vmem:[#allocation8 + $0x98] sm:$0xff] }
 0x189   :  { %v2319_v7 = vcombine.low %v275_v59, %v279_v60  ;;  %v483_v50 = vld [vmem:[#allocation8 + $0x718] sm:$0xff] }
 0x18a   :  { %2025 = vmatpush2.bf16.msra.mxu0 %v2381_v0  ;;  %v2455_v0 = vcombine.low %v411_v54, %v415_v55  ;;  %v487_v54 = vld [vmem:[#allocation8 + $0x738] sm:$0xff] }
 0x18b   :  { %2066 = vmatpush2.bf16.msra.mxu1 %v2509_v1  ;;  %2026 = vmatprep.subr.bf16.mxu0 %v2374_v2  ;;  %v2320_v1 = vcombine.high %v275_v59, %v279_v60  ;;  %v2448_v2 = vcombine.high %v403_v61, %v407_v62  ;;  %v351_v59 = vld [vmem:[#allocation8 + $0x2f8] sm:$0xff] }
 0x18c   :  { %2067 = vmatprep.subr.bf16.mxu1 %v2502_v3  ;;  %v267_v3 = vld [vmem:[#allocation8 + $0x58] sm:$0xff] }
 0x18d   :  { %v2311_v15 = vcombine.low %v267_v3, %v271_v4  ;;  %v475_v60 = vld [vmem:[#allocation8 + $0x6d8] sm:$0xff] }
 0x18e   :  { %2027 = vmatpush2.bf16.msra.mxu0 %v2373_v8  ;;  %v2447_v8 = vcombine.low %v403_v61, %v407_v62  ;;  %v479_v61 = vld [vmem:[#allocation8 + $0x6f8] sm:$0xff] }
 0x18f   :  { %2068 = vmatpush2.bf16.msra.mxu1 %v2501_v9  ;;  %2028 = vmatprep.subr.bf16.mxu0 %v2366_v10  ;;  %v2312_v9 = vcombine.high %v267_v3, %v271_v4  ;;  %v2440_v10 = vcombine.high %v395_v5, %v399_v6  ;;  %v343_v3 = vld [vmem:[#allocation8 + $0x2b8] sm:$0xff] }
 0x190   :  { %2069 = vmatprep.subr.bf16.mxu1 %v2494_v11  ;;  %v259_v11 = vld [vmem:[#allocation8 + $0x18] sm:$0xff] }
 0x191   :  { %v2303_v28 = vcombine.low %v259_v11, %v263_v12  ;;  %v467_v4 = vld [vmem:[#allocation8 + $0x698] sm:$0xff] }
 0x192   :  { %2029 = vmatpush2.bf16.msra.mxu0 %v2365_v16  ;;  %v2439_v16 = vcombine.low %v395_v5, %v399_v6  ;;  %v471_v5 = vld [vmem:[#allocation8 + $0x6b8] sm:$0xff] }
 0x193   :  { %2070 = vmatpush2.bf16.msra.mxu1 %v2493_v17  ;;  %2080 = vmatprep.subr.bf16.mxu0 %v2360_v18  ;;  %v2304_v17 = vcombine.high %v259_v11, %v263_v12  ;;  %v2432_v18 = vcombine.high %v387_v13, %v391_v14  ;;  %v335_v11 = vld [vmem:[#allocation8 + $0x278] sm:$0xff] }
 0x194   :  { %2121 = vmatprep.subr.bf16.mxu1 %v2488_v19  ;;  %v379_v19 = vld [vmem:[#allocation8 + $0x3d8] sm:$0xff] }
 0x195   :  { %2031 = vmatmul.mubr.bf16.vlgmr.msra.gmra.mxu0 %v2777_v53  ;;  %v2423_v36 = vcombine.low %v379_v19, %v383_v23  ;;  %v459_v12 = vld [vmem:[#allocation8 + $0x658] sm:$0xff] }
 0x196   :  { %2072 = vmatmul.mubr.bf16.vlgmr.msra.gmra.mxu1 %v2771_v45  ;;  %2081 = vmatpush1.bf16.msra.mxu0 %v2359_v27  ;;  %v511_v27 = vld [vmem:[#allocation8 + $0x7f8] sm:$0xff] }
 0x197   :  { %2112 = vmatprep.mubr.bf16.mxu0 %v2773_v51  ;;  %2122 = vmatpush1.bf16.msra.mxu1 %v2487_v30  ;;  %v2464_v51 = vcombine.high %v419_v43, %v423_v44  ;;  %v2424_v30 = vcombine.high %v379_v19, %v383_v23  ;;  %v495_v43 = vld [vmem:[#allocation8 + $0x778] sm:$0xff]  ;;  %v2415_v44 = vcombine.low %v371_v32, %v375_v33 }
 0x198   :  { %2153 = vmatprep.mubr.bf16.mxu1 %v2775_v52  ;;  %2082 = vmatprep.subr.bf16.mxu0 %v2352_v31  ;;  %v2335_v52 = vcombine.low %v291_v41, %v295_v42  ;;  %v2552_v31 = vcombine.high %v507_v26, %v511_v27  ;;  %v367_v41 = vld [vmem:[#allocation8 + $0x378] sm:$0xff] }
 0x199   :  { %2123 = vmatprep.subr.bf16.mxu1 %v2480_v34  ;;  %v499_v34 = vld [vmem:[#allocation8 + $0x798] sm:$0xff] }
 0x19a   :  { %2083 = vmatpush1.bf16.msra.mxu0 %v2351_v37  ;;  %v2551_v37 = vcombine.low %v507_v26, %v511_v27  ;;  %v491_v42 = vld [vmem:[#allocation8 + $0x758] sm:$0xff] }
 0x19b   :  { %2124 = vmatpush1.bf16.msra.mxu1 %v2479_v38  ;;  %2084 = vmatprep.subr.bf16.mxu0 %v2344_v39  ;;  %v2416_v38 = vcombine.high %v371_v32, %v375_v33  ;;  %v2544_v39 = vcombine.high %v499_v34, %v503_v35  ;;  %v463_v13 = vld [vmem:[#allocation8 + $0x678] sm:$0xff] }
 0x19c   :  { %2125 = vmatprep.subr.bf16.mxu1 %v2472_v40  ;;  %v363_v40 = vld [vmem:[#allocation8 + $0x358] sm:$0xff] }
 0x19d   :  { %v2407_v55 = vcombine.low %v363_v40, %v367_v41  ;;  %v327_v19 = vld [vmem:[#allocation8 + $0x238] sm:$0xff] }
 0x19e   :  { %2085 = vmatpush1.bf16.msra.mxu0 %v2343_v46  ;;  %v2543_v46 = vcombine.low %v499_v34, %v503_v35  ;;  %v451_v23 = vld [vmem:[#allocation8 + $0x618] sm:$0xff]  ;;  %v2798_v34 = vld [vmem:[#allocation10] sm:$0xff] }
 0x19f   :  { %2126 = vmatpush1.bf16.msra.mxu1 %v2471_v47  ;;  %2086 = vmatprep.subr.bf16.mxu0 %v2336_v48  ;;  %v2408_v47 = vcombine.high %v363_v40, %v367_v41  ;;  %v2536_v48 = vcombine.high %v491_v42, %v495_v43  ;;  %v455_v26 = vld [vmem:[#allocation8 + $0x638] sm:$0xff] }
 0x1a0   :  { %2127 = vmatprep.subr.bf16.mxu1 %v2464_v51  ;;  %v355_v51 = vld [vmem:[#allocation8 + $0x318] sm:$0xff]  ;;  %v2495_v32 = vcombine.low %v451_v23, %v455_v26 }
 0x1a1   :  { %v2399_v62 = vcombine.low %v355_v51, %v359_v49  ;;  %v2796_v33 = vld [vmem:[%s2846_s4] sm:$0xff] }
 0x1a2   :  { %2087 = vmatpush1.bf16.msra.mxu0 %v2335_v52  ;;  %v2535_v52 = vcombine.low %v491_v42, %v495_v43  ;;  %v517_v35 = vrot.slane %v2796_v33, %v2758_v21 }
 0x1a3   :  { %2128 = vmatpush1.bf16.msra.mxu1 %v2463_v56  ;;  %2088 = vmatprep.subr.bf16.mxu0 %v2328_v57  ;;  %v2400_v56 = vcombine.high %v355_v51, %v359_v49  ;;  %v2528_v57 = vcombine.high %v483_v50, %v487_v54 }
 0x1a4   :  { %2129 = vmatprep.subr.bf16.mxu1 %v2456_v58  ;;  %v347_v58 = vld [vmem:[#allocation8 + $0x2d8] sm:$0xff] }
 0x1a5   :  { %v2391_v6 = vcombine.low %v347_v58, %v351_v59 }
 0x1a6   :  { %2089 = vmatpush1.bf16.msra.mxu0 %v2327_v63  ;;  %v2527_v63 = vcombine.low %v483_v50, %v487_v54 }
 0x1a7   :  { %2130 = vmatpush1.bf16.msra.mxu1 %v2455_v0  ;;  %2090 = vmatprep.subr.bf16.mxu0 %v2320_v1  ;;  %v2392_v0 = vcombine.high %v347_v58, %v351_v59  ;;  %v2520_v1 = vcombine.high %v475_v60, %v479_v61  ;;  %v532_v58 = vsub.s32 4, %v2755_v20  ;;  %v525_v59 = vrot.slane %v2796_v33, %v2761_v22 }
 0x1a8   :  { %2131 = vmatprep.subr.bf16.mxu1 %v2448_v2  ;;  %v339_v2 = vld [vmem:[#allocation8 + $0x298] sm:$0xff] }
 0x1a9   :  { %v2383_v14 = vcombine.low %v339_v2, %v343_v3 }
 0x1aa   :  { %2091 = vmatpush1.bf16.msra.mxu0 %v2319_v7  ;;  %v2519_v7 = vcombine.low %v475_v60, %v479_v61  ;;  %v2816_v60 = vsub.s32 6, %v2755_v20 }
 0x1ab   :  { %2132 = vmatpush1.bf16.msra.mxu1 %v2447_v8  ;;  %2092 = vmatprep.subr.bf16.mxu0 %v2312_v9  ;;  %v2384_v8 = vcombine.high %v339_v2, %v343_v3  ;;  %v2512_v9 = vcombine.high %v467_v4, %v471_v5 }
 0x1ac   :  { %2133 = vmatprep.subr.bf16.mxu1 %v2440_v10  ;;  %v331_v10 = vld [vmem:[#allocation8 + $0x258] sm:$0xff] }
 0x1ad   :  { %v2375_v27 = vcombine.low %v331_v10, %v335_v11 }
 0x1ae   :  { %2093 = vmatpush1.bf16.msra.mxu0 %v2311_v15  ;;  %v2511_v15 = vcombine.low %v467_v4, %v471_v5 }
 0x1af   :  { %2134 = vmatpush1.bf16.msra.mxu1 %v2439_v16  ;;  %2094 = vmatprep.subr.bf16.mxu0 %v2304_v17  ;;  %v2376_v16 = vcombine.high %v331_v10, %v335_v11  ;;  %v2504_v17 = vcombine.high %v459_v12, %v463_v13 }
 0x1b0   :  { %2135 = vmatprep.subr.bf16.mxu1 %v2432_v18  ;;  %v323_v18 = vld [vmem:[#allocation8 + $0x218] sm:$0xff] }
 0x1b2   :  { %2095 = vmatpush1.bf16.msra.mxu0 %v2303_v28  ;;  %v2503_v28 = vcombine.low %v459_v12, %v463_v13 }
 0x1b3   :  { %2136 = vmatpush1.bf16.msra.mxu1 %v2431_v29  ;;  %2096 = vmatprep.subr.bf16.mxu0 %v2424_v30  ;;  %v2368_v29 = vcombine.high %v323_v18, %v327_v19  ;;  %v2496_v30 = vcombine.high %v451_v23, %v455_v26 }
 0x1b4   :  { %2137 = vmatprep.subr.bf16.mxu1 %v2552_v31  ;;  %v2367_v31 = vcombine.low %v323_v18, %v327_v19 }
 0x1b6   :  { %2097 = vmatpush2.bf16.msra.mxu0 %v2423_v36  ;;  %v2171_v36 = vunpack.c.l.bf16 %v2798_v34 }
 0x1b7   :  { %2138 = vmatpush2.bf16.msra.mxu1 %v2551_v37  ;;  %2098 = vmatprep.subr.bf16.mxu0 %v2416_v38  ;;  %v521_v37 = vrot.slane %v2796_v33, %v108_v24 }
 0x1b8   :  { %2139 = vmatprep.subr.bf16.mxu1 %v2544_v39  ;;  %v2178_v41 = vrot.slane %v2171_v36, %v2758_v21  ;;  %v2182_v42 = vrot.slane %v2171_v36, %v2761_v22  ;;  %v2186_v61 = vrot.slane %v2171_v36, %v532_v58  ;;  %v2190_v2 = vrot.slane %v2171_v36, %v2816_v60 }
 0x1b9   :  { %v2172_v36 = vunpack.c.h.bf16 %v2798_v34 }
 0x1ba   :  { %2099 = vmatpush2.bf16.msra.mxu0 %v2415_v44  ;;  %v2218_v24 = vrot.slane %v2178_v41, %v2758_v21  ;;  %v2230_v12 = vrot.slane %v2190_v2, %v2758_v21 }
 0x1bb   :  { %2140 = vmatpush2.bf16.msra.mxu1 %v2543_v46  ;;  %2100 = vmatprep.subr.bf16.mxu0 %v2408_v47 }
 0x1bc   :  { %2141 = vmatprep.subr.bf16.mxu1 %v2536_v48 }
 0x1be   :  { %2101 = vmatpush2.bf16.msra.mxu0 %v2407_v55 }
 0x1bf   :  { %2142 = vmatpush2.bf16.msra.mxu1 %v2535_v52  ;;  %2102 = vmatprep.subr.bf16.mxu0 %v2400_v56 }
 0x1c0   :  { %2143 = vmatprep.subr.bf16.mxu1 %v2528_v57 }
 0x1c2   :  { %2103 = vmatpush2.bf16.msra.mxu0 %v2399_v62  ;;  %v529_v62 = vrot.slane %v2796_v33, %v116_v25 }
 0x1c3   :  { %2144 = vmatpush2.bf16.msra.mxu1 %v2527_v63  ;;  %2104 = vmatprep.subr.bf16.mxu0 %v2392_v0 }
 0x1c4   :  { %2145 = vmatprep.subr.bf16.mxu1 %v2520_v1 }
 0x1c6   :  { %2105 = vmatpush2.bf16.msra.mxu0 %v2391_v6  ;;  %v2226_v6 = vrot.slane %v2186_v61, %v2758_v21 }
 0x1c7   :  { %2146 = vmatpush2.bf16.msra.mxu1 %v2519_v7  ;;  %2106 = vmatprep.subr.bf16.mxu0 %v2384_v8 }
 0x1c8   :  { %2147 = vmatprep.subr.bf16.mxu1 %v2512_v9 }
 0x1ca   :  { %2107 = vmatpush2.bf16.msra.mxu0 %v2383_v14 }
 0x1cb   :  { %2148 = vmatpush2.bf16.msra.mxu1 %v2511_v15  ;;  %2108 = vmatprep.subr.bf16.mxu0 %v2376_v16 }
 0x1cc   :  { %2149 = vmatprep.subr.bf16.mxu1 %v2504_v17 }
 0x1ce   :  { %2109 = vmatpush2.bf16.msra.mxu0 %v2375_v27 }
 0x1cf   :  { %2150 = vmatpush2.bf16.msra.mxu1 %v2503_v28  ;;  %2110 = vmatprep.subr.bf16.mxu0 %v2368_v29 }
 0x1d0   :  { %2151 = vmatprep.subr.bf16.mxu1 %v2496_v30 }
 0x1d2   :  { %2111 = vmatpush2.bf16.msra.mxu0 %v2367_v31 }
 0x1d3   :  { %2152 = vmatpush2.bf16.msra.mxu1 %v2495_v32  ;;  %v533_v32 = vrot.slane %v2796_v33, %v532_v58 }
 0x1d5   :  { %2113 = vmatmul.mubr.bf16.vlgmr.msra.gmra.mxu0 %v2777_v53  ;;  %v1868_v38 = vpop.f32.mrf.mxu0  ;;  %v2222_v53 = vrot.slane %v2182_v42, %v2758_v21 }
 0x1d6   :  { %v1909_v39 = vpop.f32.mrf.mxu1  ;;  %2154 = vmatmul.mubr.bf16.vlgmr.msra.gmra.mxu1 %v2771_v45  ;;  %v1869_v40 = vadd.f32 %v1868_v38, %v517_v35  ;;  %v536_v35 = vsub.s32 5, %v2755_v20 }
 0x1d7   :  { %v1870_v43 = vpop.f32.mrf.mxu0 }
 0x1d8   :  { %v1911_v44 = vpop.f32.mrf.mxu1  ;;  %v1910_v46 = vadd.f32 %v1909_v39, %v1869_v40  ;;  %v1871_v47 = vadd.f32 %v1870_v43, %v521_v37  ;;  %v537_v38 = vrot.slane %v2796_v33, %v536_v35  ;;  %v2194_v39 = vrot.slane %v2172_v36, %v2758_v21 }
 0x1d9   :  { %v1872_v48 = vpop.f32.mrf.mxu0 }
 0x1da   :  { %v1913_v51 = vpop.f32.mrf.mxu1  ;;  %v2162_v49 = vmax.f32 %v1910_v46, 0.0  ;;  %v1912_v50 = vadd.f32 %v1911_v44, %v1871_v47  ;;  %v2234_v42 = vrot.slane %v2194_v39, %v2758_v21  ;;  %v2198_v46 = vrot.slane %v2172_v36, %v2761_v22 }
 0x1db   :  { %v1873_v54 = vpop.f32.mrf.mxu0  ;;  %v544_v47 = vsub.s32 7, %v2755_v20  ;;  %v541_v48 = vrot.slane %v2796_v33, %v2816_v60  ;;  %v2202_v51 = vrot.slane %v2172_v36, %v532_v58 }
 0x1dc   :  { %v1914_v55 = vpop.f32.mrf.mxu1  ;;  %v2163_v45 = vmax.f32 %v1912_v50, 0.0  ;;  %v2247_v52 = vmul.f32 %v2218_v24, %v2162_v49  ;;  %v2238_v24 = vrot.slane %v2198_v46, %v2758_v21 }
 0x1dd   :  { %v545_v50 = vrot.slane %v2796_v33, %v544_v47 }
 0x1de   :  { %v2248_v56 = vmul.f32 %v2222_v53, %v2163_v45  ;;  %v2206_v45 = vrot.slane %v2172_v36, %v2816_v60 }
 0x1e0   :  { %v2255_v57 = vadd.f32 %v2248_v56, %v2247_v52  ;;  %v2242_v52 = vrot.slane %v2202_v51, %v2758_v21 }
 0x215   :  { %v1950_v63 = vpop.f32.mrf.mxu0 }
 0x216   :  { %v1991_v0 = vpop.f32.mrf.mxu1  ;;  %v1951_v1 = vadd.f32 %v1950_v63, %v525_v59 }
 0x217   :  { %v1952_v3 = vpop.f32.mrf.mxu0 }
 0x218   :  { %v1993_v4 = vpop.f32.mrf.mxu1  ;;  %v1992_v5 = vadd.f32 %v1991_v0, %v1951_v1  ;;  %v1953_v7 = vadd.f32 %v1952_v3, %v529_v62  ;;  %v2246_v1 = vrot.slane %v2206_v45, %v2758_v21 }
 0x219   :  { %v1954_v8 = vpop.f32.mrf.mxu0 }
 0x21a   :  { %v1995_v9 = vpop.f32.mrf.mxu1  ;;  %v2164_v10 = vmax.f32 %v1992_v5, 0.0  ;;  %v1994_v11 = vadd.f32 %v1993_v4, %v1953_v7  ;;  %v2553_v8 = vld [vmem:[#allocation2] ss:$0 sm:$0xff] }
 0x21b   :  { %v1955_v13 = vpop.f32.mrf.mxu0 }
 0x21c   :  { %v1996_v14 = vpop.f32.mrf.mxu1  ;;  %v2249_v25 = vmul.f32 %v2226_v6, %v2164_v10  ;;  %v2165_v15 = vmax.f32 %v1994_v11, 0.0 }
 0x21e   :  { %v2256_v16 = vadd.f32 %v2255_v57, %v2249_v25  ;;  %v2250_v17 = vmul.f32 %v2230_v12, %v2165_v15 }
 0x220   :  { %v2257_v18 = vadd.f32 %v2256_v16, %v2250_v17 }
 0x255   :  { %v2032_v19 = vpop.f32.mrf.mxu0 }
 0x256   :  { %v2073_v23 = vpop.f32.mrf.mxu1  ;;  %v2033_v37 = vadd.f32 %v2032_v19, %v533_v32 }
 0x257   :  { %v2034_v26 = vpop.f32.mrf.mxu0 }
 0x258   :  { %v2075_v27 = vpop.f32.mrf.mxu1  ;;  %v2074_v40 = vadd.f32 %v2073_v23, %v2033_v37  ;;  %v2035_v41 = vadd.f32 %v2034_v26, %v537_v38 }
 0x259   :  { %v2036_v28 = vpop.f32.mrf.mxu0 }
 0x25a   :  { %v2077_v29 = vpop.f32.mrf.mxu1  ;;  %v2166_v43 = vmax.f32 %v2074_v40, 0.0  ;;  %v2076_v44 = vadd.f32 %v2075_v27, %v2035_v41 }
 0x25b   :  { %v2037_v30 = vpop.f32.mrf.mxu0 }
 0x25c   :  { %v2078_v31 = vpop.f32.mrf.mxu1  ;;  %v2251_v34 = vmul.f32 %v2234_v42, %v2166_v43  ;;  %v2167_v49 = vmax.f32 %v2076_v44, 0.0 }
 0x25e   :  { %v2258_v56 = vadd.f32 %v2257_v18, %v2251_v34  ;;  %v2252_v20 = vmul.f32 %v2238_v24, %v2167_v49 }
 0x260   :  { %v2259_v5 = vadd.f32 %v2258_v56, %v2252_v20 }
 0x295   :  { %v2114_v53 = vpop.f32.mrf.mxu0 }
 0x296   :  { %v2115_v54 = vadd.f32 %v2114_v53, %v541_v48  ;;  %v2155_v55 = vpop.f32.mrf.mxu1 }
 0x297   :  { %v2116_v22 = vpop.f32.mrf.mxu0 }
 0x298   :  { %v2156_v57 = vadd.f32 %v2155_v55, %v2115_v54  ;;  %v2117_v59 = vadd.f32 %v2116_v22, %v545_v50  ;;  %v2157_v61 = vpop.f32.mrf.mxu1 }
 0x299   :  { %v2118_v58 = vpop.f32.mrf.mxu0 }
 0x29a   :  { %v2168_v62 = vmax.f32 %v2156_v57, 0.0  ;;  %v2158_v63 = vadd.f32 %v2157_v61, %v2117_v59  ;;  %v2159_v0 = vpop.f32.mrf.mxu1 }
 0x29b   :  { %v2119_v33 = vpop.f32.mrf.mxu0 }
 0x29c   :  { %v2253_v2 = vmul.f32 %v2242_v52, %v2168_v62  ;;  %v2169_v3 = vmax.f32 %v2158_v63, 0.0  ;;  %v2160_v4 = vpop.f32.mrf.mxu1 }
 0x29e   :  { %v2254_v60 = vmul.f32 %v2246_v1, %v2169_v3  ;;  %v2260_v6 = vadd.f32 %v2259_v5, %v2253_v2 }
 0x2a0   :  { %v2261_v7 = vadd.f32 %v2260_v6, %v2254_v60 }
 0x2a2   :  { %2262 = vadd.xlane.f32.xlu0 %v2261_v7 }
 0x32b   :  { %v2263_v9 = vpop.xlane.xlu0 %2262 }
 0x32c   :  { %v2271_v10 = vadd.f32 %v2553_v8, %v2263_v9 }
 0x32e   :  { %v2554_v11 = vmul.f32 -1.442695, %v2271_v10 }
 0x330   :  { %2577 = vpow2.f32 %v2554_v11 }
 0x33d   :  { %v2578_v12 = vpop.eup %2577 }
 0x33e   :  { %v2275_v13 = vadd.f32 1.0, %v2578_v12 }
 0x340   :  { %2579 = vrcp.f32 %v2275_v13 }
 0x34d   :  { %v2580_v14 = vpop.eup %2579 }
 0x34e   :  { %2279 = vst.msk [vmem:[%s2849_s7] sm:$0xff] %vm2278_vm1, %v2580_v14 }
 0x34f   :  { %2284 = vsyncpa [#allocation4], 1 }
 0x350   :  { %2285 = vsyncpa [#allocation6], 1 }
 0x351   :  { %2286 = vsyncpa [#allocation9], 1 }

// kernel: tpu_custom_call.1
= control target key start
LH: loop header
LB: loop body
LE: loop exit
PB: predicated region body
PF: predicated region fallthrough
CT: control target
= control target key end

     0   :  { %s2842_s0 = inlined_call_operand.hbm [shape: bf16[8,32], index: 0, kind: input, shape index: {}]   ;;  %s2843_s1 = inlined_call_operand.hbm [shape: bf16[32,512], index: 1, kind: input, shape index: {}]   ;;  %s2844_s2 = inlined_call_operand.hbm [shape: f32[1,512], index: 2, kind: input, shape index: {}]   ;;  %s2845_s3 = inlined_call_operand.hbm [shape: bf16[512,1024], index: 3, kind: input, shape index: {}]   ;;  %s2846_s4 = inlined_call_operand.vmem [shape: f32[1,1024], index: 4, kind: input, shape index: {}]   ;;  %s2847_s5 = inlined_call_operand.hbm [shape: bf16[1,1024], index: 5, kind: input, shape index: {}]   ;;  %s2848_s6 = inlined_call_operand.<no memory space> [shape: f32[1,1], index: 6, kind: input, shape index: {}]   ;;  %s2849_s7 = inlined_call_operand.vmem [shape: f32[8,1], index: 7, kind: output, shape index: {}]  }
   0x1   :  { %v12_v0 = vstv %s2848_s6 }
   0x2   :  { %13 = vst [vmem:[#allocation2] sm:$0x1] %v12_v0 }
   0x3   :  { %14 = vsyncpa [#allocation4], 0 }
   0x4   :  { %15 = vsyncpa [#allocation6], 0 }
   0x5   :  { %16 = vsyncpa [#allocation9], 0  ;;  %s2687_s26 = smov [#allocation5]  }
   0x6   :  { %s32_s27 = sshll.u32 %s2687_s26, 4  ;;  %s33_s27 = int_to_ptr.vmem [resolvable:$true] %s32_s27 }
   0x7   :  { %s2589_s28 = scalar_lea.vmem %s33_s27, 1024  ;;  %p2594_p1 = scmp.lt.s32.totalorder %s33_s27, %s33_s27 }
   0x8   :  { %p2590_p0 = scmp.ne.s32.totalorder %s33_s27, %s2589_s28  ;;  %p2595_p2 = scmp.lt.s32.totalorder %s2589_s28, %s2589_s28 }
   0xa   :  { %p2596_p3 = por %p2595_p2, %p2594_p1 }
   0xc   :  { %p2597_p4 = pnand %p2596_p3, %p2590_p0 }
   0xe   :  { %2600 = shalt.err (!%p2597_p4)
}
   0xf   :  { %s2688_s29 = smov 256   ;;  %s2689_s30 = smov 16  }
  0x10   :  { %38 = dma.hbm_to_vmem [thread:$0]  %s2843_s1, 1024, %s33_s27, [#allocation6], %s2688_s29, %s2688_s29, %s2689_s30  }
  0x11   :  { %s2690_s6 = smov [#allocation8]  }
  0x12   :  { %s54_s10 = sshll.u32 %s2690_s6, 4  ;;  %s55_s10 = int_to_ptr.vmem [resolvable:$true] %s54_s10 }
  0x13   :  { %s2609_s11 = scalar_lea.vmem %s55_s10, 32768  ;;  %p2614_p6 = scmp.lt.s32.totalorder %s55_s10, %s55_s10 }
  0x14   :  { %p2610_p5 = scmp.ne.s32.totalorder %s55_s10, %s2609_s11  ;;  %p2615_p7 = scmp.lt.s32.totalorder %s2609_s11, %s2609_s11 }
  0x16   :  { %p2616_p8 = por %p2615_p7, %p2614_p6 }
  0x18   :  { %p2617_p9 = pnand %p2616_p8, %p2610_p5 }
  0x1a   :  { %2620 = shalt.err (!%p2617_p9)
}
  0x1b   :  { %s2691_s12 = smov 512   ;;  %s2692_s13 = smov 32  }
  0x1c   :  { %60 = dma.hbm_to_vmem [thread:$0]  %s2845_s3, 32768, %s55_s10, [#allocation9], %s2691_s12, %s2691_s12, %s2692_s13  }
  0x1d   :  { %s2693_s16 = smov [#allocation3]   ;;  %s2694_s18 = smov [#allocation7]  }
  0x1e   :  { %s23_s17 = sshll.u32 %s2693_s16, 4  ;;  %s45_s1 = sshll.u32 %s2694_s18, 4  ;;  %s24_s17 = int_to_ptr.vmem [resolvable:$true] %s23_s17  ;;  %s46_s1 = int_to_ptr.vmem [resolvable:$true] %s45_s1 }
  0x1f   :  { %s2629_s19 = scalar_lea.vmem %s24_s17, 64  ;;  %p2634_p11 = scmp.lt.s32.totalorder %s24_s17, %s24_s17 }
  0x20   :  { %p2630_p10 = scmp.ne.s32.totalorder %s24_s17, %s2629_s19  ;;  %p2635_p12 = scmp.lt.s32.totalorder %s2629_s19, %s2629_s19 }
  0x22   :  { %p2636_p13 = por %p2635_p12, %p2634_p11 }
  0x24   :  { %p2637_p0 = pnand %p2636_p13, %p2630_p10 }
  0x26   :  { %2640 = shalt.err (!%p2637_p0)
}
  0x27   :  { %26 = dma.hbm_to_vmem [thread:$0]  %s2842_s0, 64, %s24_s17, [#allocation4]  }
  0x28   :  { %s2649_s22 = scalar_lea.vmem %s46_s1, 64  ;;  %p2654_p2 = scmp.lt.s32.totalorder %s46_s1, %s46_s1 }
  0x29   :  { %p2650_p1 = scmp.ne.s32.totalorder %s46_s1, %s2649_s22  ;;  %p2655_p3 = scmp.lt.s32.totalorder %s2649_s22, %s2649_s22 }
  0x2b   :  { %p2656_p4 = por %p2655_p3, %p2654_p2 }
  0x2d   :  { %p2657_p5 = pnand %p2656_p4, %p2650_p1 }
  0x2f   :  { %2660 = shalt.err (!%p2657_p5)
}
  0x30   :  { %48 = dma.hbm_to_vmem [thread:$0]  %s2844_s2, 64, %s46_s1, [#allocation6]  }
  0x31   :  { %s2695_s24 = smov [#allocation10]  }
  0x32   :  { %s69_s25 = sshll.u32 %s2695_s24, 4  ;;  %s70_s25 = int_to_ptr.vmem [resolvable:$true] %s69_s25 }
  0x33   :  { %s2669_s26 = scalar_lea.vmem %s70_s25, 128  ;;  %p2674_p7 = scmp.lt.s32.totalorder %s70_s25, %s70_s25 }
  0x34   :  { %p2670_p6 = scmp.ne.s32.totalorder %s70_s25, %s2669_s26  ;;  %p2675_p8 = scmp.lt.s32.totalorder %s2669_s26, %s2669_s26 }
  0x36   :  { %p2676_p9 = por %p2675_p8, %p2674_p7 }
  0x38   :  { %p2677_p10 = pnand %p2676_p9, %p2670_p6 }
  0x3a   :  { %2680 = shalt.err (!%p2677_p10)
}
  0x3b   :  { %72 = dma.hbm_to_vmem [thread:$0]  %s2847_s5, 128, %s70_s25, [#allocation9]  }
  0x3c   :  { %2681 = dma.done.wait [#allocation4], 64  }
  0x3d   :  { %2682 = vsyncadd [#allocation4], 4294967232 }
  0x3e   :  { %2683 = dma.done.wait [#allocation6], 1088  }
  0x3f   :  { %2684 = vsyncadd [#allocation6], 4294966208 }
  0x40   :  { %2685 = dma.done.wait [#allocation9], 32896  }
  0x41   :  { %2686 = vsyncadd [#allocation9], 4294934400  ;;  %v2696_v1 = vmov 0   ;;  %v2565_v2 = vld [vmem:[#allocation5 + $0x24] ss:$16 sps:$4 sm:$0xff]   ;;  %vm162_vm0 = vcmask 261120  }
  0x42   :  { %198 = vmatprep.mubr.bf16.mxu0 %v2696_v1  ;;  %239 = vmatprep.mubr.bf16.mxu1 %v2696_v1  ;;  %v2567_v3 = vld [vmem:[#allocation5 + $0x2c] ss:$16 sps:$4 sm:$0xff]   ;;  %v2569_v4 = vld [vmem:[#allocation5 + $0x20] ss:$16 sps:$4 sm:$0xff]   ;;  %v2570_v5 = vld [vmem:[#allocation5 + $0x28] ss:$16 sps:$4 sm:$0xff]  }
  0x43   :  { %178 = vmatprep.subr.bf16.mxu0 %v2565_v2  ;;  %219 = vmatprep.subr.bf16.mxu1 %v2567_v3  ;;  %v2571_v6 = vld [vmem:[#allocation5 + $0x4] ss:$16 sps:$4 sm:$0xff]   ;;  %v2573_v7 = vld [vmem:[#allocation5 + $0xc] ss:$16 sps:$4 sm:$0xff]   ;;  %v2575_v8 = vld [vmem:[#allocation5] ss:$16 sps:$4 sm:$0xff]  }
  0x44   :  { %179 = vmatpush1.bf16.msra.mxu0 %v2569_v4  ;;  %220 = vmatpush1.bf16.msra.mxu1 %v2570_v5  ;;  %v2576_v9 = vld [vmem:[#allocation5 + $0x8] ss:$16 sps:$4 sm:$0xff]   ;;  %v91_v19 = vld [vmem:[#allocation3] sm:$0xf]  ;;  %vm2278_vm1 = vcmask 7168  }
  0x45   :  { %180 = vmatprep.subr.bf16.mxu0 %v2571_v6  ;;  %v312_v10 = vld [vmem:[#allocation8 + $0x1c0] sm:$0xff]  ;;  %221 = vmatprep.subr.bf16.mxu1 %v2573_v7 }
  0x46   :  { %v316_v11 = vld [vmem:[#allocation8 + $0x1e0] sm:$0xff] }
  0x47   :  { %v440_v12 = vld [vmem:[#allocation8 + $0x5c0] sm:$0xff]  ;;  %v2354_v14 = vcombine.high %v312_v10, %v316_v11  ;;  %v2353_v20 = vcombine.low %v312_v10, %v316_v11 }
  0x48   :  { %v444_v13 = vld [vmem:[#allocation8 + $0x5e0] sm:$0xff]  ;;  %181 = vmatpush1.bf16.msra.mxu0 %v2575_v8  ;;  %222 = vmatpush1.bf16.msra.mxu1 %v2576_v9 }
  0x49   :  { %v2482_v15 = vcombine.high %v440_v12, %v444_v13  ;;  %v304_v16 = vld [vmem:[#allocation8 + $0x180] sm:$0xff]  ;;  %v2481_v21 = vcombine.low %v440_v12, %v444_v13  ;;  %1834 = vmatprep.subr.bf16.mxu0 %v2354_v14 }
  0x4a   :  { %v308_v17 = vld [vmem:[#allocation8 + $0x1a0] sm:$0xff] }
  0x4b   :  { %v432_v18 = vld [vmem:[#allocation8 + $0x580] sm:$0xff]  ;;  %1875 = vmatprep.subr.bf16.mxu1 %v2482_v15  ;;  %v2346_v23 = vcombine.high %v304_v16, %v308_v17  ;;  %2295 = vmatmul.mubr.msk.bf16.vlgmr.msra.gmra.mxu0 %vm162_vm0, %v91_v19  ;;  %v2345_v29 = vcombine.low %v304_v16, %v308_v17 }
  0x4c   :  { %v436_v22 = vld [vmem:[#allocation8 + $0x5a0] sm:$0xff]  ;;  %2296 = vmatmul.mubr.msk.bf16.vlgmr.msra.gmra.mxu1 %vm162_vm0, %v91_v19  ;;  %1835 = vmatpush1.bf16.msra.mxu0 %v2353_v20 }
  0x4d   :  { %v2474_v24 = vcombine.high %v432_v18, %v436_v22  ;;  %v296_v25 = vld [vmem:[#allocation8 + $0x140] sm:$0xff]  ;;  %1876 = vmatpush1.bf16.msra.mxu1 %v2481_v21  ;;  %v2473_v30 = vcombine.low %v432_v18, %v436_v22  ;;  %1836 = vmatprep.subr.bf16.mxu0 %v2346_v23 }
  0x4e   :  { %v300_v26 = vld [vmem:[#allocation8 + $0x160] sm:$0xff] }
  0x4f   :  { %v424_v27 = vld [vmem:[#allocation8 + $0x540] sm:$0xff]  ;;  %1877 = vmatprep.subr.bf16.mxu1 %v2474_v24  ;;  %v2338_v31 = vcombine.high %v296_v25, %v300_v26  ;;  %v2337_v37 = vcombine.low %v296_v25, %v300_v26 }
  0x50   :  { %v428_v28 = vld [vmem:[#allocation8 + $0x560] sm:$0xff]  ;;  %1837 = vmatpush1.bf16.msra.mxu0 %v2345_v29 }
  0x51   :  { %v2466_v32 = vcombine.high %v424_v27, %v428_v28  ;;  %v288_v33 = vld [vmem:[#allocation8 + $0x100] sm:$0xff]  ;;  %1878 = vmatpush1.bf16.msra.mxu1 %v2473_v30  ;;  %v2465_v38 = vcombine.low %v424_v27, %v428_v28  ;;  %1838 = vmatprep.subr.bf16.mxu0 %v2338_v31 }
  0x52   :  { %v292_v34 = vld [vmem:[#allocation8 + $0x120] sm:$0xff] }
  0x53   :  { %v416_v35 = vld [vmem:[#allocation8 + $0x500] sm:$0xff]  ;;  %1879 = vmatprep.subr.bf16.mxu1 %v2466_v32  ;;  %v2330_v39 = vcombine.high %v288_v33, %v292_v34  ;;  %v2329_v45 = vcombine.low %v288_v33, %v292_v34 }
  0x54   :  { %v420_v36 = vld [vmem:[#allocation8 + $0x520] sm:$0xff]  ;;  %1839 = vmatpush1.bf16.msra.mxu0 %v2337_v37 }
  0x55   :  { %v2458_v40 = vcombine.high %v416_v35, %v420_v36  ;;  %v280_v41 = vld [vmem:[#allocation8 + $0xc0] sm:$0xff]  ;;  %1880 = vmatpush1.bf16.msra.mxu1 %v2465_v38  ;;  %v2457_v46 = vcombine.low %v416_v35, %v420_v36  ;;  %1840 = vmatprep.subr.bf16.mxu0 %v2330_v39 }
  0x56   :  { %v284_v42 = vld [vmem:[#allocation8 + $0xe0] sm:$0xff] }
  0x57   :  { %v408_v43 = vld [vmem:[#allocation8 + $0x4c0] sm:$0xff]  ;;  %1881 = vmatprep.subr.bf16.mxu1 %v2458_v40  ;;  %v2322_v47 = vcombine.high %v280_v41, %v284_v42  ;;  %v2321_v53 = vcombine.low %v280_v41, %v284_v42 }
  0x58   :  { %v412_v44 = vld [vmem:[#allocation8 + $0x4e0] sm:$0xff]  ;;  %1841 = vmatpush1.bf16.msra.mxu0 %v2329_v45 }
  0x59   :  { %v2450_v48 = vcombine.high %v408_v43, %v412_v44  ;;  %v272_v49 = vld [vmem:[#allocation8 + $0x80] sm:$0xff]  ;;  %1882 = vmatpush1.bf16.msra.mxu1 %v2457_v46  ;;  %v2449_v54 = vcombine.low %v408_v43, %v412_v44  ;;  %1842 = vmatprep.subr.bf16.mxu0 %v2322_v47 }
  0x5a   :  { %v276_v50 = vld [vmem:[#allocation8 + $0xa0] sm:$0xff] }
  0x5b   :  { %v400_v51 = vld [vmem:[#allocation8 + $0x480] sm:$0xff]  ;;  %1883 = vmatprep.subr.bf16.mxu1 %v2450_v48  ;;  %v2314_v55 = vcombine.high %v272_v49, %v276_v50  ;;  %v2313_v61 = vcombine.low %v272_v49, %v276_v50 }
  0x5c   :  { %v404_v52 = vld [vmem:[#allocation8 + $0x4a0] sm:$0xff]  ;;  %1843 = vmatpush1.bf16.msra.mxu0 %v2321_v53 }
  0x5d   :  { %v2442_v56 = vcombine.high %v400_v51, %v404_v52  ;;  %v264_v57 = vld [vmem:[#allocation8 + $0x40] sm:$0xff]  ;;  %1884 = vmatpush1.bf16.msra.mxu1 %v2449_v54  ;;  %v2441_v62 = vcombine.low %v400_v51, %v404_v52  ;;  %1844 = vmatprep.subr.bf16.mxu0 %v2314_v55 }
  0x5e   :  { %v268_v58 = vld [vmem:[#allocation8 + $0x60] sm:$0xff] }
  0x5f   :  { %v392_v59 = vld [vmem:[#allocation8 + $0x440] sm:$0xff]  ;;  %1885 = vmatprep.subr.bf16.mxu1 %v2442_v56  ;;  %v2306_v63 = vcombine.high %v264_v57, %v268_v58  ;;  %v2305_v5 = vcombine.low %v264_v57, %v268_v58 }
  0x60   :  { %v396_v60 = vld [vmem:[#allocation8 + $0x460] sm:$0xff]  ;;  %1845 = vmatpush1.bf16.msra.mxu0 %v2313_v61 }
  0x61   :  { %v2434_v0 = vcombine.high %v392_v59, %v396_v60  ;;  %v256_v1 = vld [vmem:[#allocation8] sm:$0xff]  ;;  %1886 = vmatpush1.bf16.msra.mxu1 %v2441_v62  ;;  %v2433_v6 = vcombine.low %v392_v59, %v396_v60  ;;  %1846 = vmatprep.subr.bf16.mxu0 %v2306_v63 }
  0x62   :  { %v260_v2 = vld [vmem:[#allocation8 + $0x20] sm:$0xff] }
  0x63   :  { %v384_v3 = vld [vmem:[#allocation8 + $0x400] sm:$0xff]  ;;  %1887 = vmatprep.subr.bf16.mxu1 %v2434_v0  ;;  %v2298_v7 = vcombine.high %v256_v1, %v260_v2  ;;  %v2297_v13 = vcombine.low %v256_v1, %v260_v2 }
  0x64   :  { %v388_v4 = vld [vmem:[#allocation8 + $0x420] sm:$0xff]  ;;  %1847 = vmatpush1.bf16.msra.mxu0 %v2305_v5 }
  0x65   :  { %v2426_v8 = vcombine.high %v384_v3, %v388_v4  ;;  %v376_v9 = vld [vmem:[#allocation8 + $0x3c0] sm:$0xff]  ;;  %1888 = vmatpush1.bf16.msra.mxu1 %v2433_v6  ;;  %v2425_v14 = vcombine.low %v384_v3, %v388_v4  ;;  %1848 = vmatprep.subr.bf16.mxu0 %v2298_v7 }
  0x66   :  { %v380_v10 = vld [vmem:[#allocation8 + $0x3e0] sm:$0xff] }
  0x67   :  { %v504_v11 = vld [vmem:[#allocation8 + $0x7c0] sm:$0xff]  ;;  %1889 = vmatprep.subr.bf16.mxu1 %v2426_v8  ;;  %v2418_v15 = vcombine.high %v376_v9, %v380_v10  ;;  %v2417_v21 = vcombine.low %v376_v9, %v380_v10 }
  0x68   :  { %v508_v12 = vld [vmem:[#allocation8 + $0x7e0] sm:$0xff]  ;;  %1849 = vmatpush1.bf16.msra.mxu0 %v2297_v13  ;;  %v441_v13 = vld [vmem:[#allocation8 + $0x5c8] sm:$0xff] }
  0x69   :  { %v2546_v16 = vcombine.high %v504_v11, %v508_v12  ;;  %v368_v17 = vld [vmem:[#allocation8 + $0x380] sm:$0xff]  ;;  %1890 = vmatpush1.bf16.msra.mxu1 %v2425_v14  ;;  %v2545_v22 = vcombine.low %v504_v11, %v508_v12  ;;  %1850 = vmatprep.subr.bf16.mxu0 %v2418_v15  ;;  %v313_v11 = vld [vmem:[#allocation8 + $0x1c8] sm:$0xff] }
  0x6a   :  { %v372_v18 = vld [vmem:[#allocation8 + $0x3a0] sm:$0xff]  ;;  %v317_v12 = vld [vmem:[#allocation8 + $0x1e8] sm:$0xff] }
  0x6b   :  { %v496_v19 = vld [vmem:[#allocation8 + $0x780] sm:$0xff]  ;;  %1891 = vmatprep.subr.bf16.mxu1 %v2546_v16  ;;  %v2410_v23 = vcombine.high %v368_v17, %v372_v18  ;;  %v2409_v29 = vcombine.low %v368_v17, %v372_v18  ;;  %v2356_v14 = vcombine.high %v313_v11, %v317_v12  ;;  %v445_v15 = vld [vmem:[#allocation8 + $0x5e8] sm:$0xff]  ;;  %v2355_v16 = vcombine.low %v313_v11, %v317_v12 }
  0x6c   :  { %v500_v20 = vld [vmem:[#allocation8 + $0x7a0] sm:$0xff]  ;;  %1851 = vmatpush2.bf16.msra.mxu0 %v2417_v21  ;;  %v2483_v17 = vcombine.low %v441_v13, %v445_v15  ;;  %v2484_v18 = vcombine.high %v441_v13, %v445_v15  ;;  %v413_v11 = vld [vmem:[#allocation8 + $0x4e8] sm:$0xff] }
  0x6d   :  { %v2538_v24 = vcombine.high %v496_v19, %v500_v20  ;;  %v360_v25 = vld [vmem:[#allocation8 + $0x340] sm:$0xff]  ;;  %1892 = vmatpush2.bf16.msra.mxu1 %v2545_v22  ;;  %v2537_v30 = vcombine.low %v496_v19, %v500_v20  ;;  %1852 = vmatprep.subr.bf16.mxu0 %v2410_v23  ;;  %v102_v19 = vlaneseq  ;;  %v100_v23 = vld [vmem:[#allocation7] sm:$0xf] }
  0x6e   :  { %v364_v26 = vld [vmem:[#allocation8 + $0x360] sm:$0xff] }
  0x6f   :  { %v488_v27 = vld [vmem:[#allocation8 + $0x740] sm:$0xff]  ;;  %1893 = vmatprep.subr.bf16.mxu1 %v2538_v24  ;;  %v2402_v31 = vcombine.high %v360_v25, %v364_v26  ;;  %v2401_v37 = vcombine.low %v360_v25, %v364_v26  ;;  %v2755_v20 = vshrl.u32 %v102_v19, 7  ;;  %v405_v19 = vld [vmem:[#allocation8 + $0x4a8] sm:$0xff] }
  0x70   :  { %v492_v28 = vld [vmem:[#allocation8 + $0x760] sm:$0xff]  ;;  %1853 = vmatpush2.bf16.msra.mxu0 %v2409_v29 }
  0x71   :  { %v2530_v32 = vcombine.high %v488_v27, %v492_v28  ;;  %v352_v33 = vld [vmem:[#allocation8 + $0x300] sm:$0xff]  ;;  %1894 = vmatpush2.bf16.msra.mxu1 %v2537_v30  ;;  %v2529_v38 = vcombine.low %v488_v27, %v492_v28  ;;  %1854 = vmatprep.subr.bf16.mxu0 %v2402_v31  ;;  %v2758_v21 = vsub.s32 0, %v2755_v20  ;;  %v2761_v22 = vsub.s32 2, %v2755_v20 }
  0x72   :  { %v356_v34 = vld [vmem:[#allocation8 + $0x320] sm:$0xff]  ;;  %v108_v24 = vsub.s32 1, %v2755_v20  ;;  %v116_v25 = vsub.s32 3, %v2755_v20 }
  0x73   :  { %v480_v35 = vld [vmem:[#allocation8 + $0x700] sm:$0xff]  ;;  %1895 = vmatprep.subr.bf16.mxu1 %v2530_v32  ;;  %v2394_v39 = vcombine.high %v352_v33, %v356_v34  ;;  %v2393_v45 = vcombine.low %v352_v33, %v356_v34  ;;  %v105_v26 = vrot.slane %v100_v23, %v2758_v21  ;;  %v113_v27 = vrot.slane %v100_v23, %v2761_v22 }
  0x74   :  { %v484_v36 = vld [vmem:[#allocation8 + $0x720] sm:$0xff]  ;;  %1855 = vmatpush2.bf16.msra.mxu0 %v2401_v37  ;;  %v109_v28 = vrot.slane %v100_v23, %v108_v24  ;;  %v117_v29 = vrot.slane %v100_v23, %v116_v25 }
  0x75   :  { %v2522_v40 = vcombine.high %v480_v35, %v484_v36  ;;  %v344_v41 = vld [vmem:[#allocation8 + $0x2c0] sm:$0xff]  ;;  %1896 = vmatpush2.bf16.msra.mxu1 %v2529_v38  ;;  %v2521_v46 = vcombine.low %v480_v35, %v484_v36  ;;  %1856 = vmatprep.subr.bf16.mxu0 %v2394_v39 }
  0x76   :  { %v348_v42 = vld [vmem:[#allocation8 + $0x2e0] sm:$0xff] }
  0x77   :  { %v472_v43 = vld [vmem:[#allocation8 + $0x6c0] sm:$0xff]  ;;  %1897 = vmatprep.subr.bf16.mxu1 %v2522_v40  ;;  %v2386_v47 = vcombine.high %v344_v41, %v348_v42  ;;  %v2385_v53 = vcombine.low %v344_v41, %v348_v42 }
  0x78   :  { %v476_v44 = vld [vmem:[#allocation8 + $0x6e0] sm:$0xff]  ;;  %1857 = vmatpush2.bf16.msra.mxu0 %v2393_v45 }
  0x79   :  { %v2514_v48 = vcombine.high %v472_v43, %v476_v44  ;;  %v336_v49 = vld [vmem:[#allocation8 + $0x280] sm:$0xff]  ;;  %1898 = vmatpush2.bf16.msra.mxu1 %v2521_v46  ;;  %v2513_v54 = vcombine.low %v472_v43, %v476_v44  ;;  %1858 = vmatprep.subr.bf16.mxu0 %v2386_v47  ;;  %v305_v44 = vld [vmem:[#allocation8 + $0x188] sm:$0xff] }
  0x7a   :  { %v340_v50 = vld [vmem:[#allocation8 + $0x2a0] sm:$0xff] }
  0x7b   :  { %v464_v51 = vld [vmem:[#allocation8 + $0x680] sm:$0xff]  ;;  %1899 = vmatprep.subr.bf16.mxu1 %v2514_v48  ;;  %v2378_v55 = vcombine.high %v336_v49, %v340_v50  ;;  %v2377_v57 = vcombine.low %v336_v49, %v340_v50  ;;  %v309_v48 = vld [vmem:[#allocation8 + $0x1a8] sm:$0xff] }
  0x7c   :  { %v468_v52 = vld [vmem:[#allocation8 + $0x6a0] sm:$0xff]  ;;  %1859 = vmatpush2.bf16.msra.mxu0 %v2385_v53  ;;  %v433_v49 = vld [vmem:[#allocation8 + $0x588] sm:$0xff] }
  0x7d   :  { %v2506_v56 = vcombine.high %v464_v51, %v468_v52  ;;  %1900 = vmatpush2.bf16.msra.mxu1 %v2513_v54  ;;  %v2505_v58 = vcombine.low %v464_v51, %v468_v52  ;;  %1860 = vmatprep.subr.bf16.mxu0 %v2378_v55  ;;  %v328_v59 = vld [vmem:[#allocation8 + $0x240] sm:$0xff]  ;;  %v437_v50 = vld [vmem:[#allocation8 + $0x5a8] sm:$0xff]  ;;  %v2348_v55 = vcombine.high %v305_v44, %v309_v48 }
  0x7e   :  { %v332_v60 = vld [vmem:[#allocation8 + $0x260] sm:$0xff]  ;;  %v297_v54 = vld [vmem:[#allocation8 + $0x148] sm:$0xff] }
  0x7f   :  { %1901 = vmatprep.subr.bf16.mxu1 %v2506_v56  ;;  %v456_v61 = vld [vmem:[#allocation8 + $0x640] sm:$0xff]  ;;  %v2370_v62 = vcombine.high %v328_v59, %v332_v60  ;;  %v2369_v0 = vcombine.low %v328_v59, %v332_v60  ;;  %v2476_v56 = vcombine.high %v433_v49, %v437_v50  ;;  %v429_v59 = vld [vmem:[#allocation8 + $0x568] sm:$0xff]  ;;  %v2347_v60 = vcombine.low %v305_v44, %v309_v48 }
  0x80   :  { %1861 = vmatpush2.bf16.msra.mxu0 %v2377_v57  ;;  %v460_v63 = vld [vmem:[#allocation8 + $0x660] sm:$0xff]  ;;  %v301_v57 = vld [vmem:[#allocation8 + $0x168] sm:$0xff] }
  0x81   :  { %1902 = vmatpush2.bf16.msra.mxu1 %v2505_v58  ;;  %v2497_v1 = vcombine.low %v456_v61, %v460_v63  ;;  %v2498_v2 = vcombine.high %v456_v61, %v460_v63  ;;  %1862 = vmatprep.subr.bf16.mxu0 %v2370_v62  ;;  %v320_v3 = vld [vmem:[#allocation8 + $0x200] sm:$0xff]  ;;  %v425_v58 = vld [vmem:[#allocation8 + $0x548] sm:$0xff]  ;;  %v2475_v61 = vcombine.low %v433_v49, %v437_v50 }
  0x82   :  { %v324_v4 = vld [vmem:[#allocation8 + $0x220] sm:$0xff]  ;;  %v2340_v62 = vcombine.high %v297_v54, %v301_v57  ;;  %v2468_v63 = vcombine.high %v425_v58, %v429_v59  ;;  %v505_v48 = vld [vmem:[#allocation8 + $0x7c8] sm:$0xff] }
  0x83   :  { %1903 = vmatprep.subr.bf16.mxu1 %v2498_v2  ;;  %v448_v5 = vld [vmem:[#allocation8 + $0x600] sm:$0xff]  ;;  %v2362_v6 = vcombine.high %v320_v3, %v324_v4  ;;  %v2361_v8 = vcombine.low %v320_v3, %v324_v4  ;;  %v417_v2 = vld [vmem:[#allocation8 + $0x508] sm:$0xff]  ;;  %v2339_v4 = vcombine.low %v297_v54, %v301_v57 }
  0x84   :  { %1863 = vmatpush2.bf16.msra.mxu0 %v2369_v0  ;;  %v452_v7 = vld [vmem:[#allocation8 + $0x620] sm:$0xff]  ;;  %v289_v0 = vld [vmem:[#allocation8 + $0x108] sm:$0xff] }
  0x85   :  { %1904 = vmatpush2.bf16.msra.mxu1 %v2497_v1  ;;  %v2489_v9 = vcombine.low %v448_v5, %v452_v7  ;;  %v2490_v10 = vcombine.high %v448_v5, %v452_v7  ;;  %1864 = vmatprep.subr.bf16.mxu0 %v2362_v6  ;;  %v293_v1 = vld [vmem:[#allocation8 + $0x128] sm:$0xff]  ;;  %v2467_v5 = vcombine.low %v425_v58, %v429_v59 }
  0x86   :  { %v421_v3 = vld [vmem:[#allocation8 + $0x528] sm:$0xff]  ;;  %v2332_v6 = vcombine.high %v289_v0, %v293_v1  ;;  %v2331_v12 = vcombine.low %v289_v0, %v293_v1 }
  0x87   :  { %1905 = vmatprep.subr.bf16.mxu1 %v2490_v10  ;;  %v2460_v7 = vcombine.high %v417_v2, %v421_v3  ;;  %v409_v10 = vld [vmem:[#allocation8 + $0x4c8] sm:$0xff]  ;;  %v2459_v13 = vcombine.low %v417_v2, %v421_v3 }
  0x88   :  { %1865 = vmatpush2.bf16.msra.mxu0 %v2361_v8  ;;  %v281_v8 = vld [vmem:[#allocation8 + $0xc8] sm:$0xff]  ;;  %v2452_v15 = vcombine.high %v409_v10, %v413_v11 }
  0x89   :  { %1906 = vmatpush2.bf16.msra.mxu1 %v2489_v9  ;;  %1916 = vmatprep.subr.bf16.mxu0 %v2356_v14  ;;  %v285_v9 = vld [vmem:[#allocation8 + $0xe8] sm:$0xff] }
  0x8a   :  { %1957 = vmatprep.subr.bf16.mxu1 %v2484_v18  ;;  %v2324_v14 = vcombine.high %v281_v8, %v285_v9  ;;  %v401_v18 = vld [vmem:[#allocation8 + $0x488] sm:$0xff]  ;;  %v2323_v23 = vcombine.low %v281_v8, %v285_v9 }
  0x8b   :  { %v509_v49 = vld [vmem:[#allocation8 + $0x7e8] sm:$0xff] }
  0x8c   :  { %v369_v57 = vld [vmem:[#allocation8 + $0x388] sm:$0xff] }
  0x8d   :  { %v373_v58 = vld [vmem:[#allocation8 + $0x3a8] sm:$0xff] }
  0x8e   :  { %v497_v59 = vld [vmem:[#allocation8 + $0x788] sm:$0xff] }
  0x8f   :  { %v361_v1 = vld [vmem:[#allocation8 + $0x348] sm:$0xff] }
  0x90   :  { %v365_v2 = vld [vmem:[#allocation8 + $0x368] sm:$0xff] }
  0x91   :  { %v489_v3 = vld [vmem:[#allocation8 + $0x748] sm:$0xff] }
  0x92   :  { %v353_v9 = vld [vmem:[#allocation8 + $0x308] sm:$0xff] }
 0x10b   :  { %v200_v30 = vpop.f32.mrf.mxu0 }
 0x10c   :  { %v241_v31 = vpop.f32.mrf.mxu1  ;;  %v201_v32 = vadd.f32 %v200_v30, %v105_v26  ;;  %v2451_v26 = vcombine.low %v409_v10, %v413_v11  ;;  %v269_v30 = vld [vmem:[#allocation8 + $0x68] sm:$0xff] }
 0x10d   :  { %v242_v33 = vadd.f32 %v241_v31, %v113_v27  ;;  %v202_v34 = vpop.f32.mrf.mxu0  ;;  %v393_v31 = vld [vmem:[#allocation8 + $0x448] sm:$0xff] }
 0x10e   :  { %v243_v35 = vpop.f32.mrf.mxu1  ;;  %v203_v37 = vadd.f32 %v202_v34, %v109_v28  ;;  %v248_v39 = vmax.f32 %v201_v32, 0.0  ;;  %v2444_v28 = vcombine.high %v401_v18, %v405_v19  ;;  %v397_v32 = vld [vmem:[#allocation8 + $0x468] sm:$0xff]  ;;  %v2443_v34 = vcombine.low %v401_v18, %v405_v19 }
 0x10f   :  { %v250_v36 = vmax.f32 %v242_v33, 0.0  ;;  %v244_v38 = vadd.f32 %v243_v35, %v117_v29  ;;  %v204_v40 = vpop.f32.mrf.mxu0  ;;  %v265_v29 = vld [vmem:[#allocation8 + $0x48] sm:$0xff] }
 0x110   :  { %v245_v41 = vpop.f32.mrf.mxu1  ;;  %v249_v42 = vmax.f32 %v203_v37, 0.0  ;;  %v2777_v53 = vpack.c.bf16 %v248_v39, %v248_v39  ;;  %v2308_v35 = vcombine.high %v265_v29, %v269_v30  ;;  %v257_v37 = vld [vmem:[#allocation8 + $0x8] sm:$0xff] }
 0x111   :  { %v251_v43 = vmax.f32 %v244_v38, 0.0  ;;  %v2771_v45 = vpack.c.bf16 %v250_v36, %v250_v36  ;;  %v205_v46 = vpop.f32.mrf.mxu0  ;;  %v2436_v36 = vcombine.high %v393_v31, %v397_v32  ;;  %v261_v38 = vld [vmem:[#allocation8 + $0x28] sm:$0xff]  ;;  %v2307_v41 = vcombine.low %v265_v29, %v269_v30 }
 0x112   :  { %v246_v47 = vpop.f32.mrf.mxu1  ;;  %v2773_v51 = vpack.c.bf16 %v249_v42, %v249_v42  ;;  %v385_v39 = vld [vmem:[#allocation8 + $0x408] sm:$0xff]  ;;  %v2435_v42 = vcombine.low %v393_v31, %v397_v32  ;;  %v2299_v50 = vcombine.low %v257_v37, %v261_v38 }
 0x113   :  { %v2775_v52 = vpack.c.bf16 %v251_v43, %v251_v43  ;;  %v389_v40 = vld [vmem:[#allocation8 + $0x428] sm:$0xff]  ;;  %v2300_v43 = vcombine.high %v257_v37, %v261_v38 }
 0x114   :  { %1866 = vmatprep.mubr.bf16.mxu0 %v2773_v51  ;;  %v2428_v44 = vcombine.high %v385_v39, %v389_v40  ;;  %v377_v46 = vld [vmem:[#allocation8 + $0x3c8] sm:$0xff]  ;;  %v2427_v54 = vcombine.low %v385_v39, %v389_v40 }
 0x115   :  { %1907 = vmatprep.mubr.bf16.mxu1 %v2775_v52  ;;  %1867 = vmatmul.mubr.bf16.vlgmr.msra.gmra.mxu0 %v2777_v53  ;;  %v381_v47 = vld [vmem:[#allocation8 + $0x3e8] sm:$0xff] }
 0x116   :  { %1908 = vmatmul.mubr.bf16.vlgmr.msra.gmra.mxu1 %v2771_v45  ;;  %1917 = vmatpush1.bf16.msra.mxu0 %v2355_v16  ;;  %v273_v16 = vld [vmem:[#allocation8 + $0x88] sm:$0xff] }
 0x117   :  { %1958 = vmatpush1.bf16.msra.mxu1 %v2483_v17  ;;  %1948 = vmatprep.mubr.bf16.mxu0 %v2773_v51  ;;  %v277_v17 = vld [vmem:[#allocation8 + $0xa8] sm:$0xff] }
 0x118   :  { %1989 = vmatprep.mubr.bf16.mxu1 %v2775_v52  ;;  %1918 = vmatprep.subr.bf16.mxu0 %v2348_v55  ;;  %v2316_v27 = vcombine.high %v273_v16, %v277_v17  ;;  %v2315_v33 = vcombine.low %v273_v16, %v277_v17  ;;  %v2420_v55 = vcombine.high %v377_v46, %v381_v47  ;;  %v357_v10 = vld [vmem:[#allocation8 + $0x328] sm:$0xff] }
 0x119   :  { %1959 = vmatprep.subr.bf16.mxu1 %v2476_v56  ;;  %v2548_v56 = vcombine.high %v505_v48, %v509_v49  ;;  %v481_v11 = vld [vmem:[#allocation8 + $0x708] sm:$0xff] }
 0x11a   :  { %1919 = vmatpush1.bf16.msra.mxu0 %v2347_v60  ;;  %v501_v60 = vld [vmem:[#allocation8 + $0x7a8] sm:$0xff] }
 0x11b   :  { %1960 = vmatpush1.bf16.msra.mxu1 %v2475_v61  ;;  %1920 = vmatprep.subr.bf16.mxu0 %v2340_v62  ;;  %v2419_v61 = vcombine.low %v377_v46, %v381_v47  ;;  %v2547_v62 = vcombine.low %v505_v48, %v509_v49  ;;  %v2540_v0 = vcombine.high %v497_v59, %v501_v60  ;;  %v345_v17 = vld [vmem:[#allocation8 + $0x2c8] sm:$0xff] }
 0x11c   :  { %1961 = vmatprep.subr.bf16.mxu1 %v2468_v63  ;;  %v2412_v63 = vcombine.high %v369_v57, %v373_v58  ;;  %v349_v18 = vld [vmem:[#allocation8 + $0x2e8] sm:$0xff] }
 0x11d   :  { %v473_v19 = vld [vmem:[#allocation8 + $0x6c8] sm:$0xff] }
 0x11e   :  { %1921 = vmatpush1.bf16.msra.mxu0 %v2339_v4  ;;  %v493_v4 = vld [vmem:[#allocation8 + $0x768] sm:$0xff] }
 0x11f   :  { %1962 = vmatpush1.bf16.msra.mxu1 %v2467_v5  ;;  %1922 = vmatprep.subr.bf16.mxu0 %v2332_v6  ;;  %v2411_v5 = vcombine.low %v369_v57, %v373_v58  ;;  %v2539_v6 = vcombine.low %v497_v59, %v501_v60  ;;  %v2532_v8 = vcombine.high %v489_v3, %v493_v4  ;;  %v337_v30 = vld [vmem:[#allocation8 + $0x288] sm:$0xff]  ;;  %v314_v58 = vld [vmem:[#allocation8 + $0x1d0] sm:$0xff] }
 0x120   :  { %1963 = vmatprep.subr.bf16.mxu1 %v2460_v7  ;;  %v2404_v7 = vcombine.high %v361_v1, %v365_v2  ;;  %v341_v31 = vld [vmem:[#allocation8 + $0x2a8] sm:$0xff]  ;;  %v318_v59 = vld [vmem:[#allocation8 + $0x1f0] sm:$0xff] }
 0x121   :  { %v465_v32 = vld [vmem:[#allocation8 + $0x688] sm:$0xff]  ;;  %v442_v60 = vld [vmem:[#allocation8 + $0x5d0] sm:$0xff] }
 0x122   :  { %1923 = vmatpush1.bf16.msra.mxu0 %v2331_v12  ;;  %v485_v12 = vld [vmem:[#allocation8 + $0x728] sm:$0xff] }
 0x123   :  { %1964 = vmatpush1.bf16.msra.mxu1 %v2459_v13  ;;  %1924 = vmatprep.subr.bf16.mxu0 %v2324_v14  ;;  %v2403_v13 = vcombine.low %v361_v1, %v365_v2  ;;  %v2531_v14 = vcombine.low %v489_v3, %v493_v4  ;;  %v2524_v16 = vcombine.high %v481_v11, %v485_v12  ;;  %v329_v38 = vld [vmem:[#allocation8 + $0x248] sm:$0xff]  ;;  %v306_v2 = vld [vmem:[#allocation8 + $0x190] sm:$0xff] }
 0x124   :  { %1965 = vmatprep.subr.bf16.mxu1 %v2452_v15  ;;  %v2396_v15 = vcombine.high %v353_v9, %v357_v10  ;;  %v333_v39 = vld [vmem:[#allocation8 + $0x268] sm:$0xff]  ;;  %v310_v3 = vld [vmem:[#allocation8 + $0x1b0] sm:$0xff] }
 0x125   :  { %v457_v40 = vld [vmem:[#allocation8 + $0x648] sm:$0xff]  ;;  %v434_v4 = vld [vmem:[#allocation8 + $0x590] sm:$0xff] }
 0x126   :  { %1925 = vmatpush1.bf16.msra.mxu0 %v2323_v23  ;;  %v477_v23 = vld [vmem:[#allocation8 + $0x6e8] sm:$0xff] }
 0x127   :  { %1966 = vmatpush1.bf16.msra.mxu1 %v2451_v26  ;;  %1926 = vmatprep.subr.bf16.mxu0 %v2316_v27  ;;  %v2395_v26 = vcombine.low %v353_v9, %v357_v10  ;;  %v2523_v27 = vcombine.low %v481_v11, %v485_v12  ;;  %v2516_v29 = vcombine.high %v473_v19, %v477_v23  ;;  %v321_v47 = vld [vmem:[#allocation8 + $0x208] sm:$0xff]  ;;  %v298_v10 = vld [vmem:[#allocation8 + $0x150] sm:$0xff] }
 0x128   :  { %1967 = vmatprep.subr.bf16.mxu1 %v2444_v28  ;;  %v2388_v28 = vcombine.high %v345_v17, %v349_v18  ;;  %v325_v48 = vld [vmem:[#allocation8 + $0x228] sm:$0xff]  ;;  %v302_v11 = vld [vmem:[#allocation8 + $0x170] sm:$0xff] }
 0x129   :  { %v449_v49 = vld [vmem:[#allocation8 + $0x608] sm:$0xff]  ;;  %v426_v12 = vld [vmem:[#allocation8 + $0x550] sm:$0xff] }
 0x12a   :  { %1927 = vmatpush1.bf16.msra.mxu0 %v2315_v33  ;;  %v469_v33 = vld [vmem:[#allocation8 + $0x6a8] sm:$0xff] }
 0x12b   :  { %1968 = vmatpush1.bf16.msra.mxu1 %v2443_v34  ;;  %1928 = vmatprep.subr.bf16.mxu0 %v2308_v35  ;;  %v2387_v34 = vcombine.low %v345_v17, %v349_v18  ;;  %v2515_v35 = vcombine.low %v473_v19, %v477_v23  ;;  %v2508_v37 = vcombine.high %v465_v32, %v469_v33  ;;  %v290_v18 = vld [vmem:[#allocation8 + $0x110] sm:$0xff] }
 0x12c   :  { %1969 = vmatprep.subr.bf16.mxu1 %v2436_v36  ;;  %v2380_v36 = vcombine.high %v337_v30, %v341_v31  ;;  %v294_v19 = vld [vmem:[#allocation8 + $0x130] sm:$0xff] }
 0x12d   :  { %v418_v23 = vld [vmem:[#allocation8 + $0x510] sm:$0xff] }
 0x12e   :  { %1929 = vmatpush1.bf16.msra.mxu0 %v2307_v41  ;;  %v461_v41 = vld [vmem:[#allocation8 + $0x668] sm:$0xff] }
 0x12f   :  { %1970 = vmatpush1.bf16.msra.mxu1 %v2435_v42  ;;  %1930 = vmatprep.subr.bf16.mxu0 %v2300_v43  ;;  %v2379_v42 = vcombine.low %v337_v30, %v341_v31  ;;  %v2507_v43 = vcombine.low %v465_v32, %v469_v33  ;;  %v2500_v46 = vcombine.high %v457_v40, %v461_v41  ;;  %v282_v31 = vld [vmem:[#allocation8 + $0xd0] sm:$0xff] }
 0x130   :  { %1971 = vmatprep.subr.bf16.mxu1 %v2428_v44  ;;  %v2372_v44 = vcombine.high %v329_v38, %v333_v39  ;;  %v286_v32 = vld [vmem:[#allocation8 + $0xf0] sm:$0xff] }
 0x131   :  { %v410_v33 = vld [vmem:[#allocation8 + $0x4d0] sm:$0xff] }
 0x132   :  { %1931 = vmatpush1.bf16.msra.mxu0 %v2299_v50  ;;  %v453_v50 = vld [vmem:[#allocation8 + $0x628] sm:$0xff] }
 0x133   :  { %1972 = vmatpush1.bf16.msra.mxu1 %v2427_v54  ;;  %1932 = vmatprep.subr.bf16.mxu0 %v2420_v55  ;;  %v2371_v54 = vcombine.low %v329_v38, %v333_v39  ;;  %v2499_v55 = vcombine.low %v457_v40, %v461_v41  ;;  %v2492_v57 = vcombine.high %v449_v49, %v453_v50  ;;  %v274_v39 = vld [vmem:[#allocation8 + $0x90] sm:$0xff] }
 0x134   :  { %1973 = vmatprep.subr.bf16.mxu1 %v2548_v56  ;;  %v2364_v56 = vcombine.high %v321_v47, %v325_v48  ;;  %v278_v40 = vld [vmem:[#allocation8 + $0xb0] sm:$0xff] }
 0x135   :  { %v402_v41 = vld [vmem:[#allocation8 + $0x490] sm:$0xff] }
 0x136   :  { %1933 = vmatpush2.bf16.msra.mxu0 %v2419_v61  ;;  %v446_v61 = vld [vmem:[#allocation8 + $0x5f0] sm:$0xff] }
 0x137   :  { %1974 = vmatpush2.bf16.msra.mxu1 %v2547_v62  ;;  %1934 = vmatprep.subr.bf16.mxu0 %v2412_v63  ;;  %v2363_v62 = vcombine.low %v321_v47, %v325_v48  ;;  %v2491_v63 = vcombine.low %v449_v49, %v453_v50  ;;  %v2486_v1 = vcombine.high %v442_v60, %v446_v61  ;;  %v266_v48 = vld [vmem:[#allocation8 + $0x50] sm:$0xff] }
 0x138   :  { %1975 = vmatprep.subr.bf16.mxu1 %v2540_v0  ;;  %v2358_v0 = vcombine.high %v314_v58, %v318_v59  ;;  %v270_v49 = vld [vmem:[#allocation8 + $0x70] sm:$0xff] }
 0x139   :  { %v394_v50 = vld [vmem:[#allocation8 + $0x450] sm:$0xff] }
 0x13a   :  { %1935 = vmatpush2.bf16.msra.mxu0 %v2411_v5  ;;  %v438_v5 = vld [vmem:[#allocation8 + $0x5b0] sm:$0xff] }
 0x13b   :  { %1976 = vmatpush2.bf16.msra.mxu1 %v2539_v6  ;;  %1936 = vmatprep.subr.bf16.mxu0 %v2404_v7  ;;  %v2357_v6 = vcombine.low %v314_v58, %v318_v59  ;;  %v2485_v7 = vcombine.low %v442_v60, %v446_v61  ;;  %v2478_v9 = vcombine.high %v434_v4, %v438_v5  ;;  %v258_v59 = vld [vmem:[#allocation8 + $0x10] sm:$0xff] }
 0x13c   :  { %1977 = vmatprep.subr.bf16.mxu1 %v2532_v8  ;;  %v2350_v8 = vcombine.high %v306_v2, %v310_v3  ;;  %v262_v60 = vld [vmem:[#allocation8 + $0x30] sm:$0xff] }
 0x13d   :  { %v386_v61 = vld [vmem:[#allocation8 + $0x410] sm:$0xff] }
 0x13e   :  { %1937 = vmatpush2.bf16.msra.mxu0 %v2403_v13  ;;  %v430_v13 = vld [vmem:[#allocation8 + $0x570] sm:$0xff] }
 0x13f   :  { %1978 = vmatpush2.bf16.msra.mxu1 %v2531_v14  ;;  %1938 = vmatprep.subr.bf16.mxu0 %v2396_v15  ;;  %v2349_v14 = vcombine.low %v306_v2, %v310_v3  ;;  %v2477_v15 = vcombine.low %v434_v4, %v438_v5  ;;  %v2470_v17 = vcombine.high %v426_v12, %v430_v13  ;;  %v378_v3 = vld [vmem:[#allocation8 + $0x3d0] sm:$0xff] }
 0x140   :  { %1979 = vmatprep.subr.bf16.mxu1 %v2524_v16  ;;  %v2342_v16 = vcombine.high %v298_v10, %v302_v11  ;;  %v382_v4 = vld [vmem:[#allocation8 + $0x3f0] sm:$0xff] }
 0x141   :  { %v506_v5 = vld [vmem:[#allocation8 + $0x7d0] sm:$0xff] }
 0x142   :  { %1939 = vmatpush2.bf16.msra.mxu0 %v2395_v26  ;;  %v422_v26 = vld [vmem:[#allocation8 + $0x530] sm:$0xff] }
 0x143   :  { %1980 = vmatpush2.bf16.msra.mxu1 %v2523_v27  ;;  %1940 = vmatprep.subr.bf16.mxu0 %v2388_v28  ;;  %v2341_v27 = vcombine.low %v298_v10, %v302_v11  ;;  %v2469_v28 = vcombine.low %v426_v12, %v430_v13  ;;  %v2462_v30 = vcombine.high %v418_v23, %v422_v26  ;;  %v370_v11 = vld [vmem:[#allocation8 + $0x390] sm:$0xff] }
 0x144   :  { %1981 = vmatprep.subr.bf16.mxu1 %v2516_v29  ;;  %v2334_v29 = vcombine.high %v290_v18, %v294_v19  ;;  %v374_v12 = vld [vmem:[#allocation8 + $0x3b0] sm:$0xff] }
 0x145   :  { %v498_v13 = vld [vmem:[#allocation8 + $0x790] sm:$0xff] }
 0x146   :  { %1941 = vmatpush2.bf16.msra.mxu0 %v2387_v34  ;;  %v414_v34 = vld [vmem:[#allocation8 + $0x4f0] sm:$0xff] }
 0x147   :  { %1982 = vmatpush2.bf16.msra.mxu1 %v2515_v35  ;;  %1942 = vmatprep.subr.bf16.mxu0 %v2380_v36  ;;  %v2333_v35 = vcombine.low %v290_v18, %v294_v19  ;;  %v2461_v36 = vcombine.low %v418_v23, %v422_v26  ;;  %v2454_v38 = vcombine.high %v410_v33, %v414_v34  ;;  %v362_v19 = vld [vmem:[#allocation8 + $0x350] sm:$0xff] }
 0x148   :  { %1983 = vmatprep.subr.bf16.mxu1 %v2508_v37  ;;  %v2326_v37 = vcombine.high %v282_v31, %v286_v32  ;;  %v366_v23 = vld [vmem:[#allocation8 + $0x370] sm:$0xff] }
 0x149   :  { %v490_v26 = vld [vmem:[#allocation8 + $0x750] sm:$0xff] }
 0x14a   :  { %1943 = vmatpush2.bf16.msra.mxu0 %v2379_v42  ;;  %v406_v42 = vld [vmem:[#allocation8 + $0x4b0] sm:$0xff] }
 0x14b   :  { %1984 = vmatpush2.bf16.msra.mxu1 %v2507_v43  ;;  %1944 = vmatprep.subr.bf16.mxu0 %v2372_v44  ;;  %v2325_v43 = vcombine.low %v282_v31, %v286_v32  ;;  %v2453_v44 = vcombine.low %v410_v33, %v414_v34  ;;  %v2446_v47 = vcombine.high %v402_v41, %v406_v42  ;;  %v354_v32 = vld [vmem:[#allocation8 + $0x310] sm:$0xff] }
 0x14c   :  { %1985 = vmatprep.subr.bf16.mxu1 %v2500_v46  ;;  %v2318_v46 = vcombine.high %v274_v39, %v278_v40  ;;  %v358_v33 = vld [vmem:[#allocation8 + $0x330] sm:$0xff] }
 0x14d   :  { %v482_v34 = vld [vmem:[#allocation8 + $0x710] sm:$0xff] }
 0x14e   :  { %1945 = vmatpush2.bf16.msra.mxu0 %v2371_v54  ;;  %v398_v54 = vld [vmem:[#allocation8 + $0x470] sm:$0xff] }
 0x14f   :  { %1986 = vmatpush2.bf16.msra.mxu1 %v2499_v55  ;;  %1946 = vmatprep.subr.bf16.mxu0 %v2364_v56  ;;  %v2317_v55 = vcombine.low %v274_v39, %v278_v40  ;;  %v2445_v56 = vcombine.low %v402_v41, %v406_v42  ;;  %v2438_v58 = vcombine.high %v394_v50, %v398_v54  ;;  %v346_v40 = vld [vmem:[#allocation8 + $0x2d0] sm:$0xff] }
 0x150   :  { %1987 = vmatprep.subr.bf16.mxu1 %v2492_v57  ;;  %v2310_v57 = vcombine.high %v266_v48, %v270_v49  ;;  %v350_v41 = vld [vmem:[#allocation8 + $0x2f0] sm:$0xff] }
 0x151   :  { %v474_v42 = vld [vmem:[#allocation8 + $0x6d0] sm:$0xff] }
 0x152   :  { %1947 = vmatpush2.bf16.msra.mxu0 %v2363_v62  ;;  %v390_v62 = vld [vmem:[#allocation8 + $0x430] sm:$0xff] }
 0x153   :  { %1988 = vmatpush2.bf16.msra.mxu1 %v2491_v63  ;;  %1998 = vmatprep.subr.bf16.mxu0 %v2358_v0  ;;  %v2309_v63 = vcombine.low %v266_v48, %v270_v49  ;;  %v2437_v0 = vcombine.low %v394_v50, %v398_v54  ;;  %v2430_v2 = vcombine.high %v386_v61, %v390_v62  ;;  %v338_v49 = vld [vmem:[#allocation8 + $0x290] sm:$0xff] }
 0x154   :  { %2039 = vmatprep.subr.bf16.mxu1 %v2486_v1  ;;  %v2302_v1 = vcombine.high %v258_v59, %v262_v60  ;;  %v342_v50 = vld [vmem:[#allocation8 + $0x2b0] sm:$0xff] }
 0x155   :  { %1949 = vmatmul.mubr.bf16.vlgmr.msra.gmra.mxu0 %v2777_v53  ;;  %v466_v54 = vld [vmem:[#allocation8 + $0x690] sm:$0xff] }
 0x156   :  { %1990 = vmatmul.mubr.bf16.vlgmr.msra.gmra.mxu1 %v2771_v45  ;;  %1999 = vmatpush1.bf16.msra.mxu0 %v2357_v6  ;;  %v510_v6 = vld [vmem:[#allocation8 + $0x7f0] sm:$0xff] }
 0x157   :  { %2030 = vmatprep.mubr.bf16.mxu0 %v2773_v51  ;;  %2040 = vmatpush1.bf16.msra.mxu1 %v2485_v7  ;;  %v2301_v7 = vcombine.low %v258_v59, %v262_v60  ;;  %v2550_v10 = vcombine.high %v506_v5, %v510_v6  ;;  %v330_v60 = vld [vmem:[#allocation8 + $0x250] sm:$0xff] }
 0x158   :  { %2071 = vmatprep.mubr.bf16.mxu1 %v2775_v52  ;;  %2000 = vmatprep.subr.bf16.mxu0 %v2350_v8  ;;  %v2429_v8 = vcombine.low %v386_v61, %v390_v62  ;;  %v334_v61 = vld [vmem:[#allocation8 + $0x270] sm:$0xff] }
 0x159   :  { %2041 = vmatprep.subr.bf16.mxu1 %v2478_v9  ;;  %v2422_v9 = vcombine.high %v378_v3, %v382_v4  ;;  %v458_v62 = vld [vmem:[#allocation8 + $0x650] sm:$0xff] }
 0x15a   :  { %2001 = vmatpush1.bf16.msra.mxu0 %v2349_v14  ;;  %v502_v14 = vld [vmem:[#allocation8 + $0x7b0] sm:$0xff] }
 0x15b   :  { %2042 = vmatpush1.bf16.msra.mxu1 %v2477_v15  ;;  %2002 = vmatprep.subr.bf16.mxu0 %v2342_v16  ;;  %v2421_v15 = vcombine.low %v378_v3, %v382_v4  ;;  %v2549_v16 = vcombine.low %v506_v5, %v510_v6  ;;  %v2542_v18 = vcombine.high %v498_v13, %v502_v14  ;;  %v322_v4 = vld [vmem:[#allocation8 + $0x210] sm:$0xff] }
 0x15c   :  { %2043 = vmatprep.subr.bf16.mxu1 %v2470_v17  ;;  %v2414_v17 = vcombine.high %v370_v11, %v374_v12  ;;  %v326_v5 = vld [vmem:[#allocation8 + $0x230] sm:$0xff] }
 0x15d   :  { %v450_v6 = vld [vmem:[#allocation8 + $0x610] sm:$0xff] }
 0x15e   :  { %2003 = vmatpush1.bf16.msra.mxu0 %v2341_v27  ;;  %v494_v27 = vld [vmem:[#allocation8 + $0x770] sm:$0xff] }
 0x15f   :  { %2044 = vmatpush1.bf16.msra.mxu1 %v2469_v28  ;;  %2004 = vmatprep.subr.bf16.mxu0 %v2334_v29  ;;  %v2413_v28 = vcombine.low %v370_v11, %v374_v12  ;;  %v2541_v29 = vcombine.low %v498_v13, %v502_v14  ;;  %v2534_v31 = vcombine.high %v490_v26, %v494_v27  ;;  %v315_v12 = vld [vmem:[#allocation8 + $0x1d8] sm:$0xff] }
 0x160   :  { %2045 = vmatprep.subr.bf16.mxu1 %v2462_v30  ;;  %v2406_v30 = vcombine.high %v362_v19, %v366_v23  ;;  %v319_v13 = vld [vmem:[#allocation8 + $0x1f8] sm:$0xff] }
 0x161   :  { %v443_v14 = vld [vmem:[#allocation8 + $0x5d8] sm:$0xff] }
 0x162   :  { %2005 = vmatpush1.bf16.msra.mxu0 %v2333_v35  ;;  %v486_v35 = vld [vmem:[#allocation8 + $0x730] sm:$0xff] }
 0x163   :  { %2046 = vmatpush1.bf16.msra.mxu1 %v2461_v36  ;;  %2006 = vmatprep.subr.bf16.mxu0 %v2326_v37  ;;  %v2405_v36 = vcombine.low %v362_v19, %v366_v23  ;;  %v2533_v37 = vcombine.low %v490_v26, %v494_v27  ;;  %v2526_v39 = vcombine.high %v482_v34, %v486_v35  ;;  %v307_v23 = vld [vmem:[#allocation8 + $0x198] sm:$0xff] }
 0x164   :  { %2047 = vmatprep.subr.bf16.mxu1 %v2454_v38  ;;  %v2398_v38 = vcombine.high %v354_v32, %v358_v33  ;;  %v311_v26 = vld [vmem:[#allocation8 + $0x1b8] sm:$0xff]  ;;  %v2359_v27 = vcombine.low %v315_v12, %v319_v13 }
 0x166   :  { %2007 = vmatpush1.bf16.msra.mxu0 %v2325_v43  ;;  %v478_v43 = vld [vmem:[#allocation8 + $0x6f0] sm:$0xff] }
 0x167   :  { %2048 = vmatpush1.bf16.msra.mxu1 %v2453_v44  ;;  %2008 = vmatprep.subr.bf16.mxu0 %v2318_v46  ;;  %v2397_v44 = vcombine.low %v354_v32, %v358_v33  ;;  %v2525_v46 = vcombine.low %v482_v34, %v486_v35  ;;  %v2518_v48 = vcombine.high %v474_v42, %v478_v43  ;;  %v299_v32 = vld [vmem:[#allocation8 + $0x158] sm:$0xff] }
 0x168   :  { %2049 = vmatprep.subr.bf16.mxu1 %v2446_v47  ;;  %v2390_v47 = vcombine.high %v346_v40, %v350_v41  ;;  %v303_v33 = vld [vmem:[#allocation8 + $0x178] sm:$0xff] }
 0x169   :  { %v427_v35 = vld [vmem:[#allocation8 + $0x558] sm:$0xff] }
 0x16a   :  { %2009 = vmatpush1.bf16.msra.mxu0 %v2317_v55  ;;  %v470_v55 = vld [vmem:[#allocation8 + $0x6b0] sm:$0xff] }
 0x16b   :  { %2050 = vmatpush1.bf16.msra.mxu1 %v2445_v56  ;;  %2010 = vmatprep.subr.bf16.mxu0 %v2310_v57  ;;  %v2389_v56 = vcombine.low %v346_v40, %v350_v41  ;;  %v2517_v57 = vcombine.low %v474_v42, %v478_v43  ;;  %v2510_v59 = vcombine.high %v466_v54, %v470_v55  ;;  %v291_v41 = vld [vmem:[#allocation8 + $0x118] sm:$0xff] }
 0x16c   :  { %2051 = vmatprep.subr.bf16.mxu1 %v2438_v58  ;;  %v2382_v58 = vcombine.high %v338_v49, %v342_v50  ;;  %v295_v42 = vld [vmem:[#allocation8 + $0x138] sm:$0xff] }
 0x16d   :  { %v419_v43 = vld [vmem:[#allocation8 + $0x518] sm:$0xff] }
 0x16e   :  { %2011 = vmatpush1.bf16.msra.mxu0 %v2309_v63  ;;  %v462_v63 = vld [vmem:[#allocation8 + $0x670] sm:$0xff] }
 0x16f   :  { %2052 = vmatpush1.bf16.msra.mxu1 %v2437_v0  ;;  %2012 = vmatprep.subr.bf16.mxu0 %v2302_v1  ;;  %v2381_v0 = vcombine.low %v338_v49, %v342_v50  ;;  %v2509_v1 = vcombine.low %v466_v54, %v470_v55  ;;  %v2502_v3 = vcombine.high %v458_v62, %v462_v63  ;;  %v283_v49 = vld [vmem:[#allocation8 + $0xd8] sm:$0xff] }
 0x170   :  { %2053 = vmatprep.subr.bf16.mxu1 %v2430_v2  ;;  %v2374_v2 = vcombine.high %v330_v60, %v334_v61  ;;  %v287_v50 = vld [vmem:[#allocation8 + $0xf8] sm:$0xff] }
 0x171   :  { %v411_v54 = vld [vmem:[#allocation8 + $0x4d8] sm:$0xff] }
 0x172   :  { %2013 = vmatpush1.bf16.msra.mxu0 %v2301_v7  ;;  %v454_v7 = vld [vmem:[#allocation8 + $0x630] sm:$0xff]  ;;  %v415_v55 = vld [vmem:[#allocation8 + $0x4f8] sm:$0xff] }
 0x173   :  { %2054 = vmatpush1.bf16.msra.mxu1 %v2429_v8  ;;  %2014 = vmatprep.subr.bf16.mxu0 %v2422_v9  ;;  %v2373_v8 = vcombine.low %v330_v60, %v334_v61  ;;  %v2501_v9 = vcombine.low %v458_v62, %v462_v63  ;;  %v2494_v11 = vcombine.high %v450_v6, %v454_v7  ;;  %v279_v60 = vld [vmem:[#allocation8 + $0xb8] sm:$0xff] }
 0x174   :  { %2055 = vmatprep.subr.bf16.mxu1 %v2550_v10  ;;  %v2366_v10 = vcombine.high %v322_v4, %v326_v5  ;;  %v403_v61 = vld [vmem:[#allocation8 + $0x498] sm:$0xff]  ;;  %v2327_v63 = vcombine.low %v283_v49, %v287_v50 }
 0x175   :  { %v407_v62 = vld [vmem:[#allocation8 + $0x4b8] sm:$0xff] }
 0x176   :  { %2015 = vmatpush2.bf16.msra.mxu0 %v2421_v15  ;;  %v447_v15 = vld [vmem:[#allocation8 + $0x5f8] sm:$0xff] }
 0x177   :  { %2056 = vmatpush2.bf16.msra.mxu1 %v2549_v16  ;;  %2016 = vmatprep.subr.bf16.mxu0 %v2414_v17  ;;  %v2365_v16 = vcombine.low %v322_v4, %v326_v5  ;;  %v2493_v17 = vcombine.low %v450_v6, %v454_v7  ;;  %v2488_v19 = vcombine.high %v443_v14, %v447_v15  ;;  %v271_v4 = vld [vmem:[#allocation8 + $0x78] sm:$0xff] }
 0x178   :  { %2057 = vmatprep.subr.bf16.mxu1 %v2542_v18  ;;  %v2360_v18 = vcombine.high %v315_v12, %v319_v13  ;;  %v395_v5 = vld [vmem:[#allocation8 + $0x458] sm:$0xff] }
 0x179   :  { %v399_v6 = vld [vmem:[#allocation8 + $0x478] sm:$0xff] }
 0x17a   :  { %2017 = vmatpush2.bf16.msra.mxu0 %v2413_v28  ;;  %v435_v28 = vld [vmem:[#allocation8 + $0x598] sm:$0xff] }
 0x17b   :  { %2058 = vmatpush2.bf16.msra.mxu1 %v2541_v29  ;;  %2018 = vmatprep.subr.bf16.mxu0 %v2406_v30  ;;  %v439_v29 = vld [vmem:[#allocation8 + $0x5b8] sm:$0xff]  ;;  %v2487_v30 = vcombine.low %v443_v14, %v447_v15 }
 0x17c   :  { %2059 = vmatprep.subr.bf16.mxu1 %v2534_v31  ;;  %v2352_v31 = vcombine.high %v307_v23, %v311_v26  ;;  %v2480_v34 = vcombine.high %v435_v28, %v439_v29  ;;  %v263_v12 = vld [vmem:[#allocation8 + $0x38] sm:$0xff] }
 0x17d   :  { %v387_v13 = vld [vmem:[#allocation8 + $0x418] sm:$0xff] }
 0x17e   :  { %2019 = vmatpush2.bf16.msra.mxu0 %v2405_v36  ;;  %v431_v36 = vld [vmem:[#allocation8 + $0x578] sm:$0xff] }
 0x17f   :  { %2060 = vmatpush2.bf16.msra.mxu1 %v2533_v37  ;;  %2020 = vmatprep.subr.bf16.mxu0 %v2398_v38  ;;  %v2351_v37 = vcombine.low %v307_v23, %v311_v26  ;;  %v2479_v38 = vcombine.low %v435_v28, %v439_v29  ;;  %v2472_v40 = vcombine.high %v427_v35, %v431_v36  ;;  %v391_v14 = vld [vmem:[#allocation8 + $0x438] sm:$0xff] }
 0x180   :  { %2061 = vmatprep.subr.bf16.mxu1 %v2526_v39  ;;  %v2344_v39 = vcombine.high %v299_v32, %v303_v33  ;;  %v383_v23 = vld [vmem:[#allocation8 + $0x3f8] sm:$0xff]  ;;  %v2431_v29 = vcombine.low %v387_v13, %v391_v14 }
 0x181   :  { %v507_v26 = vld [vmem:[#allocation8 + $0x7d8] sm:$0xff] }
 0x182   :  { %2021 = vmatpush2.bf16.msra.mxu0 %v2397_v44  ;;  %v423_v44 = vld [vmem:[#allocation8 + $0x538] sm:$0xff] }
 0x183   :  { %2062 = vmatpush2.bf16.msra.mxu1 %v2525_v46  ;;  %2022 = vmatprep.subr.bf16.mxu0 %v2390_v47  ;;  %v2343_v46 = vcombine.low %v299_v32, %v303_v33  ;;  %v2471_v47 = vcombine.low %v427_v35, %v431_v36  ;;  %v371_v32 = vld [vmem:[#allocation8 + $0x398] sm:$0xff] }
 0x184   :  { %2063 = vmatprep.subr.bf16.mxu1 %v2518_v48  ;;  %v2336_v48 = vcombine.high %v291_v41, %v295_v42  ;;  %v375_v33 = vld [vmem:[#allocation8 + $0x3b8] sm:$0xff] }
 0x185   :  { %v503_v35 = vld [vmem:[#allocation8 + $0x7b8] sm:$0xff] }
 0x186   :  { %2023 = vmatpush2.bf16.msra.mxu0 %v2389_v56  ;;  %v2463_v56 = vcombine.low %v419_v43, %v423_v44 }
 0x187   :  { %2064 = vmatpush2.bf16.msra.mxu1 %v2517_v57  ;;  %2024 = vmatprep.subr.bf16.mxu0 %v2382_v58  ;;  %v2328_v57 = vcombine.high %v283_v49, %v287_v50  ;;  %v2456_v58 = vcombine.high %v411_v54, %v415_v55  ;;  %v359_v49 = vld [vmem:[#allocation8 + $0x338] sm:$0xff] }
 0x188   :  { %2065 = vmatprep.subr.bf16.mxu1 %v2510_v59  ;;  %v275_v59 = vld [vmem:[#allocation8 + $0x98] sm:$0xff] }
 0x189   :  { %v2319_v7 = vcombine.low %v275_v59, %v279_v60  ;;  %v483_v50 = vld [vmem:[#allocation8 + $0x718] sm:$0xff] }
 0x18a   :  { %2025 = vmatpush2.bf16.msra.mxu0 %v2381_v0  ;;  %v2455_v0 = vcombine.low %v411_v54, %v415_v55  ;;  %v487_v54 = vld [vmem:[#allocation8 + $0x738] sm:$0xff] }
 0x18b   :  { %2066 = vmatpush2.bf16.msra.mxu1 %v2509_v1  ;;  %2026 = vmatprep.subr.bf16.mxu0 %v2374_v2  ;;  %v2320_v1 = vcombine.high %v275_v59, %v279_v60  ;;  %v2448_v2 = vcombine.high %v403_v61, %v407_v62  ;;  %v351_v59 = vld [vmem:[#allocation8 + $0x2f8] sm:$0xff] }
 0x18c   :  { %2067 = vmatprep.subr.bf16.mxu1 %v2502_v3  ;;  %v267_v3 = vld [vmem:[#allocation8 + $0x58] sm:$0xff] }
 0x18d   :  { %v2311_v15 = vcombine.low %v267_v3, %v271_v4  ;;  %v475_v60 = vld [vmem:[#allocation8 + $0x6d8] sm:$0xff] }
 0x18e   :  { %2027 = vmatpush2.bf16.msra.mxu0 %v2373_v8  ;;  %v2447_v8 = vcombine.low %v403_v61, %v407_v62  ;;  %v479_v61 = vld [vmem:[#allocation8 + $0x6f8] sm:$0xff] }
 0x18f   :  { %2068 = vmatpush2.bf16.msra.mxu1 %v2501_v9  ;;  %2028 = vmatprep.subr.bf16.mxu0 %v2366_v10  ;;  %v2312_v9 = vcombine.high %v267_v3, %v271_v4  ;;  %v2440_v10 = vcombine.high %v395_v5, %v399_v6  ;;  %v343_v3 = vld [vmem:[#allocation8 + $0x2b8] sm:$0xff] }
 0x190   :  { %2069 = vmatprep.subr.bf16.mxu1 %v2494_v11  ;;  %v259_v11 = vld [vmem:[#allocation8 + $0x18] sm:$0xff] }
 0x191   :  { %v2303_v28 = vcombine.low %v259_v11, %v263_v12  ;;  %v467_v4 = vld [vmem:[#allocation8 + $0x698] sm:$0xff] }
 0x192   :  { %2029 = vmatpush2.bf16.msra.mxu0 %v2365_v16  ;;  %v2439_v16 = vcombine.low %v395_v5, %v399_v6  ;;  %v471_v5 = vld [vmem:[#allocation8 + $0x6b8] sm:$0xff] }
 0x193   :  { %2070 = vmatpush2.bf16.msra.mxu1 %v2493_v17  ;;  %2080 = vmatprep.subr.bf16.mxu0 %v2360_v18  ;;  %v2304_v17 = vcombine.high %v259_v11, %v263_v12  ;;  %v2432_v18 = vcombine.high %v387_v13, %v391_v14  ;;  %v335_v11 = vld [vmem:[#allocation8 + $0x278] sm:$0xff] }
 0x194   :  { %2121 = vmatprep.subr.bf16.mxu1 %v2488_v19  ;;  %v379_v19 = vld [vmem:[#allocation8 + $0x3d8] sm:$0xff] }
 0x195   :  { %2031 = vmatmul.mubr.bf16.vlgmr.msra.gmra.mxu0 %v2777_v53  ;;  %v2423_v36 = vcombine.low %v379_v19, %v383_v23  ;;  %v459_v12 = vld [vmem:[#allocation8 + $0x658] sm:$0xff] }
 0x196   :  { %2072 = vmatmul.mubr.bf16.vlgmr.msra.gmra.mxu1 %v2771_v45  ;;  %2081 = vmatpush1.bf16.msra.mxu0 %v2359_v27  ;;  %v511_v27 = vld [vmem:[#allocation8 + $0x7f8] sm:$0xff] }
 0x197   :  { %2112 = vmatprep.mubr.bf16.mxu0 %v2773_v51  ;;  %2122 = vmatpush1.bf16.msra.mxu1 %v2487_v30  ;;  %v2464_v51 = vcombine.high %v419_v43, %v423_v44  ;;  %v2424_v30 = vcombine.high %v379_v19, %v383_v23  ;;  %v495_v43 = vld [vmem:[#allocation8 + $0x778] sm:$0xff]  ;;  %v2415_v44 = vcombine.low %v371_v32, %v375_v33 }
 0x198   :  { %2153 = vmatprep.mubr.bf16.mxu1 %v2775_v52  ;;  %2082 = vmatprep.subr.bf16.mxu0 %v2352_v31  ;;  %v2335_v52 = vcombine.low %v291_v41, %v295_v42  ;;  %v2552_v31 = vcombine.high %v507_v26, %v511_v27  ;;  %v367_v41 = vld [vmem:[#allocation8 + $0x378] sm:$0xff] }
 0x199   :  { %2123 = vmatprep.subr.bf16.mxu1 %v2480_v34  ;;  %v499_v34 = vld [vmem:[#allocation8 + $0x798] sm:$0xff] }
 0x19a   :  { %2083 = vmatpush1.bf16.msra.mxu0 %v2351_v37  ;;  %v2551_v37 = vcombine.low %v507_v26, %v511_v27  ;;  %v491_v42 = vld [vmem:[#allocation8 + $0x758] sm:$0xff] }
 0x19b   :  { %2124 = vmatpush1.bf16.msra.mxu1 %v2479_v38  ;;  %2084 = vmatprep.subr.bf16.mxu0 %v2344_v39  ;;  %v2416_v38 = vcombine.high %v371_v32, %v375_v33  ;;  %v2544_v39 = vcombine.high %v499_v34, %v503_v35  ;;  %v463_v13 = vld [vmem:[#allocation8 + $0x678] sm:$0xff] }
 0x19c   :  { %2125 = vmatprep.subr.bf16.mxu1 %v2472_v40  ;;  %v363_v40 = vld [vmem:[#allocation8 + $0x358] sm:$0xff] }
 0x19d   :  { %v2407_v55 = vcombine.low %v363_v40, %v367_v41  ;;  %v327_v19 = vld [vmem:[#allocation8 + $0x238] sm:$0xff] }
 0x19e   :  { %2085 = vmatpush1.bf16.msra.mxu0 %v2343_v46  ;;  %v2543_v46 = vcombine.low %v499_v34, %v503_v35  ;;  %v451_v23 = vld [vmem:[#allocation8 + $0x618] sm:$0xff]  ;;  %v2798_v34 = vld [vmem:[#allocation10] sm:$0xff] }
 0x19f   :  { %2126 = vmatpush1.bf16.msra.mxu1 %v2471_v47  ;;  %2086 = vmatprep.subr.bf16.mxu0 %v2336_v48  ;;  %v2408_v47 = vcombine.high %v363_v40, %v367_v41  ;;  %v2536_v48 = vcombine.high %v491_v42, %v495_v43  ;;  %v455_v26 = vld [vmem:[#allocation8 + $0x638] sm:$0xff] }
 0x1a0   :  { %2127 = vmatprep.subr.bf16.mxu1 %v2464_v51  ;;  %v355_v51 = vld [vmem:[#allocation8 + $0x318] sm:$0xff]  ;;  %v2495_v32 = vcombine.low %v451_v23, %v455_v26 }
 0x1a1   :  { %v2399_v62 = vcombine.low %v355_v51, %v359_v49  ;;  %v2796_v33 = vld [vmem:[%s2846_s4] sm:$0xff] }
 0x1a2   :  { %2087 = vmatpush1.bf16.msra.mxu0 %v2335_v52  ;;  %v2535_v52 = vcombine.low %v491_v42, %v495_v43  ;;  %v517_v35 = vrot.slane %v2796_v33, %v2758_v21 }
 0x1a3   :  { %2128 = vmatpush1.bf16.msra.mxu1 %v2463_v56  ;;  %2088 = vmatprep.subr.bf16.mxu0 %v2328_v57  ;;  %v2400_v56 = vcombine.high %v355_v51, %v359_v49  ;;  %v2528_v57 = vcombine.high %v483_v50, %v487_v54 }
 0x1a4   :  { %2129 = vmatprep.subr.bf16.mxu1 %v2456_v58  ;;  %v347_v58 = vld [vmem:[#allocation8 + $0x2d8] sm:$0xff] }
 0x1a5   :  { %v2391_v6 = vcombine.low %v347_v58, %v351_v59 }
 0x1a6   :  { %2089 = vmatpush1.bf16.msra.mxu0 %v2327_v63  ;;  %v2527_v63 = vcombine.low %v483_v50, %v487_v54 }
 0x1a7   :  { %2130 = vmatpush1.bf16.msra.mxu1 %v2455_v0  ;;  %2090 = vmatprep.subr.bf16.mxu0 %v2320_v1  ;;  %v2392_v0 = vcombine.high %v347_v58, %v351_v59  ;;  %v2520_v1 = vcombine.high %v475_v60, %v479_v61  ;;  %v532_v58 = vsub.s32 4, %v2755_v20  ;;  %v525_v59 = vrot.slane %v2796_v33, %v2761_v22 }
 0x1a8   :  { %2131 = vmatprep.subr.bf16.mxu1 %v2448_v2  ;;  %v339_v2 = vld [vmem:[#allocation8 + $0x298] sm:$0xff] }
 0x1a9   :  { %v2383_v14 = vcombine.low %v339_v2, %v343_v3 }
 0x1aa   :  { %2091 = vmatpush1.bf16.msra.mxu0 %v2319_v7  ;;  %v2519_v7 = vcombine.low %v475_v60, %v479_v61  ;;  %v2816_v60 = vsub.s32 6, %v2755_v20 }
 0x1ab   :  { %2132 = vmatpush1.bf16.msra.mxu1 %v2447_v8  ;;  %2092 = vmatprep.subr.bf16.mxu0 %v2312_v9  ;;  %v2384_v8 = vcombine.high %v339_v2, %v343_v3  ;;  %v2512_v9 = vcombine.high %v467_v4, %v471_v5 }
 0x1ac   :  { %2133 = vmatprep.subr.bf16.mxu1 %v2440_v10  ;;  %v331_v10 = vld [vmem:[#allocation8 + $0x258] sm:$0xff] }
 0x1ad   :  { %v2375_v27 = vcombine.low %v331_v10, %v335_v11 }
 0x1ae   :  { %2093 = vmatpush1.bf16.msra.mxu0 %v2311_v15  ;;  %v2511_v15 = vcombine.low %v467_v4, %v471_v5 }
 0x1af   :  { %2134 = vmatpush1.bf16.msra.mxu1 %v2439_v16  ;;  %2094 = vmatprep.subr.bf16.mxu0 %v2304_v17  ;;  %v2376_v16 = vcombine.high %v331_v10, %v335_v11  ;;  %v2504_v17 = vcombine.high %v459_v12, %v463_v13 }
 0x1b0   :  { %2135 = vmatprep.subr.bf16.mxu1 %v2432_v18  ;;  %v323_v18 = vld [vmem:[#allocation8 + $0x218] sm:$0xff] }
 0x1b2   :  { %2095 = vmatpush1.bf16.msra.mxu0 %v2303_v28  ;;  %v2503_v28 = vcombine.low %v459_v12, %v463_v13 }
 0x1b3   :  { %2136 = vmatpush1.bf16.msra.mxu1 %v2431_v29  ;;  %2096 = vmatprep.subr.bf16.mxu0 %v2424_v30  ;;  %v2368_v29 = vcombine.high %v323_v18, %v327_v19  ;;  %v2496_v30 = vcombine.high %v451_v23, %v455_v26 }
 0x1b4   :  { %2137 = vmatprep.subr.bf16.mxu1 %v2552_v31  ;;  %v2367_v31 = vcombine.low %v323_v18, %v327_v19 }
 0x1b6   :  { %2097 = vmatpush2.bf16.msra.mxu0 %v2423_v36  ;;  %v2171_v36 = vunpack.c.l.bf16 %v2798_v34 }
 0x1b7   :  { %2138 = vmatpush2.bf16.msra.mxu1 %v2551_v37  ;;  %2098 = vmatprep.subr.bf16.mxu0 %v2416_v38  ;;  %v521_v37 = vrot.slane %v2796_v33, %v108_v24 }
 0x1b8   :  { %2139 = vmatprep.subr.bf16.mxu1 %v2544_v39  ;;  %v2178_v41 = vrot.slane %v2171_v36, %v2758_v21  ;;  %v2182_v42 = vrot.slane %v2171_v36, %v2761_v22  ;;  %v2186_v61 = vrot.slane %v2171_v36, %v532_v58  ;;  %v2190_v2 = vrot.slane %v2171_v36, %v2816_v60 }
 0x1b9   :  { %v2172_v36 = vunpack.c.h.bf16 %v2798_v34 }
 0x1ba   :  { %2099 = vmatpush2.bf16.msra.mxu0 %v2415_v44  ;;  %v2218_v24 = vrot.slane %v2178_v41, %v2758_v21  ;;  %v2230_v12 = vrot.slane %v2190_v2, %v2758_v21 }
 0x1bb   :  { %2140 = vmatpush2.bf16.msra.mxu1 %v2543_v46  ;;  %2100 = vmatprep.subr.bf16.mxu0 %v2408_v47 }
 0x1bc   :  { %2141 = vmatprep.subr.bf16.mxu1 %v2536_v48 }
 0x1be   :  { %2101 = vmatpush2.bf16.msra.mxu0 %v2407_v55 }
 0x1bf   :  { %2142 = vmatpush2.bf16.msra.mxu1 %v2535_v52  ;;  %2102 = vmatprep.subr.bf16.mxu0 %v2400_v56 }
 0x1c0   :  { %2143 = vmatprep.subr.bf16.mxu1 %v2528_v57 }
 0x1c2   :  { %2103 = vmatpush2.bf16.msra.mxu0 %v2399_v62  ;;  %v529_v62 = vrot.slane %v2796_v33, %v116_v25 }
 0x1c3   :  { %2144 = vmatpush2.bf16.msra.mxu1 %v2527_v63  ;;  %2104 = vmatprep.subr.bf16.mxu0 %v2392_v0 }
 0x1c4   :  { %2145 = vmatprep.subr.bf16.mxu1 %v2520_v1 }
 0x1c6   :  { %2105 = vmatpush2.bf16.msra.mxu0 %v2391_v6  ;;  %v2226_v6 = vrot.slane %v2186_v61, %v2758_v21 }
 0x1c7   :  { %2146 = vmatpush2.bf16.msra.mxu1 %v2519_v7  ;;  %2106 = vmatprep.subr.bf16.mxu0 %v2384_v8 }
 0x1c8   :  { %2147 = vmatprep.subr.bf16.mxu1 %v2512_v9 }
 0x1ca   :  { %2107 = vmatpush2.bf16.msra.mxu0 %v2383_v14 }
 0x1cb   :  { %2148 = vmatpush2.bf16.msra.mxu1 %v2511_v15  ;;  %2108 = vmatprep.subr.bf16.mxu0 %v2376_v16 }
 0x1cc   :  { %2149 = vmatprep.subr.bf16.mxu1 %v2504_v17 }
 0x1ce   :  { %2109 = vmatpush2.bf16.msra.mxu0 %v2375_v27 }
 0x1cf   :  { %2150 = vmatpush2.bf16.msra.mxu1 %v2503_v28  ;;  %2110 = vmatprep.subr.bf16.mxu0 %v2368_v29 }
 0x1d0   :  { %2151 = vmatprep.subr.bf16.mxu1 %v2496_v30 }
 0x1d2   :  { %2111 = vmatpush2.bf16.msra.mxu0 %v2367_v31 }
 0x1d3   :  { %2152 = vmatpush2.bf16.msra.mxu1 %v2495_v32  ;;  %v533_v32 = vrot.slane %v2796_v33, %v532_v58 }
 0x1d5   :  { %2113 = vmatmul.mubr.bf16.vlgmr.msra.gmra.mxu0 %v2777_v53  ;;  %v1868_v38 = vpop.f32.mrf.mxu0  ;;  %v2222_v53 = vrot.slane %v2182_v42, %v2758_v21 }
 0x1d6   :  { %v1909_v39 = vpop.f32.mrf.mxu1  ;;  %2154 = vmatmul.mubr.bf16.vlgmr.msra.gmra.mxu1 %v2771_v45  ;;  %v1869_v40 = vadd.f32 %v1868_v38, %v517_v35  ;;  %v536_v35 = vsub.s32 5, %v2755_v20 }
 0x1d7   :  { %v1870_v43 = vpop.f32.mrf.mxu0 }
 0x1d8   :  { %v1911_v44 = vpop.f32.mrf.mxu1  ;;  %v1910_v46 = vadd.f32 %v1909_v39, %v1869_v40  ;;  %v1871_v47 = vadd.f32 %v1870_v43, %v521_v37  ;;  %v537_v38 = vrot.slane %v2796_v33, %v536_v35  ;;  %v2194_v39 = vrot.slane %v2172_v36, %v2758_v21 }
 0x1d9   :  { %v1872_v48 = vpop.f32.mrf.mxu0 }
 0x1da   :  { %v1913_v51 = vpop.f32.mrf.mxu1  ;;  %v2162_v49 = vmax.f32 %v1910_v46, 0.0  ;;  %v1912_v50 = vadd.f32 %v1911_v44, %v1871_v47  ;;  %v2234_v42 = vrot.slane %v2194_v39, %v2758_v21  ;;  %v2198_v46 = vrot.slane %v2172_v36, %v2761_v22 }
 0x1db   :  { %v1873_v54 = vpop.f32.mrf.mxu0  ;;  %v544_v47 = vsub.s32 7, %v2755_v20  ;;  %v541_v48 = vrot.slane %v2796_v33, %v2816_v60  ;;  %v2202_v51 = vrot.slane %v2172_v36, %v532_v58 }
 0x1dc   :  { %v1914_v55 = vpop.f32.mrf.mxu1  ;;  %v2163_v45 = vmax.f32 %v1912_v50, 0.0  ;;  %v2247_v52 = vmul.f32 %v2218_v24, %v2162_v49  ;;  %v2238_v24 = vrot.slane %v2198_v46, %v2758_v21 }
 0x1dd   :  { %v545_v50 = vrot.slane %v2796_v33, %v544_v47 }
 0x1de   :  { %v2248_v56 = vmul.f32 %v2222_v53, %v2163_v45  ;;  %v2206_v45 = vrot.slane %v2172_v36, %v2816_v60 }
 0x1e0   :  { %v2255_v57 = vadd.f32 %v2248_v56, %v2247_v52  ;;  %v2242_v52 = vrot.slane %v2202_v51, %v2758_v21 }
 0x215   :  { %v1950_v63 = vpop.f32.mrf.mxu0 }
 0x216   :  { %v1991_v0 = vpop.f32.mrf.mxu1  ;;  %v1951_v1 = vadd.f32 %v1950_v63, %v525_v59 }
 0x217   :  { %v1952_v3 = vpop.f32.mrf.mxu0 }
 0x218   :  { %v1993_v4 = vpop.f32.mrf.mxu1  ;;  %v1992_v5 = vadd.f32 %v1991_v0, %v1951_v1  ;;  %v1953_v7 = vadd.f32 %v1952_v3, %v529_v62  ;;  %v2246_v1 = vrot.slane %v2206_v45, %v2758_v21 }
 0x219   :  { %v1954_v8 = vpop.f32.mrf.mxu0 }
 0x21a   :  { %v1995_v9 = vpop.f32.mrf.mxu1  ;;  %v2164_v10 = vmax.f32 %v1992_v5, 0.0  ;;  %v1994_v11 = vadd.f32 %v1993_v4, %v1953_v7  ;;  %v2553_v8 = vld [vmem:[#allocation2] ss:$0 sm:$0xff] }
 0x21b   :  { %v1955_v13 = vpop.f32.mrf.mxu0 }
 0x21c   :  { %v1996_v14 = vpop.f32.mrf.mxu1  ;;  %v2249_v25 = vmul.f32 %v2226_v6, %v2164_v10  ;;  %v2165_v15 = vmax.f32 %v1994_v11, 0.0 }
 0x21e   :  { %v2256_v16 = vadd.f32 %v2255_v57, %v2249_v25  ;;  %v2250_v17 = vmul.f32 %v2230_v12, %v2165_v15 }
 0x220   :  { %v2257_v18 = vadd.f32 %v2256_v16, %v2250_v17 }
 0x255   :  { %v2032_v19 = vpop.f32.mrf.mxu0 }
 0x256   :  { %v2073_v23 = vpop.f32.mrf.mxu1  ;;  %v2033_v37 = vadd.f32 %v2032_v19, %v533_v32 }
 0x257   :  { %v2034_v26 = vpop.f32.mrf.mxu0 }
 0x258   :  { %v2075_v27 = vpop.f32.mrf.mxu1  ;;  %v2074_v40 = vadd.f32 %v2073_v23, %v2033_v37  ;;  %v2035_v41 = vadd.f32 %v2034_v26, %v537_v38 }
 0x259   :  { %v2036_v28 = vpop.f32.mrf.mxu0 }
 0x25a   :  { %v2077_v29 = vpop.f32.mrf.mxu1  ;;  %v2166_v43 = vmax.f32 %v2074_v40, 0.0  ;;  %v2076_v44 = vadd.f32 %v2075_v27, %v2035_v41 }
 0x25b   :  { %v2037_v30 = vpop.f32.mrf.mxu0 }
 0x25c   :  { %v2078_v31 = vpop.f32.mrf.mxu1  ;;  %v2251_v34 = vmul.f32 %v2234_v42, %v2166_v43  ;;  %v2167_v49 = vmax.f32 %v2076_v44, 0.0 }
 0x25e   :  { %v2258_v56 = vadd.f32 %v2257_v18, %v2251_v34  ;;  %v2252_v20 = vmul.f32 %v2238_v24, %v2167_v49 }
 0x260   :  { %v2259_v5 = vadd.f32 %v2258_v56, %v2252_v20 }
 0x295   :  { %v2114_v53 = vpop.f32.mrf.mxu0 }
 0x296   :  { %v2115_v54 = vadd.f32 %v2114_v53, %v541_v48  ;;  %v2155_v55 = vpop.f32.mrf.mxu1 }
 0x297   :  { %v2116_v22 = vpop.f32.mrf.mxu0 }
 0x298   :  { %v2156_v57 = vadd.f32 %v2155_v55, %v2115_v54  ;;  %v2117_v59 = vadd.f32 %v2116_v22, %v545_v50  ;;  %v2157_v61 = vpop.f32.mrf.mxu1 }
 0x299   :  { %v2118_v58 = vpop.f32.mrf.mxu0 }
 0x29a   :  { %v2168_v62 = vmax.f32 %v2156_v57, 0.0  ;;  %v2158_v63 = vadd.f32 %v2157_v61, %v2117_v59  ;;  %v2159_v0 = vpop.f32.mrf.mxu1 }
 0x29b   :  { %v2119_v33 = vpop.f32.mrf.mxu0 }
 0x29c   :  { %v2253_v2 = vmul.f32 %v2242_v52, %v2168_v62  ;;  %v2169_v3 = vmax.f32 %v2158_v63, 0.0  ;;  %v2160_v4 = vpop.f32.mrf.mxu1 }
 0x29e   :  { %v2254_v60 = vmul.f32 %v2246_v1, %v2169_v3  ;;  %v2260_v6 = vadd.f32 %v2259_v5, %v2253_v2 }
 0x2a0   :  { %v2261_v7 = vadd.f32 %v2260_v6, %v2254_v60 }
 0x2a2   :  { %2262 = vadd.xlane.f32.xlu0 %v2261_v7 }
 0x32b   :  { %v2263_v9 = vpop.xlane.xlu0 %2262 }
 0x32c   :  { %v2271_v10 = vadd.f32 %v2553_v8, %v2263_v9 }
 0x32e   :  { %v2554_v11 = vmul.f32 -1.442695, %v2271_v10 }
 0x330   :  { %2577 = vpow2.f32 %v2554_v11 }
 0x33d   :  { %v2578_v12 = vpop.eup %2577 }
 0x33e   :  { %v2275_v13 = vadd.f32 1.0, %v2578_v12 }
 0x340   :  { %2579 = vrcp.f32 %v2275_v13 }
 0x34d   :  { %v2580_v14 = vpop.eup %2579 }
 0x34e   :  { %2279 = vst.msk [vmem:[%s2849_s7] sm:$0xff] %vm2278_vm1, %v2580_v14 }
 0x34f   :  { %2284 = vsyncpa [#allocation4], 1 }
 0x350   :  { %2285 = vsyncpa [#allocation6], 1 }
 0x351   :  { %2286 = vsyncpa [#allocation9], 1 }

</bundles_post_ra>
